<compile_context>
chip_gen: v7x
topology: tpu7x:2x2x1
jax: 0.10.0
libtpu: 0.0.40
codegen_flags: <defaults>
</compile_context>

<pallas_src>
import jax
import jax.numpy as jnp
from jax import lax
from jax.experimental import pallas as pl
from jax.experimental.pallas import tpu as pltpu


# ----------------------------------------------------------------------------
# Fused kernel: 4x Non_local_Block (per quadrant) + reassembly + 3x3 conv/BN/SiLU
# One grid step == one batch image.
# ----------------------------------------------------------------------------
def _patch_nonlocal_conv_kernel(x_ref, wqkv_ref, bqkv_ref, wo_ref, bo_ref,
                                wc_ref, bias_ref, o_ref, pad_ref):
    f32, bf16 = jnp.float32, jnp.bfloat16
    _, H, W, C = x_ref.shape
    h2, w2 = H // 2, W // 2
    HWq = h2 * w2
    Ci = wo_ref.shape[1]
    Cout = wc_ref.shape[2]

    x = x_ref[0]                                        # (H, W, C) bf16

    # Zero only the 1-pixel conv halo; the interior is fully overwritten every step.
    zr = jnp.zeros((1, W + 2, C), pad_ref.dtype)
    zc = jnp.zeros((H, 1, C), pad_ref.dtype)
    pad_ref[0:1, :, :] = zr
    pad_ref[H + 1:H + 2, :, :] = zr
    pad_ref[1:H + 1, 0:1, :] = zc
    pad_ref[1:H + 1, W + 1:W + 2, :] = zc

    # Quadrant order matches the module: p=0 lt, p=1 lb, p=2 rt, p=3 rb.
    quads = ((0, 0), (h2, 0), (0, w2), (h2, w2))        # (row offset, col offset)
    for p, (y0, x0) in enumerate(quads):
        xq = x[y0:y0 + h2, x0:x0 + w2, :].reshape(HWq, C)          # (HWq, C) bf16

        # Fused g|theta|phi 1x1 convs: one matmul, K=C, N=3*Ci (weights pre-transposed,
        # 1/HWq already folded into the theta block of weight AND bias on the host).
        qkv = jnp.dot(xq, wqkv_ref[p], preferred_element_type=f32) + bqkv_ref[p]
        g = qkv[:, 0:Ci]                                            # (HWq, Ci) f32
        th = qkv[:, Ci:2 * Ci]                                      # theta / HWq
        ph = qkv[:, 2 * Ci:3 * Ci]

        # Reassociated non-local product (exact for dot_product mode, no softmax):
        #   y = (theta/HWq) @ (phi^T @ g)   -- no (HWq x HWq) intermediate.
        m = lax.dot_general(ph.astype(bf16), g.astype(bf16),
                            (((0,), (0,)), ((), ())),
                            preferred_element_type=f32)             # (Ci, Ci)
        y = jnp.dot(th.astype(bf16), m.astype(bf16),
                    preferred_element_type=f32)                     # (HWq, Ci)

        # residual + conv_out (1x1), residual upcast to f32
        out = (xq.astype(f32)
               + jnp.dot(y.astype(bf16), wo_ref[p], preferred_element_type=f32)
               + bo_ref[p])                                         # (HWq, C) f32

        # Write the quadrant straight into the padded conv input (fused cat + pad).
        pad_ref[1 + y0:1 + y0 + h2, 1 + x0:1 + x0 + w2, :] = (
            out.reshape(h2, w2, C).astype(pad_ref.dtype))

    # BaseConv 3x3 / stride 1 / pad 1 + eval-BN + SiLU.  BN scale is folded into the
    # weights on the host; the accumulator starts from the BN bias.  Accumulation is in
    # the transposed (Cout, H*W) layout so the single HBM store is lane-dense and
    # already NCHW-ordered.
    xp = pad_ref[...]                                               # (H+2, W+2, C) bf16
    acc = jnp.broadcast_to(bias_ref[...], (Cout, H * W))            # (Cout, HW) f32
    for ky in range(3):
        for kx in range(3):
            patch = xp[ky:ky + H, kx:kx + W, :].reshape(H * W, C)   # bf16
            acc = acc + lax.dot_general(
                wc_ref[ky, kx], patch, (((1,), (1,)), ((), ())),
                preferred_element_type=f32)                         # (Cout, HW)

    o_ref[0] = acc * jax.nn.sigmoid(acc)                            # SiLU, lane-dense


# ----------------------------------------------------------------------------
# Full module forward
# ----------------------------------------------------------------------------
def patch_conv_nonlocal_forward(x_nchw, params):
    # NCHW -> NHWC, staged in bf16 (matmul operands are bf16 anyway; halves HBM read).
    x = jnp.transpose(x_nchw, (0, 2, 3, 1)).astype(jnp.bfloat16)
    N, H, W, C = x.shape
    P, Ci, _ = params["wg"].shape
    Cout = params["conv_w"].shape[-1]
    HWq = (H // 2) * (W // 2)

    # ---- host-side weight prep (all folds done once, outside the kernel) ----
    wg_t = jnp.swapaxes(params["wg"], 1, 2)                   # (P, C, Ci)
    wt_t = jnp.swapaxes(params["wt"], 1, 2) / HWq             # fold 1/HWq into theta
    wp_t = jnp.swapaxes(params["wp"], 1, 2)
    w_qkv = jnp.concatenate([wg_t, wt_t, wp_t], axis=2).astype(jnp.bfloat16)  # (P, C, 3Ci)
    b_qkv = jnp.concatenate(
        [params["bg"], params["bt"] / HWq, params["bp"]], axis=2).astype(jnp.float32)

    wo = jnp.swapaxes(params["wo"], 1, 2).astype(jnp.bfloat16)       # (P, Ci, C)
    bo = params["bo"].astype(jnp.float32)                            # (P, 1, C)

    # 3x3 conv: fold eval-BN scale into the weights, HWIO -> HWOI, bf16.
    wc = params["conv_w"] * params["bn_scale"].reshape(1, 1, 1, Cout)
    wc = jnp.transpose(wc, (0, 1, 3, 2)).astype(jnp.bfloat16)        # (3, 3, Cout, C)
    bias = params["bn_bias"].reshape(Cout, 1).astype(jnp.float32)

    # ---- cost estimate (helps XLA schedule the host-side transposes/casts) ----
    flops = N * (4 * (2 * HWq * C * 3 * Ci          # fused qkv matmul
                      + 4 * HWq * Ci * Ci           # phi^T@g and theta@M
                      + 2 * HWq * Ci * C)           # conv_out 1x1
                 + 2 * 9 * Cout * C * H * W)        # 3x3 conv
    transcendentals = N * Cout * H * W              # sigmoid in SiLU
    bytes_accessed = int(x.size * 2 + N * Cout * H * W * 4
                         + w_qkv.size * 2 + b_qkv.size * 4 + wo.size * 2
                         + bo.size * 4 + wc.size * 2 + bias.size * 4)

    wmap3 = lambda b: (0, 0, 0)
    out = pl.pallas_call(
        _patch_nonlocal_conv_kernel,
        out_shape=jax.ShapeDtypeStruct((N, Cout, H * W), jnp.float32),
        grid_spec=pltpu.PrefetchScalarGridSpec(
            num_scalar_prefetch=0,
            grid=(N,),
            in_specs=[
                pl.BlockSpec((1, H, W, C), lambda b: (b, 0, 0, 0)),     # x (one image)
                pl.BlockSpec((P, C, 3 * Ci), wmap3),                    # fused qkv W
                pl.BlockSpec((P, 1, 3 * Ci), wmap3),                    # fused qkv b
                pl.BlockSpec((P, Ci, C), wmap3),                        # wo
                pl.BlockSpec((P, 1, C), wmap3),                         # bo
                pl.BlockSpec((3, 3, Cout, C), lambda b: (0, 0, 0, 0)),  # conv W (scale folded)
                pl.BlockSpec((Cout, 1), lambda b: (0, 0)),              # bn bias
            ],
            out_specs=pl.BlockSpec((1, Cout, H * W), lambda b: (b, 0, 0)),
            scratch_shapes=[pltpu.VMEM((H + 2, W + 2, C), jnp.bfloat16)],
        ),
        compiler_params=pltpu.CompilerParams(
            dimension_semantics=("parallel",),
            vmem_limit_bytes=32 * 1024 * 1024),
        cost_estimate=pl.CostEstimate(flops=int(flops),
                                      transcendentals=int(transcendentals),
                                      bytes_accessed=bytes_accessed),
    )(x, w_qkv, b_qkv, wo, bo, wc, bias)

    # (N, Cout, H*W) is already NCHW memory order -> free reshape, no transpose pass.
    return out.reshape(N, Cout, H, W)


# ----------------------------------------------------------------------------
# Pure-JAX reference (module semantics in f32, for correctness check)
# ----------------------------------------------------------------------------
def reference_forward(x_nchw, params):
    x = jnp.transpose(x_nchw, (0, 2, 3, 1)).astype(jnp.float32)
    N, H, W, C = x.shape
    h2, w2 = H // 2, W // 2
    HW = h2 * w2
    parts = [x[:, :h2, :w2], x[:, h2:, :w2], x[:, :h2, w2:], x[:, h2:, w2:]]
    outs = []
    for p, xp in enumerate(parts):
        xt = xp.reshape(N, HW, C)
        g = xt @ params["wg"][p].T + params["bg"][p]
        th = xt @ params["wt"][p].T + params["bt"][p]
        ph = xt @ params["wp"][p].T + params["bp"][p]
        pw = (th @ jnp.swapaxes(ph, 1, 2)) / HW
        y = pw @ g
        o = xt + y @ params["wo"][p].T + params["bo"][p]
        outs.append(o.reshape(N, h2, w2, C))
    o_lt, o_lb, o_rt, o_rb = outs
    feat = jnp.concatenate(
        [jnp.concatenate([o_lt, o_rt], axis=2),
         jnp.concatenate([o_lb, o_rb], axis=2)], axis=1)
    z = jax.lax.conv_general_dilated(
        feat, params["conv_w"], window_strides=(1, 1), padding="SAME",
        dimension_numbers=("NHWC", "HWIO", "NHWC"))
    z = z * params["bn_scale"] + params["bn_bias"]
    out = z * jax.nn.sigmoid(z)
    return jnp.transpose(out, (0, 3, 1, 2))


# ----------------------------------------------------------------------------
def make_params(key, in_channel, out_channel, channel_scale=1.0):
    middle = int(channel_scale * in_channel)
    ks = jax.random.split(key, 12)
    P = 4
    p = {
        "wg": 0.1 * jax.random.normal(ks[0], (P, middle, in_channel), jnp.float32),
        "bg": 0.1 * jax.random.normal(ks[1], (P, 1, middle), jnp.float32),
        "wt": 0.1 * jax.random.normal(ks[2], (P, middle, in_channel), jnp.float32),
        "bt": 0.1 * jax.random.normal(ks[3], (P, 1, middle), jnp.float32),
        "wp": 0.1 * jax.random.normal(ks[4], (P, middle, in_channel), jnp.float32),
        "bp": 0.1 * jax.random.normal(ks[5], (P, 1, middle), jnp.float32),
        "wo": 0.1 * jax.random.normal(ks[6], (P, in_channel, middle), jnp.float32),
        "bo": 0.1 * jax.random.normal(ks[7], (P, 1, in_channel), jnp.float32),
        "conv_w": 0.1 * jax.random.normal(ks[8], (3, 3, in_channel, out_channel), jnp.float32),
    }
    # eval-mode BatchNorm (running_mean=0, running_var=1, eps=1e-3) folded to scale/bias
    gamma = 1.0 + 0.1 * jax.random.normal(ks[9], (out_channel,), jnp.float32)
    beta = 0.1 * jax.random.normal(ks[10], (out_channel,), jnp.float32)
    eps = 1e-3
    p["bn_scale"] = gamma / jnp.sqrt(1.0 + eps)
    p["bn_bias"] = beta
    return p


if __name__ == "__main__":
    key = jax.random.PRNGKey(0)
    k_x, k_p = jax.random.split(key)

    N, C, H, W = 2, 4, 16, 16          # small shapes consistent with the module
    out_channel = 8
    x = jax.random.normal(k_x, (N, C, H, W), jnp.float32)
    params = make_params(k_p, in_channel=C, out_channel=out_channel, channel_scale=1.0)

    fwd = jax.jit(patch_conv_nonlocal_forward)
    out = jax.block_until_ready(fwd(x, params))

    ref = jax.block_until_ready(reference_forward(x, params))
    assert out.shape == (N, out_channel, H, W)
    # bf16-staged input + bf16 matmul operands with f32 accumulation vs f32 reference
    assert jnp.allclose(out, ref, rtol=2e-2, atol=2e-2)

    print("KERNEL_OK")
</pallas_src>

<mosaic_0001>
module attributes {stable_mosaic.version = 11 : i64} {
  func.func @_patch_nonlocal_conv_kernel(%arg0: i32, %arg1: memref<1x16x16x4xbf16, #tpu.memory_space<vmem>>, %arg2: memref<4x4x12xbf16, #tpu.memory_space<vmem>>, %arg3: memref<4x1x12xf32, #tpu.memory_space<vmem>>, %arg4: memref<4x4x4xbf16, #tpu.memory_space<vmem>>, %arg5: memref<4x1x4xf32, #tpu.memory_space<vmem>>, %arg6: memref<3x3x8x4xbf16, #tpu.memory_space<vmem>>, %arg7: memref<8x1xf32, #tpu.memory_space<vmem>>, %arg8: memref<1x8x256xf32, #tpu.memory_space<vmem>>, %arg9: memref<18x18x4xbf16, #tpu.memory_space<vmem>>) attributes {dimension_semantics = [#tpu.dimension_semantics<parallel>], iteration_bounds = array<i64: 2>, scalar_prefetch = 0 : i64, scratch_operands = 1 : i64, tpu.core_type = #tpu.core_type<tc>, window_params = [{transform_indices = @transform_0, window_bounds = array<i64: 1, 16, 16, 4>}, {pipeline_mode = #tpu.pipeline_mode<synchronous>, transform_indices = @transform_1, window_bounds = array<i64: 4, 4, 12>}, {pipeline_mode = #tpu.pipeline_mode<synchronous>, transform_indices = @transform_2, window_bounds = array<i64: 4, 1, 12>}, {pipeline_mode = #tpu.pipeline_mode<synchronous>, transform_indices = @transform_3, window_bounds = array<i64: 4, 4, 4>}, {pipeline_mode = #tpu.pipeline_mode<synchronous>, transform_indices = @transform_4, window_bounds = array<i64: 4, 1, 4>}, {pipeline_mode = #tpu.pipeline_mode<synchronous>, transform_indices = @transform_5, window_bounds = array<i64: 3, 3, 8, 4>}, {pipeline_mode = #tpu.pipeline_mode<synchronous>, transform_indices = @transform_6, window_bounds = array<i64: 8, 1>}, {transform_indices = @transform_7, window_bounds = array<i64: 1, 8, 256>}]} {
    %c0 = arith.constant 0 : index
    %c0_0 = arith.constant 0 : index
    %c0_1 = arith.constant 0 : index
    %c0_2 = arith.constant 0 : index
    %0 = vector.load %arg1[%c0, %c0_0, %c0_1, %c0_2] : memref<1x16x16x4xbf16, #tpu.memory_space<vmem>>, vector<1x16x16x4xbf16>
    %1 = vector.shape_cast %0 : vector<1x16x16x4xbf16> to vector<16x16x4xbf16>
    %cst = arith.constant 0.000000e+00 : bf16
    %2 = vector.broadcast %cst : bf16 to vector<1x18x4xbf16>
    %cst_3 = arith.constant 0.000000e+00 : bf16
    %3 = vector.broadcast %cst_3 : bf16 to vector<16x1x4xbf16>
    %c0_4 = arith.constant 0 : index
    %c0_5 = arith.constant 0 : index
    %c0_6 = arith.constant 0 : index
    %4 = vector.load %arg9[%c0_4, %c0_5, %c0_6] : memref<18x18x4xbf16, #tpu.memory_space<vmem>>, vector<1x18x4xbf16>
    tpu.vector_store %arg9[%c0_4, %c0_5, %c0_6], %2 {strides = array<i32>} : memref<18x18x4xbf16, #tpu.memory_space<vmem>>, vector<1x18x4xbf16>,
    %c17 = arith.constant 17 : index
    %c0_7 = arith.constant 0 : index
    %c0_8 = arith.constant 0 : index
    %5 = vector.load %arg9[%c17, %c0_7, %c0_8] : memref<18x18x4xbf16, #tpu.memory_space<vmem>>, vector<1x18x4xbf16>
    tpu.vector_store %arg9[%c17, %c0_7, %c0_8], %2 {strides = array<i32>} : memref<18x18x4xbf16, #tpu.memory_space<vmem>>, vector<1x18x4xbf16>,
    %c1 = arith.constant 1 : index
    %c0_9 = arith.constant 0 : index
    %c0_10 = arith.constant 0 : index
    %6 = vector.load %arg9[%c1, %c0_9, %c0_10] : memref<18x18x4xbf16, #tpu.memory_space<vmem>>, vector<16x1x4xbf16>
    tpu.vector_store %arg9[%c1, %c0_9, %c0_10], %3 {strides = array<i32>} : memref<18x18x4xbf16, #tpu.memory_space<vmem>>, vector<16x1x4xbf16>,
    %c1_11 = arith.constant 1 : index
    %c17_12 = arith.constant 17 : index
    %c0_13 = arith.constant 0 : index
    %7 = vector.load %arg9[%c1_11, %c17_12, %c0_13] : memref<18x18x4xbf16, #tpu.memory_space<vmem>>, vector<16x1x4xbf16>
    tpu.vector_store %arg9[%c1_11, %c17_12, %c0_13], %3 {strides = array<i32>} : memref<18x18x4xbf16, #tpu.memory_space<vmem>>, vector<16x1x4xbf16>,
    %8 = vector.extract_strided_slice %1 {offsets = [0, 0, 0], sizes = [8, 8, 4], strides = [1, 1, 1]} : vector<16x16x4xbf16> to vector<8x8x4xbf16>
    %9 = vector.shape_cast %8 : vector<8x8x4xbf16> to vector<64x4xbf16>
    %c0_14 = arith.constant 0 : index
    %c0_15 = arith.constant 0 : index
    %c0_16 = arith.constant 0 : index
    %10 = vector.load %arg2[%c0_14, %c0_15, %c0_16] : memref<4x4x12xbf16, #tpu.memory_space<vmem>>, vector<1x4x12xbf16>
    %11 = vector.shape_cast %10 : vector<1x4x12xbf16> to vector<4x12xbf16>
    %cst_17 = arith.constant dense<0.000000e+00> : vector<64x12xf32>
    %12 = tpu.matmul %9, %11, %cst_17 {dimension_numbers = #tpu.dot_dimension_numbers<[1], [0], [0], [1], [0, 0, 1, 1], [], []>} : vector<64x4xbf16>, vector<4x12xbf16>, vector<64x12xf32> -> vector<64x12xf32>
    %c0_18 = arith.constant 0 : index
    %c0_19 = arith.constant 0 : index
    %c0_20 = arith.constant 0 : index
    %13 = vector.load %arg3[%c0_18, %c0_19, %c0_20] : memref<4x1x12xf32, #tpu.memory_space<vmem>>, vector<1x1x12xf32>
    %14 = vector.shape_cast %13 : vector<1x1x12xf32> to vector<1x12xf32>
    %15 = vector.broadcast %14 : vector<1x12xf32> to vector<64x12xf32>
    %16 = arith.addf %12, %15 : vector<64x12xf32>
    %17 = vector.extract_strided_slice %16 {offsets = [0, 0], sizes = [64, 4], strides = [1, 1]} : vector<64x12xf32> to vector<64x4xf32>
    %18 = vector.extract_strided_slice %16 {offsets = [0, 4], sizes = [64, 4], strides = [1, 1]} : vector<64x12xf32> to vector<64x4xf32>
    %19 = vector.extract_strided_slice %16 {offsets = [0, 8], sizes = [64, 4], strides = [1, 1]} : vector<64x12xf32> to vector<64x4xf32>
    %20 = arith.truncf %19 : vector<64x4xf32> to vector<64x4xbf16>
    %21 = arith.truncf %17 : vector<64x4xf32> to vector<64x4xbf16>
    %cst_21 = arith.constant dense<0.000000e+00> : vector<4x4xf32>
    %22 = tpu.matmul %20, %21, %cst_21 {dimension_numbers = #tpu.dot_dimension_numbers<[0], [0], [1], [1], [0, 1, 1, 1], [], []>} : vector<64x4xbf16>, vector<64x4xbf16>, vector<4x4xf32> -> vector<4x4xf32>
    %23 = arith.truncf %18 : vector<64x4xf32> to vector<64x4xbf16>
    %24 = arith.truncf %22 : vector<4x4xf32> to vector<4x4xbf16>
    %cst_22 = arith.constant dense<0.000000e+00> : vector<64x4xf32>
    %25 = tpu.matmul %23, %24, %cst_22 {dimension_numbers = #tpu.dot_dimension_numbers<[1], [0], [0], [1], [0, 0, 1, 1], [], []>} : vector<64x4xbf16>, vector<4x4xbf16>, vector<64x4xf32> -> vector<64x4xf32>
    %26 = arith.extf %9 : vector<64x4xbf16> to vector<64x4xf32>
    %27 = arith.truncf %25 : vector<64x4xf32> to vector<64x4xbf16>
    %c0_23 = arith.constant 0 : index
    %c0_24 = arith.constant 0 : index
    %c0_25 = arith.constant 0 : index
    %28 = vector.load %arg4[%c0_23, %c0_24, %c0_25] : memref<4x4x4xbf16, #tpu.memory_space<vmem>>, vector<1x4x4xbf16>
    %29 = vector.shape_cast %28 : vector<1x4x4xbf16> to vector<4x4xbf16>
    %cst_26 = arith.constant dense<0.000000e+00> : vector<64x4xf32>
    %30 = tpu.matmul %27, %29, %cst_26 {dimension_numbers = #tpu.dot_dimension_numbers<[1], [0], [0], [1], [0, 0, 1, 1], [], []>} : vector<64x4xbf16>, vector<4x4xbf16>, vector<64x4xf32> -> vector<64x4xf32>
    %31 = arith.addf %26, %30 : vector<64x4xf32>
    %c0_27 = arith.constant 0 : index
    %c0_28 = arith.constant 0 : index
    %c0_29 = arith.constant 0 : index
    %32 = vector.load %arg5[%c0_27, %c0_28, %c0_29] : memref<4x1x4xf32, #tpu.memory_space<vmem>>, vector<1x1x4xf32>
    %33 = vector.shape_cast %32 : vector<1x1x4xf32> to vector<1x4xf32>
    %34 = vector.broadcast %33 : vector<1x4xf32> to vector<64x4xf32>
    %35 = arith.addf %31, %34 : vector<64x4xf32>
    %36 = vector.shape_cast %35 : vector<64x4xf32> to vector<8x8x4xf32>
    %37 = arith.truncf %36 : vector<8x8x4xf32> to vector<8x8x4xbf16>
    %c1_30 = arith.constant 1 : index
    %c1_31 = arith.constant 1 : index
    %c0_32 = arith.constant 0 : index
    %38 = vector.load %arg9[%c1_30, %c1_31, %c0_32] : memref<18x18x4xbf16, #tpu.memory_space<vmem>>, vector<8x8x4xbf16>
    tpu.vector_store %arg9[%c1_30, %c1_31, %c0_32], %37 {strides = array<i32>} : memref<18x18x4xbf16, #tpu.memory_space<vmem>>, vector<8x8x4xbf16>,
    %39 = vector.extract_strided_slice %1 {offsets = [8, 0, 0], sizes = [8, 8, 4], strides = [1, 1, 1]} : vector<16x16x4xbf16> to vector<8x8x4xbf16>
    %40 = vector.shape_cast %39 : vector<8x8x4xbf16> to vector<64x4xbf16>
    %c1_33 = arith.constant 1 : index
    %c0_34 = arith.constant 0 : index
    %c0_35 = arith.constant 0 : index
    %41 = vector.load %arg2[%c1_33, %c0_34, %c0_35] : memref<4x4x12xbf16, #tpu.memory_space<vmem>>, vector<1x4x12xbf16>
    %42 = vector.shape_cast %41 : vector<1x4x12xbf16> to vector<4x12xbf16>
    %cst_36 = arith.constant dense<0.000000e+00> : vector<64x12xf32>
    %43 = tpu.matmul %40, %42, %cst_36 {dimension_numbers = #tpu.dot_dimension_numbers<[1], [0], [0], [1], [0, 0, 1, 1], [], []>} : vector<64x4xbf16>, vector<4x12xbf16>, vector<64x12xf32> -> vector<64x12xf32>
    %c1_37 = arith.constant 1 : index
    %c0_38 = arith.constant 0 : index
    %c0_39 = arith.constant 0 : index
    %44 = vector.load %arg3[%c1_37, %c0_38, %c0_39] : memref<4x1x12xf32, #tpu.memory_space<vmem>>, vector<1x1x12xf32>
    %45 = vector.shape_cast %44 : vector<1x1x12xf32> to vector<1x12xf32>
    %46 = vector.broadcast %45 : vector<1x12xf32> to vector<64x12xf32>
    %47 = arith.addf %43, %46 : vector<64x12xf32>
    %48 = vector.extract_strided_slice %47 {offsets = [0, 0], sizes = [64, 4], strides = [1, 1]} : vector<64x12xf32> to vector<64x4xf32>
    %49 = vector.extract_strided_slice %47 {offsets = [0, 4], sizes = [64, 4], strides = [1, 1]} : vector<64x12xf32> to vector<64x4xf32>
    %50 = vector.extract_strided_slice %47 {offsets = [0, 8], sizes = [64, 4], strides = [1, 1]} : vector<64x12xf32> to vector<64x4xf32>
    %51 = arith.truncf %50 : vector<64x4xf32> to vector<64x4xbf16>
    %52 = arith.truncf %48 : vector<64x4xf32> to vector<64x4xbf16>
    %cst_40 = arith.constant dense<0.000000e+00> : vector<4x4xf32>
    %53 = tpu.matmul %51, %52, %cst_40 {dimension_numbers = #tpu.dot_dimension_numbers<[0], [0], [1], [1], [0, 1, 1, 1], [], []>} : vector<64x4xbf16>, vector<64x4xbf16>, vector<4x4xf32> -> vector<4x4xf32>
    %54 = arith.truncf %49 : vector<64x4xf32> to vector<64x4xbf16>
    %55 = arith.truncf %53 : vector<4x4xf32> to vector<4x4xbf16>
    %cst_41 = arith.constant dense<0.000000e+00> : vector<64x4xf32>
    %56 = tpu.matmul %54, %55, %cst_41 {dimension_numbers = #tpu.dot_dimension_numbers<[1], [0], [0], [1], [0, 0, 1, 1], [], []>} : vector<64x4xbf16>, vector<4x4xbf16>, vector<64x4xf32> -> vector<64x4xf32>
    %57 = arith.extf %40 : vector<64x4xbf16> to vector<64x4xf32>
    %58 = arith.truncf %56 : vector<64x4xf32> to vector<64x4xbf16>
    %c1_42 = arith.constant 1 : index
    %c0_43 = arith.constant 0 : index
    %c0_44 = arith.constant 0 : index
    %59 = vector.load %arg4[%c1_42, %c0_43, %c0_44] : memref<4x4x4xbf16, #tpu.memory_space<vmem>>, vector<1x4x4xbf16>
    %60 = vector.shape_cast %59 : vector<1x4x4xbf16> to vector<4x4xbf16>
    %cst_45 = arith.constant dense<0.000000e+00> : vector<64x4xf32>
    %61 = tpu.matmul %58, %60, %cst_45 {dimension_numbers = #tpu.dot_dimension_numbers<[1], [0], [0], [1], [0, 0, 1, 1], [], []>} : vector<64x4xbf16>, vector<4x4xbf16>, vector<64x4xf32> -> vector<64x4xf32>
    %62 = arith.addf %57, %61 : vector<64x4xf32>
    %c1_46 = arith.constant 1 : index
    %c0_47 = arith.constant 0 : index
    %c0_48 = arith.constant 0 : index
    %63 = vector.load %arg5[%c1_46, %c0_47, %c0_48] : memref<4x1x4xf32, #tpu.memory_space<vmem>>, vector<1x1x4xf32>
    %64 = vector.shape_cast %63 : vector<1x1x4xf32> to vector<1x4xf32>
    %65 = vector.broadcast %64 : vector<1x4xf32> to vector<64x4xf32>
    %66 = arith.addf %62, %65 : vector<64x4xf32>
    %67 = vector.shape_cast %66 : vector<64x4xf32> to vector<8x8x4xf32>
    %68 = arith.truncf %67 : vector<8x8x4xf32> to vector<8x8x4xbf16>
    %c9 = arith.constant 9 : index
    %c1_49 = arith.constant 1 : index
    %c0_50 = arith.constant 0 : index
    %69 = vector.load %arg9[%c9, %c1_49, %c0_50] : memref<18x18x4xbf16, #tpu.memory_space<vmem>>, vector<8x8x4xbf16>
    tpu.vector_store %arg9[%c9, %c1_49, %c0_50], %68 {strides = array<i32>} : memref<18x18x4xbf16, #tpu.memory_space<vmem>>, vector<8x8x4xbf16>,
    %70 = vector.extract_strided_slice %1 {offsets = [0, 8, 0], sizes = [8, 8, 4], strides = [1, 1, 1]} : vector<16x16x4xbf16> to vector<8x8x4xbf16>
    %71 = vector.shape_cast %70 : vector<8x8x4xbf16> to vector<64x4xbf16>
    %c2 = arith.constant 2 : index
    %c0_51 = arith.constant 0 : index
    %c0_52 = arith.constant 0 : index
    %72 = vector.load %arg2[%c2, %c0_51, %c0_52] : memref<4x4x12xbf16, #tpu.memory_space<vmem>>, vector<1x4x12xbf16>
    %73 = vector.shape_cast %72 : vector<1x4x12xbf16> to vector<4x12xbf16>
    %cst_53 = arith.constant dense<0.000000e+00> : vector<64x12xf32>
    %74 = tpu.matmul %71, %73, %cst_53 {dimension_numbers = #tpu.dot_dimension_numbers<[1], [0], [0], [1], [0, 0, 1, 1], [], []>} : vector<64x4xbf16>, vector<4x12xbf16>, vector<64x12xf32> -> vector<64x12xf32>
    %c2_54 = arith.constant 2 : index
    %c0_55 = arith.constant 0 : index
    %c0_56 = arith.constant 0 : index
    %75 = vector.load %arg3[%c2_54, %c0_55, %c0_56] : memref<4x1x12xf32, #tpu.memory_space<vmem>>, vector<1x1x12xf32>
    %76 = vector.shape_cast %75 : vector<1x1x12xf32> to vector<1x12xf32>
    %77 = vector.broadcast %76 : vector<1x12xf32> to vector<64x12xf32>
    %78 = arith.addf %74, %77 : vector<64x12xf32>
    %79 = vector.extract_strided_slice %78 {offsets = [0, 0], sizes = [64, 4], strides = [1, 1]} : vector<64x12xf32> to vector<64x4xf32>
    %80 = vector.extract_strided_slice %78 {offsets = [0, 4], sizes = [64, 4], strides = [1, 1]} : vector<64x12xf32> to vector<64x4xf32>
    %81 = vector.extract_strided_slice %78 {offsets = [0, 8], sizes = [64, 4], strides = [1, 1]} : vector<64x12xf32> to vector<64x4xf32>
    %82 = arith.truncf %81 : vector<64x4xf32> to vector<64x4xbf16>
    %83 = arith.truncf %79 : vector<64x4xf32> to vector<64x4xbf16>
    %cst_57 = arith.constant dense<0.000000e+00> : vector<4x4xf32>
    %84 = tpu.matmul %82, %83, %cst_57 {dimension_numbers = #tpu.dot_dimension_numbers<[0], [0], [1], [1], [0, 1, 1, 1], [], []>} : vector<64x4xbf16>, vector<64x4xbf16>, vector<4x4xf32> -> vector<4x4xf32>
    %85 = arith.truncf %80 : vector<64x4xf32> to vector<64x4xbf16>
    %86 = arith.truncf %84 : vector<4x4xf32> to vector<4x4xbf16>
    %cst_58 = arith.constant dense<0.000000e+00> : vector<64x4xf32>
    %87 = tpu.matmul %85, %86, %cst_58 {dimension_numbers = #tpu.dot_dimension_numbers<[1], [0], [0], [1], [0, 0, 1, 1], [], []>} : vector<64x4xbf16>, vector<4x4xbf16>, vector<64x4xf32> -> vector<64x4xf32>
    %88 = arith.extf %71 : vector<64x4xbf16> to vector<64x4xf32>
    %89 = arith.truncf %87 : vector<64x4xf32> to vector<64x4xbf16>
    %c2_59 = arith.constant 2 : index
    %c0_60 = arith.constant 0 : index
    %c0_61 = arith.constant 0 : index
    %90 = vector.load %arg4[%c2_59, %c0_60, %c0_61] : memref<4x4x4xbf16, #tpu.memory_space<vmem>>, vector<1x4x4xbf16>
    %91 = vector.shape_cast %90 : vector<1x4x4xbf16> to vector<4x4xbf16>
    %cst_62 = arith.constant dense<0.000000e+00> : vector<64x4xf32>
    %92 = tpu.matmul %89, %91, %cst_62 {dimension_numbers = #tpu.dot_dimension_numbers<[1], [0], [0], [1], [0, 0, 1, 1], [], []>} : vector<64x4xbf16>, vector<4x4xbf16>, vector<64x4xf32> -> vector<64x4xf32>
    %93 = arith.addf %88, %92 : vector<64x4xf32>
    %c2_63 = arith.constant 2 : index
    %c0_64 = arith.constant 0 : index
    %c0_65 = arith.constant 0 : index
    %94 = vector.load %arg5[%c2_63, %c0_64, %c0_65] : memref<4x1x4xf32, #tpu.memory_space<vmem>>, vector<1x1x4xf32>
    %95 = vector.shape_cast %94 : vector<1x1x4xf32> to vector<1x4xf32>
    %96 = vector.broadcast %95 : vector<1x4xf32> to vector<64x4xf32>
    %97 = arith.addf %93, %96 : vector<64x4xf32>
    %98 = vector.shape_cast %97 : vector<64x4xf32> to vector<8x8x4xf32>
    %99 = arith.truncf %98 : vector<8x8x4xf32> to vector<8x8x4xbf16>
    %c1_66 = arith.constant 1 : index
    %c9_67 = arith.constant 9 : index
    %c0_68 = arith.constant 0 : index
    %100 = vector.load %arg9[%c1_66, %c9_67, %c0_68] : memref<18x18x4xbf16, #tpu.memory_space<vmem>>, vector<8x8x4xbf16>
    tpu.vector_store %arg9[%c1_66, %c9_67, %c0_68], %99 {strides = array<i32>} : memref<18x18x4xbf16, #tpu.memory_space<vmem>>, vector<8x8x4xbf16>,
    %101 = vector.extract_strided_slice %1 {offsets = [8, 8, 0], sizes = [8, 8, 4], strides = [1, 1, 1]} : vector<16x16x4xbf16> to vector<8x8x4xbf16>
    %102 = vector.shape_cast %101 : vector<8x8x4xbf16> to vector<64x4xbf16>
    %c3 = arith.constant 3 : index
    %c0_69 = arith.constant 0 : index
    %c0_70 = arith.constant 0 : index
    %103 = vector.load %arg2[%c3, %c0_69, %c0_70] : memref<4x4x12xbf16, #tpu.memory_space<vmem>>, vector<1x4x12xbf16>
    %104 = vector.shape_cast %103 : vector<1x4x12xbf16> to vector<4x12xbf16>
    %cst_71 = arith.constant dense<0.000000e+00> : vector<64x12xf32>
    %105 = tpu.matmul %102, %104, %cst_71 {dimension_numbers = #tpu.dot_dimension_numbers<[1], [0], [0], [1], [0, 0, 1, 1], [], []>} : vector<64x4xbf16>, vector<4x12xbf16>, vector<64x12xf32> -> vector<64x12xf32>
    %c3_72 = arith.constant 3 : index
    %c0_73 = arith.constant 0 : index
    %c0_74 = arith.constant 0 : index
    %106 = vector.load %arg3[%c3_72, %c0_73, %c0_74] : memref<4x1x12xf32, #tpu.memory_space<vmem>>, vector<1x1x12xf32>
    %107 = vector.shape_cast %106 : vector<1x1x12xf32> to vector<1x12xf32>
    %108 = vector.broadcast %107 : vector<1x12xf32> to vector<64x12xf32>
    %109 = arith.addf %105, %108 : vector<64x12xf32>
    %110 = vector.extract_strided_slice %109 {offsets = [0, 0], sizes = [64, 4], strides = [1, 1]} : vector<64x12xf32> to vector<64x4xf32>
    %111 = vector.extract_strided_slice %109 {offsets = [0, 4], sizes = [64, 4], strides = [1, 1]} : vector<64x12xf32> to vector<64x4xf32>
    %112 = vector.extract_strided_slice %109 {offsets = [0, 8], sizes = [64, 4], strides = [1, 1]} : vector<64x12xf32> to vector<64x4xf32>
    %113 = arith.truncf %112 : vector<64x4xf32> to vector<64x4xbf16>
    %114 = arith.truncf %110 : vector<64x4xf32> to vector<64x4xbf16>
    %cst_75 = arith.constant dense<0.000000e+00> : vector<4x4xf32>
    %115 = tpu.matmul %113, %114, %cst_75 {dimension_numbers = #tpu.dot_dimension_numbers<[0], [0], [1], [1], [0, 1, 1, 1], [], []>} : vector<64x4xbf16>, vector<64x4xbf16>, vector<4x4xf32> -> vector<4x4xf32>
    %116 = arith.truncf %111 : vector<64x4xf32> to vector<64x4xbf16>
    %117 = arith.truncf %115 : vector<4x4xf32> to vector<4x4xbf16>
    %cst_76 = arith.constant dense<0.000000e+00> : vector<64x4xf32>
    %118 = tpu.matmul %116, %117, %cst_76 {dimension_numbers = #tpu.dot_dimension_numbers<[1], [0], [0], [1], [0, 0, 1, 1], [], []>} : vector<64x4xbf16>, vector<4x4xbf16>, vector<64x4xf32> -> vector<64x4xf32>
    %119 = arith.extf %102 : vector<64x4xbf16> to vector<64x4xf32>
    %120 = arith.truncf %118 : vector<64x4xf32> to vector<64x4xbf16>
    %c3_77 = arith.constant 3 : index
    %c0_78 = arith.constant 0 : index
    %c0_79 = arith.constant 0 : index
    %121 = vector.load %arg4[%c3_77, %c0_78, %c0_79] : memref<4x4x4xbf16, #tpu.memory_space<vmem>>, vector<1x4x4xbf16>
    %122 = vector.shape_cast %121 : vector<1x4x4xbf16> to vector<4x4xbf16>
    %cst_80 = arith.constant dense<0.000000e+00> : vector<64x4xf32>
    %123 = tpu.matmul %120, %122, %cst_80 {dimension_numbers = #tpu.dot_dimension_numbers<[1], [0], [0], [1], [0, 0, 1, 1], [], []>} : vector<64x4xbf16>, vector<4x4xbf16>, vector<64x4xf32> -> vector<64x4xf32>
    %124 = arith.addf %119, %123 : vector<64x4xf32>
    %c3_81 = arith.constant 3 : index
    %c0_82 = arith.constant 0 : index
    %c0_83 = arith.constant 0 : index
    %125 = vector.load %arg5[%c3_81, %c0_82, %c0_83] : memref<4x1x4xf32, #tpu.memory_space<vmem>>, vector<1x1x4xf32>
    %126 = vector.shape_cast %125 : vector<1x1x4xf32> to vector<1x4xf32>
    %127 = vector.broadcast %126 : vector<1x4xf32> to vector<64x4xf32>
    %128 = arith.addf %124, %127 : vector<64x4xf32>
    %129 = vector.shape_cast %128 : vector<64x4xf32> to vector<8x8x4xf32>
    %130 = arith.truncf %129 : vector<8x8x4xf32> to vector<8x8x4xbf16>
    %c9_84 = arith.constant 9 : index
    %c9_85 = arith.constant 9 : index
    %c0_86 = arith.constant 0 : index
    %131 = vector.load %arg9[%c9_84, %c9_85, %c0_86] : memref<18x18x4xbf16, #tpu.memory_space<vmem>>, vector<8x8x4xbf16>
    tpu.vector_store %arg9[%c9_84, %c9_85, %c0_86], %130 {strides = array<i32>} : memref<18x18x4xbf16, #tpu.memory_space<vmem>>, vector<8x8x4xbf16>,
    %c0_87 = arith.constant 0 : index
    %c0_88 = arith.constant 0 : index
    %c0_89 = arith.constant 0 : index
    %132 = vector.load %arg9[%c0_87, %c0_88, %c0_89] : memref<18x18x4xbf16, #tpu.memory_space<vmem>>, vector<18x18x4xbf16>
    %c0_90 = arith.constant 0 : index
    %c0_91 = arith.constant 0 : index
    %133 = vector.load %arg7[%c0_90, %c0_91] : memref<8x1xf32, #tpu.memory_space<vmem>>, vector<8x1xf32>
    %134 = vector.shape_cast %133 : vector<8x1xf32> to vector<8x1xf32>
    %135 = vector.broadcast %134 : vector<8x1xf32> to vector<8x256xf32>
    %136 = vector.extract_strided_slice %132 {offsets = [0, 0, 0], sizes = [16, 16, 4], strides = [1, 1, 1]} : vector<18x18x4xbf16> to vector<16x16x4xbf16>
    %137 = vector.shape_cast %136 : vector<16x16x4xbf16> to vector<256x4xbf16>
    %c0_92 = arith.constant 0 : index
    %c0_93 = arith.constant 0 : index
    %c0_94 = arith.constant 0 : index
    %c0_95 = arith.constant 0 : index
    %138 = vector.load %arg6[%c0_92, %c0_93, %c0_94, %c0_95] : memref<3x3x8x4xbf16, #tpu.memory_space<vmem>>, vector<1x1x8x4xbf16>
    %139 = vector.shape_cast %138 : vector<1x1x8x4xbf16> to vector<8x4xbf16>
    %cst_96 = arith.constant dense<0.000000e+00> : vector<8x256xf32>
    %140 = tpu.matmul %139, %137, %cst_96 {dimension_numbers = #tpu.dot_dimension_numbers<[1], [1], [0], [0], [0, 0, 1, 0], [], []>} : vector<8x4xbf16>, vector<256x4xbf16>, vector<8x256xf32> -> vector<8x256xf32>
    %141 = arith.addf %135, %140 : vector<8x256xf32>
    %142 = vector.extract_strided_slice %132 {offsets = [0, 1, 0], sizes = [16, 16, 4], strides = [1, 1, 1]} : vector<18x18x4xbf16> to vector<16x16x4xbf16>
    %143 = vector.shape_cast %142 : vector<16x16x4xbf16> to vector<256x4xbf16>
    %c0_97 = arith.constant 0 : index
    %c1_98 = arith.constant 1 : index
    %c0_99 = arith.constant 0 : index
    %c0_100 = arith.constant 0 : index
    %144 = vector.load %arg6[%c0_97, %c1_98, %c0_99, %c0_100] : memref<3x3x8x4xbf16, #tpu.memory_space<vmem>>, vector<1x1x8x4xbf16>
    %145 = vector.shape_cast %144 : vector<1x1x8x4xbf16> to vector<8x4xbf16>
    %cst_101 = arith.constant dense<0.000000e+00> : vector<8x256xf32>
    %146 = tpu.matmul %145, %143, %cst_101 {dimension_numbers = #tpu.dot_dimension_numbers<[1], [1], [0], [0], [0, 0, 1, 0], [], []>} : vector<8x4xbf16>, vector<256x4xbf16>, vector<8x256xf32> -> vector<8x256xf32>
    %147 = arith.addf %141, %146 : vector<8x256xf32>
    %148 = vector.extract_strided_slice %132 {offsets = [0, 2, 0], sizes = [16, 16, 4], strides = [1, 1, 1]} : vector<18x18x4xbf16> to vector<16x16x4xbf16>
    %149 = vector.shape_cast %148 : vector<16x16x4xbf16> to vector<256x4xbf16>
    %c0_102 = arith.constant 0 : index
    %c2_103 = arith.constant 2 : index
    %c0_104 = arith.constant 0 : index
    %c0_105 = arith.constant 0 : index
    %150 = vector.load %arg6[%c0_102, %c2_103, %c0_104, %c0_105] : memref<3x3x8x4xbf16, #tpu.memory_space<vmem>>, vector<1x1x8x4xbf16>
    %151 = vector.shape_cast %150 : vector<1x1x8x4xbf16> to vector<8x4xbf16>
    %cst_106 = arith.constant dense<0.000000e+00> : vector<8x256xf32>
    %152 = tpu.matmul %151, %149, %cst_106 {dimension_numbers = #tpu.dot_dimension_numbers<[1], [1], [0], [0], [0, 0, 1, 0], [], []>} : vector<8x4xbf16>, vector<256x4xbf16>, vector<8x256xf32> -> vector<8x256xf32>
    %153 = arith.addf %147, %152 : vector<8x256xf32>
    %154 = vector.extract_strided_slice %132 {offsets = [1, 0, 0], sizes = [16, 16, 4], strides = [1, 1, 1]} : vector<18x18x4xbf16> to vector<16x16x4xbf16>
    %155 = vector.shape_cast %154 : vector<16x16x4xbf16> to vector<256x4xbf16>
    %c1_107 = arith.constant 1 : index
    %c0_108 = arith.constant 0 : index
    %c0_109 = arith.constant 0 : index
    %c0_110 = arith.constant 0 : index
    %156 = vector.load %arg6[%c1_107, %c0_108, %c0_109, %c0_110] : memref<3x3x8x4xbf16, #tpu.memory_space<vmem>>, vector<1x1x8x4xbf16>
    %157 = vector.shape_cast %156 : vector<1x1x8x4xbf16> to vector<8x4xbf16>
    %cst_111 = arith.constant dense<0.000000e+00> : vector<8x256xf32>
    %158 = tpu.matmul %157, %155, %cst_111 {dimension_numbers = #tpu.dot_dimension_numbers<[1], [1], [0], [0], [0, 0, 1, 0], [], []>} : vector<8x4xbf16>, vector<256x4xbf16>, vector<8x256xf32> -> vector<8x256xf32>
    %159 = arith.addf %153, %158 : vector<8x256xf32>
    %160 = vector.extract_strided_slice %132 {offsets = [1, 1, 0], sizes = [16, 16, 4], strides = [1, 1, 1]} : vector<18x18x4xbf16> to vector<16x16x4xbf16>
    %161 = vector.shape_cast %160 : vector<16x16x4xbf16> to vector<256x4xbf16>
    %c1_112 = arith.constant 1 : index
    %c1_113 = arith.constant 1 : index
    %c0_114 = arith.constant 0 : index
    %c0_115 = arith.constant 0 : index
    %162 = vector.load %arg6[%c1_112, %c1_113, %c0_114, %c0_115] : memref<3x3x8x4xbf16, #tpu.memory_space<vmem>>, vector<1x1x8x4xbf16>
    %163 = vector.shape_cast %162 : vector<1x1x8x4xbf16> to vector<8x4xbf16>
    %cst_116 = arith.constant dense<0.000000e+00> : vector<8x256xf32>
    %164 = tpu.matmul %163, %161, %cst_116 {dimension_numbers = #tpu.dot_dimension_numbers<[1], [1], [0], [0], [0, 0, 1, 0], [], []>} : vector<8x4xbf16>, vector<256x4xbf16>, vector<8x256xf32> -> vector<8x256xf32>
    %165 = arith.addf %159, %164 : vector<8x256xf32>
    %166 = vector.extract_strided_slice %132 {offsets = [1, 2, 0], sizes = [16, 16, 4], strides = [1, 1, 1]} : vector<18x18x4xbf16> to vector<16x16x4xbf16>
    %167 = vector.shape_cast %166 : vector<16x16x4xbf16> to vector<256x4xbf16>
    %c1_117 = arith.constant 1 : index
    %c2_118 = arith.constant 2 : index
    %c0_119 = arith.constant 0 : index
    %c0_120 = arith.constant 0 : index
    %168 = vector.load %arg6[%c1_117, %c2_118, %c0_119, %c0_120] : memref<3x3x8x4xbf16, #tpu.memory_space<vmem>>, vector<1x1x8x4xbf16>
    %169 = vector.shape_cast %168 : vector<1x1x8x4xbf16> to vector<8x4xbf16>
    %cst_121 = arith.constant dense<0.000000e+00> : vector<8x256xf32>
    %170 = tpu.matmul %169, %167, %cst_121 {dimension_numbers = #tpu.dot_dimension_numbers<[1], [1], [0], [0], [0, 0, 1, 0], [], []>} : vector<8x4xbf16>, vector<256x4xbf16>, vector<8x256xf32> -> vector<8x256xf32>
    %171 = arith.addf %165, %170 : vector<8x256xf32>
    %172 = vector.extract_strided_slice %132 {offsets = [2, 0, 0], sizes = [16, 16, 4], strides = [1, 1, 1]} : vector<18x18x4xbf16> to vector<16x16x4xbf16>
    %173 = vector.shape_cast %172 : vector<16x16x4xbf16> to vector<256x4xbf16>
    %c2_122 = arith.constant 2 : index
    %c0_123 = arith.constant 0 : index
    %c0_124 = arith.constant 0 : index
    %c0_125 = arith.constant 0 : index
    %174 = vector.load %arg6[%c2_122, %c0_123, %c0_124, %c0_125] : memref<3x3x8x4xbf16, #tpu.memory_space<vmem>>, vector<1x1x8x4xbf16>
    %175 = vector.shape_cast %174 : vector<1x1x8x4xbf16> to vector<8x4xbf16>
    %cst_126 = arith.constant dense<0.000000e+00> : vector<8x256xf32>
    %176 = tpu.matmul %175, %173, %cst_126 {dimension_numbers = #tpu.dot_dimension_numbers<[1], [1], [0], [0], [0, 0, 1, 0], [], []>} : vector<8x4xbf16>, vector<256x4xbf16>, vector<8x256xf32> -> vector<8x256xf32>
    %177 = arith.addf %171, %176 : vector<8x256xf32>
    %178 = vector.extract_strided_slice %132 {offsets = [2, 1, 0], sizes = [16, 16, 4], strides = [1, 1, 1]} : vector<18x18x4xbf16> to vector<16x16x4xbf16>
    %179 = vector.shape_cast %178 : vector<16x16x4xbf16> to vector<256x4xbf16>
    %c2_127 = arith.constant 2 : index
    %c1_128 = arith.constant 1 : index
    %c0_129 = arith.constant 0 : index
    %c0_130 = arith.constant 0 : index
    %180 = vector.load %arg6[%c2_127, %c1_128, %c0_129, %c0_130] : memref<3x3x8x4xbf16, #tpu.memory_space<vmem>>, vector<1x1x8x4xbf16>
    %181 = vector.shape_cast %180 : vector<1x1x8x4xbf16> to vector<8x4xbf16>
    %cst_131 = arith.constant dense<0.000000e+00> : vector<8x256xf32>
    %182 = tpu.matmul %181, %179, %cst_131 {dimension_numbers = #tpu.dot_dimension_numbers<[1], [1], [0], [0], [0, 0, 1, 0], [], []>} : vector<8x4xbf16>, vector<256x4xbf16>, vector<8x256xf32> -> vector<8x256xf32>
    %183 = arith.addf %177, %182 : vector<8x256xf32>
    %184 = vector.extract_strided_slice %132 {offsets = [2, 2, 0], sizes = [16, 16, 4], strides = [1, 1, 1]} : vector<18x18x4xbf16> to vector<16x16x4xbf16>
    %185 = vector.shape_cast %184 : vector<16x16x4xbf16> to vector<256x4xbf16>
    %c2_132 = arith.constant 2 : index
    %c2_133 = arith.constant 2 : index
    %c0_134 = arith.constant 0 : index
    %c0_135 = arith.constant 0 : index
    %186 = vector.load %arg6[%c2_132, %c2_133, %c0_134, %c0_135] : memref<3x3x8x4xbf16, #tpu.memory_space<vmem>>, vector<1x1x8x4xbf16>
    %187 = vector.shape_cast %186 : vector<1x1x8x4xbf16> to vector<8x4xbf16>
    %cst_136 = arith.constant dense<0.000000e+00> : vector<8x256xf32>
    %188 = tpu.matmul %187, %185, %cst_136 {dimension_numbers = #tpu.dot_dimension_numbers<[1], [1], [0], [0], [0, 0, 1, 0], [], []>} : vector<8x4xbf16>, vector<256x4xbf16>, vector<8x256xf32> -> vector<8x256xf32>
    %189 = arith.addf %183, %188 : vector<8x256xf32>
    %190 = arith.negf %189 : vector<8x256xf32>
    %191 = math.exp %190 : vector<8x256xf32>
    %cst_137 = arith.constant 1.000000e+00 : f32
    %192 = vector.broadcast %cst_137 : f32 to vector<8x256xf32>
    %193 = arith.addf %192, %191 : vector<8x256xf32>
    %194 = arith.divf %192, %193 : vector<8x256xf32>
    %195 = arith.mulf %189, %194 : vector<8x256xf32>
    %c0_138 = arith.constant 0 : index
    %c0_139 = arith.constant 0 : index
    %c0_140 = arith.constant 0 : index
    %196 = vector.load %arg8[%c0_138, %c0_139, %c0_140] : memref<1x8x256xf32, #tpu.memory_space<vmem>>, vector<1x8x256xf32>
    %197 = vector.shape_cast %196 : vector<1x8x256xf32> to vector<8x256xf32>
    %198 = vector.shape_cast %195 : vector<8x256xf32> to vector<1x8x256xf32>
    tpu.vector_store %arg8[%c0_138, %c0_139, %c0_140], %198 {strides = array<i32>} : memref<1x8x256xf32, #tpu.memory_space<vmem>>, vector<1x8x256xf32>,
    return
  }
  func.func @transform_0(%arg0: i32) -> (i32, i32, i32, i32) {
    %c0_i32 = arith.constant 0 : i32
    %c0_i32_0 = arith.constant 0 : i32
    %c0_i32_1 = arith.constant 0 : i32
    %c0_i32_2 = arith.constant 0 : i32
    return %arg0, %c0_i32, %c0_i32_0, %c0_i32_1 : i32, i32, i32, i32
  }
  func.func @transform_1(%arg0: i32) -> (i32, i32, i32) {
    %c0_i32 = arith.constant 0 : i32
    %c0_i32_0 = arith.constant 0 : i32
    %c0_i32_1 = arith.constant 0 : i32
    %c0_i32_2 = arith.constant 0 : i32
    return %c0_i32, %c0_i32_0, %c0_i32_1 : i32, i32, i32
  }
  func.func @transform_2(%arg0: i32) -> (i32, i32, i32) {
    %c0_i32 = arith.constant 0 : i32
    %c0_i32_0 = arith.constant 0 : i32
    %c0_i32_1 = arith.constant 0 : i32
    %c0_i32_2 = arith.constant 0 : i32
    return %c0_i32, %c0_i32_0, %c0_i32_1 : i32, i32, i32
  }
  func.func @transform_3(%arg0: i32) -> (i32, i32, i32) {
    %c0_i32 = arith.constant 0 : i32
    %c0_i32_0 = arith.constant 0 : i32
    %c0_i32_1 = arith.constant 0 : i32
    %c0_i32_2 = arith.constant 0 : i32
    return %c0_i32, %c0_i32_0, %c0_i32_1 : i32, i32, i32
  }
  func.func @transform_4(%arg0: i32) -> (i32, i32, i32) {
    %c0_i32 = arith.constant 0 : i32
    %c0_i32_0 = arith.constant 0 : i32
    %c0_i32_1 = arith.constant 0 : i32
    %c0_i32_2 = arith.constant 0 : i32
    return %c0_i32, %c0_i32_0, %c0_i32_1 : i32, i32, i32
  }
  func.func @transform_5(%arg0: i32) -> (i32, i32, i32, i32) {
    %c0_i32 = arith.constant 0 : i32
    %c0_i32_0 = arith.constant 0 : i32
    %c0_i32_1 = arith.constant 0 : i32
    %c0_i32_2 = arith.constant 0 : i32
    %c0_i32_3 = arith.constant 0 : i32
    return %c0_i32, %c0_i32_0, %c0_i32_1, %c0_i32_2 : i32, i32, i32, i32
  }
  func.func @transform_6(%arg0: i32) -> (i32, i32) {
    %c0_i32 = arith.constant 0 : i32
    %c0_i32_0 = arith.constant 0 : i32
    %c0_i32_1 = arith.constant 0 : i32
    return %c0_i32, %c0_i32_0 : i32, i32
  }
  func.func @transform_7(%arg0: i32) -> (i32, i32, i32) {
    %c0_i32 = arith.constant 0 : i32
    %c0_i32_0 = arith.constant 0 : i32
    %c0_i32_1 = arith.constant 0 : i32
    return %arg0, %c0_i32, %c0_i32_0 : i32, i32, i32
  }
}

</mosaic_0001>

<bundles_post_ra>
// kernel: patch_conv_nonlocal_forward.1
= control target key start
LH: loop header
LB: loop body
LE: loop exit
PB: predicated region body
PF: predicated region fallthrough
CT: control target
= control target key end

     0   :  { %s5061_s24 = smov 0   ;;  %s6773_s0 = inlined_call_operand.vmem [shape: bf16[2,16,16,4], index: 0, kind: input, shape index: {}]   ;;  %s6774_s1 = inlined_call_operand.vmem [shape: bf16[4,4,12], index: 1, kind: input, shape index: {}]   ;;  %s6775_s2 = inlined_call_operand.vmem [shape: f32[4,1,12], index: 2, kind: input, shape index: {}]   ;;  %s6776_s3 = inlined_call_operand.vmem [shape: bf16[4,4,4], index: 3, kind: input, shape index: {}]   ;;  %s6777_s4 = inlined_call_operand.vmem [shape: f32[4,1,4], index: 4, kind: input, shape index: {}]   ;;  %s6778_s5 = inlined_call_operand.vmem [shape: bf16[3,3,8,4], index: 5, kind: input, shape index: {}]   ;;  %s6779_s6 = inlined_call_operand.vmem [shape: f32[8,1], index: 6, kind: input, shape index: {}]   ;;  %s6780_s7 = inlined_call_operand.vmem [shape: f32[2,8,256], index: 7, kind: output, shape index: {}]  }
   0x1 LB: > { %s4153_s25 = sadd.s32 4294967295, %s5014_s24   ;;  %p4157_p0 = scmp.ge.s32.totalorder %s5014_s24, 1  ;;  %s5014_s24 = sphi %s5061_s24, %s17_s24  }
   0x2   : > { %p237_p1 = scmp.lt.s32.totalorder %s5014_s24, 3 }
   0x4   : > { %p238_p2 = pnand %p4157_p0, %p237_p1 }
   0x6   : > { %241 = sbr.rel (%p238_p2) target bundleno = 3510 (0xdb6), region = 48 }
   0xd   : > { %v423_v0 = vld [vmem:[%s6774_s1] sm:$0x3]  ;;  %vm464_vm0 = vcmask 1041408   ;;  %p269_p3 = scmp.lt.s32.totalorder %s4153_s25, 1  ;;  %vm451_vm1 = vcmask 31744   ;;  %v5016_v14 = vmov 0.0  }
   0xe   : > { %4851 = vmatprep.subr.msk.bf16.mxu0 %vm464_vm0, %v423_v0  ;;  %v466_v1 = vsel %vm464_vm0, %v423_v0, 0  ;;  %v4162_v16 = vld [vmem:[%s6775_s2] ss:$0 sm:$0xff]  ;;  %s5017_s11 = smov 120   ;;  %vm5018_vm2 = vmmov 0   ;;  %s5019_s12 = smov 124  }
   0xf   : > { %4652 = vmatpush3.bf16.msra.mxu0 %v466_v1  ;;  %s6964_s25 = smov (!%p269_p3, %s4153_s25), 1  ;;  %vm569_vm3 = vcmask 523264   ;;  %v4189_v47 = vld [vmem:[%s6774_s1 + $0x2] sm:$0x3]  ;;  %v714_v1 = vld [vmem:[%s6776_s3] sm:$0x3] }
  0x10   : > { %s4375_s28 = sshll.u32 %s6964_s25, 7  ;;  %4661 = vmatprep.subr.bf16.mxu0 %v5016_v14  ;;  %v1023_v50 = vsel %vm464_vm0, %v4189_v47, 0  ;;  %4853 = vmatprep.subr.msk.bf16.mxu1 %vm464_vm0, %v714_v1  ;;  %vm315_vm4 = vcmask 24576   ;;  %vm323_vm5 = vsmask.f32 256  ;;  %vm312_vm7 = vcmask 27648  }
  0x11   : > { %s5080_s8 = scalar_lea.vmem %s6773_s0, %s4375_s28  ;;  %vm5203_vm6 = vmand %vm315_vm4, %vm323_vm5  ;;  %vm373_vm8 = vsmask.f32 7938  ;;  %vm3431_vm11 = vcmask 1042432   ;;  %vm3432_vm12 = vcmask 1046532   ;;  %vm2884_vm14 = vsmask.f32 3328 }
  0x12   : > { %v5083_v2 = vld [vmem:[%s5080_s8] sm:$0xf]  ;;  %v5086_v3 = vld [vmem:[%s5080_s8 + $0x8] sm:$0xf]  ;;  %v5089_v4 = vld [vmem:[%s5080_s8 + $0x10] sm:$0xf] }
  0x13   : > { %v4163_v5 = vcombine.low %v5083_v2, %v5086_v3  ;;  %v5094_v6 = vld [vmem:[%s5080_s8 + $0x18] sm:$0xf]  ;;  %v5097_v7 = vld [vmem:[%s5080_s8 + $0x20] sm:$0xf]  ;;  %v5100_v8 = vld [vmem:[%s5080_s8 + $0x28] sm:$0xf] }
  0x14   : > { %v4164_v9 = vcombine.low %v5089_v4, %v5094_v6  ;;  %v4165_v10 = vcombine.low %v5097_v7, %v5100_v8  ;;  %v5110_v11 = vld [vmem:[%s5080_s8 + $0x30] sm:$0xf]  ;;  %v5113_v12 = vld [vmem:[%s5080_s8 + $0x38] sm:$0xf]  ;;  %v5147_v52 = vld [vmem:[%s5080_s8 + $0x40] sm:$0xf] }
  0x15   : > { %4653 = vmatprep.mubr.msk.bf16.mxu0 %vm451_vm1, %v4163_v5  ;;  %v4166_v13 = vcombine.low %v5110_v11, %v5113_v12  ;;  %v5150_v53 = vld [vmem:[%s5080_s8 + $0x48] sm:$0xf]  ;;  %v5157_v56 = vld [vmem:[%s5080_s8 + $0x50] sm:$0xf]  ;;  %v5160_v57 = vld [vmem:[%s5080_s8 + $0x58] sm:$0xf] }
  0x16   : > { %4654 = vmatmul.mubr.msk.bf16.vlgmr.msra.gmra.mrb[0].mxu0 %vm451_vm1, %v4164_v9  ;;  %v4192_v54 = vcombine.low %v5147_v52, %v5150_v53  ;;  %v5163_v58 = vld [vmem:[%s5080_s8 + $0x60] sm:$0xf]  ;;  %v5166_v59 = vld [vmem:[%s5080_s8 + $0x68] sm:$0xf]  ;;  %v4193_v60 = vcombine.low %v5157_v56, %v5160_v57  ;;  %v5175_v62 = vld [vmem:[%s5080_s8 + $0x70] sm:$0xf] }
  0x17   : > { %4657 = vmatprep.mubr.msk.bf16.mxu0 %vm451_vm1, %v4165_v10  ;;  %v4194_v61 = vcombine.low %v5163_v58, %v5166_v59  ;;  %v5178_v63 = vld [vmem:[%s5080_s8 + $0x78] sm:$0xf]  ;;  %v728_v5 = vsel %vm464_vm0, %v714_v1, 0  ;;  %vm5257_vm9 = vmand %vm312_vm7, %vm373_vm8  ;;  %vm2885_vm15 = vsmask.f32 7440  ;;  %s4376_s26 = sshll.u32 %s6964_s25, 4 }
  0x18   : > { %v4195_v0 = vcombine.low %v5175_v62, %v5178_v63  ;;  %4684 = vmatpush3.bf16.msra.mxu1 %v728_v5  ;;  %v346_v5 = vld [vmem:[#allocation2 + $0x60] sm:$0x1]  ;;  %vm5480_vm10 = vmand %vm315_vm4, %vm373_vm8  ;;  %s278_s28 = scalar_lea.vmem %s6780_s7, %s4376_s26 }
  0x19   : > { %4703 = vmatprep.subr.bf16.mxu1 %v5016_v14  ;;  %vm5596_vm13 = vmor %vm3431_vm11, %vm3432_vm12 }
  0x1e   : > { %4658 = vmatmul.mubr.msk.bf16.gmra.mrb[4].mxu0 %vm451_vm1, %v4166_v13 }
  0x1f   : > { %4669 = vmatprep.mubr.msk.bf16.mxu0 %vm5018_vm2, %v5016_v14 }
  0xe9   : > { %v4655_v15 = vpop.f32.mrb[0].mxu0 }
  0xea   : > { %v502_v17 = vpop.f32.mrb[1].mxu0  ;;  %v511_v19 = vadd.f32 %v4655_v15, %v4162_v16 }
  0xeb   : > { %v4656_v18 = vpop.f32.mrb[2].mxu0  ;;  %v503_v22 = vadd.f32 %v4162_v16, %v502_v17 }
  0xec   : > { %v514_v20 = vadd.f32 %v4656_v18, %v4162_v16  ;;  %v505_v21 = vpop.f32.mrb[3].mxu0 }
  0xed   : > { %v506_v23 = vadd.f32 %v4162_v16, %v505_v21 }
  0xee   : > { %v534_v24 = vpack.c.bf16 %v514_v20, %v511_v19 }
  0xef   : > { %v533_v25 = vpack.c.bf16 %v506_v23, %v503_v22 }
  0xf1   : > { %v4659_v26 = vpop.f32.mrb[4].mxu0  ;;  %541 = vrot.lane.b32.xlu0 %v533_v25, %s5017_s11  ;;  %4662 = vmatpush3.bf16.msra.mxu0 %v533_v25 }
  0xf2   : > { %v518_v27 = vpop.f32.mrb[5].mxu0  ;;  %4663 = vmatprep.subr.bf16.mxu0 %v5016_v14  ;;  %v527_v29 = vadd.f32 %v4659_v26, %v4162_v16 }
  0xf3   : > { %v4660_v28 = vpop.f32.mrb[6].mxu0  ;;  %v519_v32 = vadd.f32 %v4162_v16, %v518_v27 }
  0xf4   : > { %v530_v30 = vadd.f32 %v4660_v28, %v4162_v16  ;;  %v521_v31 = vpop.f32.mrb[7].mxu0 }
  0xf5   : > { %v522_v33 = vadd.f32 %v4162_v16, %v521_v31  ;;  %543 = vrot.lane.b32.xlu0 %v534_v24, %s5017_s11  ;;  %4664 = vmatpush3.bf16.msra.mxu0 %v534_v24 }
  0xf6   : > { %v536_v34 = vpack.c.bf16 %v530_v30, %v527_v29  ;;  %4665 = vmatprep.subr.bf16.mxu0 %v5016_v14 }
  0xf7   : > { %v535_v35 = vpack.c.bf16 %v522_v33, %v519_v32 }
  0xf9   : > { %545 = vrot.lane.b32.xlu1 %v535_v35, %s5017_s11  ;;  %4666 = vmatpush3.bf16.msra.mxu0 %v535_v35 }
  0xfa   : > { %4667 = vmatprep.subr.bf16.mxu0 %v5016_v14 }
  0xfd   : > { %547 = vrot.lane.b32.xlu1 %v536_v34, %s5017_s11  ;;  %4668 = vmatpush3.bf16.msra.mxu0 %v536_v34 }
 0x101   : > { %614 = vrot.lane.b32.xlu1 %v533_v25, %s5019_s12  ;;  %v4191_v25 = vld [vmem:[%s6775_s2 + $0x1] ss:$0 sm:$0xff] }
 0x105   : > { %616 = vrot.lane.b32.xlu1 %v534_v24, %s5019_s12 }
 0x109   : > { %618 = vrot.lane.b32.xlu1 %v535_v35, %s5019_s12 }
 0x10d   : > { %620 = vrot.lane.b32.xlu1 %v536_v34, %s5019_s12 }
 0x163   : > { %v542_v36 = vpop.permute.xlu0 %541 }
 0x164   : > { %553 = vxpose.xlu0.c.b16.start [1/4] (short) (narrow) %v542_v36, 16 }
 0x167   : > { %v544_v37 = vpop.permute.xlu0 %543 }
 0x168   : > { %554 = vxpose.xlu0.c.b16.cont [2/4] (short) (narrow) %v544_v37, 16 }
 0x16b   : > { %v546_v38 = vpop.permute.xlu1 %545 }
 0x16c   : > { %555 = vxpose.xlu0.c.b16.cont [3/4] (short) (narrow) %v546_v38, 16 }
 0x16f   : > { %v548_v39 = vpop.permute.xlu1 %547 }
 0x170   : > { %556 = vxpose.xlu0.c.b16.end [4/4] (short) (narrow) %v548_v39, 16 }
 0x173   : > { %v615_v41 = vpop.permute.xlu1 %614 }
 0x177   : > { %v617_v43 = vpop.permute.xlu1 %616 }
 0x17b   : > { %v619_v51 = vpop.permute.xlu1 %618 }
 0x17f   : > { %v621_v55 = vpop.permute.xlu1 %620 }
 0x1ca   : > { %v561_v40 = vpop.trf.xlu0 }
 0x1cb   : > { %4670 = vmatmul.mubr.msk.bf16.vlgmr.msra.gmra.mrb[8].mxu0 %vm569_vm3, %v561_v40 }
 0x1cc   : > { %4675 = vmatprep.mubr.msk.bf16.mxu0 %vm451_vm1, %v615_v41 }
 0x29e   : > { %v607_v42 = vpop.f32.mrb[8].mxu0 }
 0x29f   : > { %v613_v44 = vpack.c.bf16 %v607_v42, %v607_v42  ;;  %v4671_v45 = vpop.f32.mrb[9].mxu0 }
 0x2a0   : > { %v610_v46 = vpop.f32.mrb[10].mxu0 }
 0x2a1   : > { %v635_v48 = vsel %vm464_vm0, %v613_v44, 0  ;;  %v4672_v49 = vpop.f32.mrb[11].mxu0  ;;  %4852 = vmatprep.subr.msk.bf16.mxu0 %vm464_vm0, %v613_v44 }
 0x2a2   : > { %4674 = vmatpush3.bf16.msra.mxu0 %v635_v48  ;;  %v325_v48 = vld [vmem:[#allocation2 + $0xc] sm:$0x1] }
 0x2a3   : > { %4854 = vmatprep.subr.msk.bf16.mxu0 %vm464_vm0, %v4189_v47  ;;  %v326_v49 = vsel %vm5203_vm6, 0, %v325_v48 }
 0x2a4   : > { %327 = vst [vmem:[#allocation2 + $0xc] sm:$0x1] %v326_v49 }
 0x2a5   : > { %4676 = vmatmul.mubr.msk.bf16.vlgmr.msra.gmra.mrb[12].mxu0 %vm451_vm1, %v617_v43  ;;  %v331_v43 = vld [vmem:[#allocation2 + $0x24] sm:$0x1] }
 0x2a6   : > { %4679 = vmatprep.mubr.msk.bf16.mxu0 %vm451_vm1, %v619_v51  ;;  %4694 = vmatpush3.bf16.msra.mxu0 %v1023_v50  ;;  %v332_v45 = vsel %vm5203_vm6, 0, %v331_v43  ;;  %v334_v50 = vld [vmem:[#allocation2 + $0x30] sm:$0x1] }
 0x2a7   : > { %333 = vst [vmem:[#allocation2 + $0x24] sm:$0x1] %v332_v45  ;;  %v335_v51 = vsel %vm5203_vm6, 0, %v334_v50 }
 0x2a8   : > { %336 = vst [vmem:[#allocation2 + $0x30] sm:$0x1] %v335_v51 }
 0x2ad   : > { %4680 = vmatmul.mubr.msk.bf16.gmra.mrb[16].mxu0 %vm451_vm1, %v621_v55 }
 0x2ae   : > { %4695 = vmatprep.mubr.msk.bf16.mxu0 %vm451_vm1, %v4192_v54  ;;  %v328_v54 = vld [vmem:[#allocation2 + $0x18] sm:$0x1] }
 0x2af   : > { %v329_v55 = vsel %vm5203_vm6, 0, %v328_v54 }
 0x2b0   : > { %330 = vst [vmem:[#allocation2 + $0x18] sm:$0x1] %v329_v55 }
 0x2b5   : > { %4696 = vmatmul.mubr.msk.bf16.vlgmr.msra.gmra.mrb[20].mxu0 %vm451_vm1, %v4193_v60  ;;  %v343_v60 = vld [vmem:[#allocation2 + $0x54] sm:$0x1] }
 0x2b6   : > { %4699 = vmatprep.mubr.msk.bf16.mxu0 %vm451_vm1, %v4194_v61  ;;  %v344_v61 = vsel %vm5203_vm6, 0, %v343_v60 }
 0x2b7   : > { %345 = vst [vmem:[#allocation2 + $0x54] sm:$0x1] %v344_v61 }
 0x2bd   : > { %4700 = vmatmul.mubr.msk.bf16.gmra.mrb[24].mxu0 %vm451_vm1, %v4195_v0  ;;  %v337_v0 = vld [vmem:[#allocation2 + $0x3c] sm:$0x1] }
 0x2be   : > { %v338_v1 = vsel %vm5203_vm6, 0, %v337_v0 }
 0x2bf   : > { %339 = vst [vmem:[#allocation2 + $0x3c] sm:$0x1] %v338_v1 }
 0x378   : > { %v4677_v9 = vpop.f32.mrb[12].mxu0 }
 0x379   : > { %v671_v10 = vpop.f32.mrb[13].mxu0 }
 0x37a   : > { %v4678_v13 = vpop.f32.mrb[14].mxu0 }
 0x37b   : > { %v711_v15 = vpack.c.bf16 %v4678_v13, %v4677_v9  ;;  %v674_v16 = vpop.f32.mrb[15].mxu0  ;;  %v347_v9 = vsel %vm5203_vm6, 0, %v346_v5 }
 0x37c   : > { %v710_v17 = vpack.c.bf16 %v674_v16, %v671_v10  ;;  %348 = vst [vmem:[#allocation2 + $0x60] sm:$0x1] %v347_v9  ;;  %v340_v10 = vld [vmem:[#allocation2 + $0x48] sm:$0x1] }
 0x37d   : > { %v341_v13 = vsel %vm5203_vm6, 0, %v340_v10  ;;  %v935_v10 = vld [vmem:[#allocation2 + $0x10] sm:$0x1] }
 0x37e   : > { %4685 = vmatprep.mubr.msk.bf16.mxu1 %vm451_vm1, %v710_v17  ;;  %342 = vst [vmem:[#allocation2 + $0x48] sm:$0x1] %v341_v13 }
 0x37f   : > { %4686 = vmatmul.mubr.msk.bf16.vlgmr.msra.gmra.mrb[0].mxu1 %vm451_vm1, %v711_v15  ;;  %v5233_v15 = vld [vmem:[%s6774_s1 + $0x4] sm:$0x3] }
 0x380   : > { %v4681_v18 = vpop.f32.mrb[16].mxu0 }
 0x381   : > { %v687_v19 = vpop.f32.mrb[17].mxu0 }
 0x382   : > { %v4682_v20 = vpop.f32.mrb[18].mxu0 }
 0x383   : > { %v713_v21 = vpack.c.bf16 %v4682_v20, %v4681_v18  ;;  %v690_v22 = vpop.f32.mrb[19].mxu0 }
 0x384   : > { %v712_v23 = vpack.c.bf16 %v690_v22, %v687_v19  ;;  %v702_v22 = vunpack.c.l.bf16 %v5083_v2 }
 0x386   : > { %4689 = vmatprep.mubr.msk.bf16.mxu1 %vm451_vm1, %v712_v23  ;;  %v705_v23 = vunpack.c.l.bf16 %v5094_v6 }
 0x387   : > { %4690 = vmatmul.mubr.msk.bf16.gmra.mrb[4].mxu1 %vm451_vm1, %v713_v21  ;;  %v704_v21 = vunpack.c.l.bf16 %v5089_v4 }
 0x388   : > { %v4697_v24 = vpop.f32.mrb[20].mxu0  ;;  %4711 = vmatprep.mubr.msk.bf16.mxu1 %vm5018_vm2, %v5016_v14 }
 0x389   : > { %v1059_v26 = vpop.f32.mrb[21].mxu0  ;;  %v1068_v28 = vadd.f32 %v4697_v24, %v4191_v25 }
 0x38a   : > { %v4698_v27 = vpop.f32.mrb[22].mxu0  ;;  %v1060_v31 = vadd.f32 %v4191_v25, %v1059_v26  ;;  %v703_v26 = vunpack.c.l.bf16 %v5086_v3 }
 0x38b   : > { %v1071_v29 = vadd.f32 %v4698_v27, %v4191_v25  ;;  %v1062_v30 = vpop.f32.mrb[23].mxu0 }
 0x38c   : > { %v1063_v32 = vadd.f32 %v4191_v25, %v1062_v30 }
 0x38d   : > { %v1091_v33 = vpack.c.bf16 %v1071_v29, %v1068_v28 }
 0x38e   : > { %v1090_v34 = vpack.c.bf16 %v1063_v32, %v1060_v31 }
 0x38f   : > { %1100 = vrot.lane.b32.xlu1 %v1091_v33, %s5017_s11 }
 0x390   : > { %v4701_v35 = vpop.f32.mrb[24].mxu0  ;;  %1170 = vrot.lane.b32.xlu0 %v1090_v34, %s5019_s12  ;;  %4704 = vmatpush3.bf16.msra.mxu1 %v1090_v34 }
 0x391   : > { %v1084_v36 = vadd.f32 %v4701_v35, %v4191_v25  ;;  %v1075_v37 = vpop.f32.mrb[25].mxu0  ;;  %4705 = vmatprep.subr.bf16.mxu1 %v5016_v14  ;;  %v708_v35 = vunpack.c.l.bf16 %v5110_v11  ;;  %v947_v11 = vld [vmem:[#allocation2 + $0x28] sm:$0x1] }
 0x392   : > { %v1076_v38 = vadd.f32 %v4191_v25, %v1075_v37  ;;  %v4702_v39 = vpop.f32.mrb[26].mxu0  ;;  %v706_v37 = vunpack.c.l.bf16 %v5097_v7 }
 0x393   : > { %v1087_v40 = vadd.f32 %v4702_v39, %v4191_v25  ;;  %v1078_v41 = vpop.f32.mrb[27].mxu0  ;;  %1098 = vrot.lane.b32.xlu1 %v1090_v34, %s5017_s11 }
 0x394   : > { %v1079_v44 = vadd.f32 %v4191_v25, %v1078_v41  ;;  %1172 = vrot.lane.b32.xlu0 %v1091_v33, %s5019_s12  ;;  %4706 = vmatpush3.bf16.msra.mxu1 %v1091_v33  ;;  %v5244_v25 = vld [vmem:[%s6777_s4] ss:$0 sm:$0xff]  ;;  %v707_v41 = vunpack.c.l.bf16 %v5100_v8  ;;  %v932_v8 = vld [vmem:[#allocation2 + $0xc] sm:$0xf] }
 0x395   : > { %v1093_v46 = vpack.c.bf16 %v1087_v40, %v1084_v36  ;;  %4707 = vmatprep.subr.bf16.mxu1 %v5016_v14  ;;  %v709_v40 = vunpack.c.l.bf16 %v5113_v12 }
 0x396   : > { %v1092_v47 = vpack.c.bf16 %v1079_v44, %v1076_v38  ;;  %v944_v44 = vld [vmem:[#allocation2 + $0x24] sm:$0xf] }
 0x398   : > { %1174 = vrot.lane.b32.xlu0 %v1092_v47, %s5019_s12  ;;  %1102 = vrot.lane.b32.xlu1 %v1092_v47, %s5017_s11 }
 0x399   : > { %4708 = vmatpush3.bf16.msra.mxu1 %v1092_v47 }
 0x39a   : > { %4709 = vmatprep.subr.bf16.mxu1 %v5016_v14 }
 0x39c   : > { %1176 = vrot.lane.b32.xlu0 %v1093_v46, %s5019_s12  ;;  %1104 = vrot.lane.b32.xlu1 %v1093_v46, %s5017_s11 }
 0x39d   : > { %4710 = vmatpush3.bf16.msra.mxu1 %v1093_v46 }
 0x39e   : > { %4857 = vmatprep.subr.msk.bf16.mxu1 %vm464_vm0, %v5233_v15 }
 0x401   : > { %v1101_v16 = vpop.permute.xlu1 %1100 }
 0x402   : > { %v1171_v17 = vpop.permute.xlu0 %1170 }
 0x403   : > { %4717 = vmatprep.mubr.msk.bf16.mxu0 %vm451_vm1, %v1171_v17 }
 0x405   : > { %v1099_v18 = vpop.permute.xlu1 %1098 }
 0x406   : > { %1110 = vxpose.xlu1.c.b16.start [1/4] (short) (narrow) %v1099_v18, 16 }
 0x40a   : > { %1111 = vxpose.xlu1.c.b16.cont [2/4] (short) (narrow) %v1101_v16, 16  ;;  %v1103_v19 = vpop.permute.xlu1 %1102 }
 0x40e   : > { %1112 = vxpose.xlu1.c.b16.cont [3/4] (short) (narrow) %v1103_v19, 16  ;;  %v1105_v20 = vpop.permute.xlu1 %1104 }
 0x412   : > { %1113 = vxpose.xlu1.c.b16.end [4/4] (short) (narrow) %v1105_v20, 16  ;;  %v950_v20 = vld [vmem:[#allocation2 + $0x30] sm:$0xf] }
 0x452   : > { %v4687_v24 = vpop.f32.mrb[0].mxu1 }
 0x453   : > { %v797_v27 = vadd.f32 %v4687_v24, %v704_v21  ;;  %v764_v28 = vpop.f32.mrb[1].mxu1  ;;  %v953_v21 = vld [vmem:[#allocation2 + $0x34] sm:$0x1] }
 0x454   : > { %v795_v29 = vadd.f32 %v764_v28, %v702_v22  ;;  %v4688_v30 = vpop.f32.mrb[2].mxu1 }
 0x455   : > { %v812_v31 = vadd.f32 %v5244_v25, %v797_v27  ;;  %v798_v32 = vadd.f32 %v4688_v30, %v705_v23  ;;  %v767_v4 = vpop.f32.mrb[3].mxu1  ;;  %v941_v30 = vld [vmem:[#allocation2 + $0x1c] sm:$0x1] }
 0x456   : > { %v810_v2 = vadd.f32 %v5244_v25, %v795_v29  ;;  %v796_v33 = vadd.f32 %v767_v4, %v703_v26  ;;  %v938_v29 = vld [vmem:[#allocation2 + $0x18] sm:$0xf] }
 0x457   : > { %v4379_v6 = vpack.c.bf16 %v812_v31, %v812_v31  ;;  %v813_v34 = vadd.f32 %v5244_v25, %v798_v32 }
 0x458   : > { %v4377_v36 = vpack.c.bf16 %v810_v2, %v810_v2  ;;  %v811_v3 = vadd.f32 %v5244_v25, %v796_v33 }
 0x459   : > { %v867_v38 = vshrl.u32 %v4379_v6, 16  ;;  %v4380_v39 = vpack.c.bf16 %v813_v34, %v813_v34  ;;  %v870_v43 = vshll.u32 %v4379_v6, 16 }
 0x45a   : > { %v851_v45 = vshrl.u32 %v4377_v36, 16  ;;  %v854_v46 = vshll.u32 %v4377_v36, 16  ;;  %v4378_v47 = vpack.c.bf16 %v811_v3, %v811_v3  ;;  %v4691_v48 = vpop.f32.mrb[4].mxu1 }
 0x45b   : > { %v869_v49 = vrot.slane %v867_v38, 7  ;;  %v875_v50 = vshrl.u32 %v4380_v39, 16  ;;  %v878_v51 = vshll.u32 %v4380_v39, 16  ;;  %v801_v54 = vadd.f32 %v4691_v48, %v708_v35  ;;  %v780_v55 = vpop.f32.mrb[5].mxu1  ;;  %v968_v48 = vld [vmem:[#allocation2 + $0x54] sm:$0xf] }
 0x45c   : > { %v853_v12 = vrot.slane %v851_v45, 7  ;;  %v859_v60 = vshrl.u32 %v4378_v47, 16  ;;  %v862_v61 = vshll.u32 %v4378_v47, 16  ;;  %v799_v0 = vadd.f32 %v780_v55, %v706_v37  ;;  %v4692_v1 = vpop.f32.mrb[6].mxu1 }
 0x45d   : > { %v872_v5 = vor.u32 %v870_v43, %v869_v49  ;;  %v873_v9 = vrot.slane %v869_v49, 4  ;;  %v877_v13 = vrot.slane %v875_v50, 7  ;;  %v816_v16 = vadd.f32 %v5244_v25, %v801_v54  ;;  %v783_v17 = vpop.f32.mrb[7].mxu1  ;;  %v971_v50 = vld [vmem:[#allocation2 + $0x58] sm:$0x1] }
 0x45e   : > { %v856_v18 = vor.u32 %v854_v46, %v853_v12  ;;  %v857_v19 = vrot.slane %v853_v12, 4  ;;  %v861_v22 = vrot.slane %v859_v60, 7  ;;  %v814_v23 = vadd.f32 %v5244_v25, %v799_v0  ;;  %v959_v54 = vld [vmem:[#allocation2 + $0x40] sm:$0x1] }
 0x45f   : > { %v945_v24 = vsel %vm5257_vm9, %v872_v5, %v944_v44  ;;  %v948_v26 = vsel %vm5203_vm6, %v873_v9, %v947_v11  ;;  %v880_v27 = vor.u32 %v878_v51, %v877_v13  ;;  %v881_v28 = vrot.slane %v877_v13, 4  ;;  %v956_v51 = vld [vmem:[#allocation2 + $0x3c] sm:$0xf] }
 0x460   : > { %946 = vst [vmem:[#allocation2 + $0x24] sm:$0xf] %v945_v24  ;;  %949 = vst [vmem:[#allocation2 + $0x28] sm:$0x1] %v948_v26  ;;  %v933_v31 = vsel %vm5257_vm9, %v856_v18, %v932_v8  ;;  %v936_v32 = vsel %vm5203_vm6, %v857_v19, %v935_v10  ;;  %v864_v4 = vor.u32 %v862_v61, %v861_v22  ;;  %v865_v2 = vrot.slane %v861_v22, 4 }
 0x461   : > { %934 = vst [vmem:[#allocation2 + $0xc] sm:$0xf] %v933_v31  ;;  %937 = vst [vmem:[#allocation2 + $0x10] sm:$0x1] %v936_v32  ;;  %v951_v33 = vsel %vm5257_vm9, %v880_v27, %v950_v20  ;;  %v954_v6 = vsel %vm5203_vm6, %v881_v28, %v953_v21  ;;  %v4383_v34 = vpack.c.bf16 %v816_v16, %v816_v16  ;;  %v974_v16 = vld [vmem:[#allocation2 + $0x60] sm:$0xf] }
 0x462   : > { %v4381_v35 = vpack.c.bf16 %v814_v23, %v814_v23  ;;  %952 = vst [vmem:[#allocation2 + $0x30] sm:$0xf] %v951_v33  ;;  %955 = vst [vmem:[#allocation2 + $0x34] sm:$0x1] %v954_v6  ;;  %v939_v36 = vsel %vm5257_vm9, %v864_v4, %v938_v29  ;;  %v942_v3 = vsel %vm5203_vm6, %v865_v2, %v941_v30  ;;  %v977_v19 = vld [vmem:[#allocation2 + $0x64] sm:$0x1] }
 0x463   : > { %v802_v37 = vadd.f32 %v4692_v1, %v709_v40  ;;  %v800_v38 = vadd.f32 %v783_v17, %v707_v41  ;;  %940 = vst [vmem:[#allocation2 + $0x18] sm:$0xf] %v939_v36  ;;  %943 = vst [vmem:[#allocation2 + $0x1c] sm:$0x1] %v942_v3  ;;  %v899_v39 = vshrl.u32 %v4383_v34, 16  ;;  %v902_v47 = vshll.u32 %v4383_v34, 16 }
 0x464   : > { %v883_v43 = vshrl.u32 %v4381_v35, 16  ;;  %v886_v11 = vshll.u32 %v4381_v35, 16  ;;  %v5282_v1 = vld [vmem:[%s5080_s8 + $0x4] sm:$0xf]  ;;  %v962_v22 = vld [vmem:[#allocation2 + $0x48] sm:$0xf] }
 0x465   : > { %v817_v44 = vadd.f32 %v5244_v25, %v802_v37  ;;  %v815_v45 = vadd.f32 %v5244_v25, %v800_v38  ;;  %v901_v46 = vrot.slane %v899_v39, 7  ;;  %v5285_v25 = vld [vmem:[%s5080_s8 + $0xc] sm:$0xf]  ;;  %v1580_v24 = vsel %vm464_vm0, %v5233_v15, 0  ;;  %v5309_v33 = vld [vmem:[%s5080_s8 + $0x14] sm:$0xf] }
 0x466   : > { %v885_v49 = vrot.slane %v883_v43, 7  ;;  %v965_v23 = vld [vmem:[#allocation2 + $0x4c] sm:$0x1]  ;;  %v4223_v26 = vcombine.low %v5282_v1, %v5285_v25  ;;  %v5312_v6 = vld [vmem:[%s5080_s8 + $0x1c] sm:$0xf] }
 0x467   : > { %v4384_v40 = vpack.c.bf16 %v817_v44, %v817_v44  ;;  %v4382_v41 = vpack.c.bf16 %v815_v45, %v815_v45  ;;  %v904_v55 = vor.u32 %v902_v47, %v901_v46  ;;  %v905_v12 = vrot.slane %v901_v46, 4  ;;  %v5316_v34 = vld [vmem:[%s5080_s8 + $0x24] sm:$0xf]  ;;  %v5319_v35 = vld [vmem:[%s5080_s8 + $0x2c] sm:$0xf]  ;;  %v1173_v44 = vpop.permute.xlu0 %1172 }
 0x468   : > { %v888_v8 = vor.u32 %v886_v11, %v885_v49  ;;  %v889_v60 = vrot.slane %v885_v49, 4  ;;  %v4224_v36 = vcombine.low %v5309_v33, %v5312_v6  ;;  %v4225_v3 = vcombine.low %v5316_v34, %v5319_v35  ;;  %v5328_v37 = vld [vmem:[%s5080_s8 + $0x34] sm:$0xf]  ;;  %v5331_v38 = vld [vmem:[%s5080_s8 + $0x3c] sm:$0xf] }
 0x469   : > { %v907_v61 = vshrl.u32 %v4384_v40, 16  ;;  %v891_v0 = vshrl.u32 %v4382_v41, 16  ;;  %v969_v5 = vsel %vm5257_vm9, %v904_v55, %v968_v48  ;;  %v972_v9 = vsel %vm5203_vm6, %v905_v12, %v971_v50  ;;  %v4222_v11 = vld [vmem:[%s6775_s2 + $0x2] ss:$0 sm:$0xff] }
 0x46a   : > { %v957_v10 = vsel %vm5257_vm9, %v888_v8, %v956_v51  ;;  %v960_v13 = vsel %vm5203_vm6, %v889_v60, %v959_v54  ;;  %970 = vst [vmem:[#allocation2 + $0x54] sm:$0xf] %v969_v5  ;;  %973 = vst [vmem:[#allocation2 + $0x58] sm:$0x1] %v972_v9  ;;  %v910_v18 = vshll.u32 %v4384_v40, 16  ;;  %v894_v21 = vshll.u32 %v4382_v41, 16 }
 0x46b   : > { %958 = vst [vmem:[#allocation2 + $0x3c] sm:$0xf] %v957_v10  ;;  %961 = vst [vmem:[#allocation2 + $0x40] sm:$0x1] %v960_v13  ;;  %v909_v17 = vrot.slane %v907_v61, 7  ;;  %v893_v20 = vrot.slane %v891_v0, 7  ;;  %v4226_v39 = vcombine.low %v5328_v37, %v5331_v38  ;;  %v1175_v50 = vpop.permute.xlu0 %1174 }
 0x46c   : > { %v1118_v31 = vpop.trf.xlu1 }
 0x46d   : > { %v912_v27 = vor.u32 %v910_v18, %v909_v17  ;;  %v913_v28 = vrot.slane %v909_v17, 4  ;;  %v896_v29 = vor.u32 %v894_v21, %v893_v20  ;;  %v897_v30 = vrot.slane %v893_v20, 4  ;;  %4712 = vmatmul.mubr.msk.bf16.vlgmr.msra.gmra.mrb[8].mxu1 %vm569_vm3, %v1118_v31 }
 0x46e   : > { %4736 = vmatpush3.bf16.msra.mxu1 %v1580_v24  ;;  %4737 = vmatprep.mubr.msk.bf16.mxu1 %vm451_vm1, %v4223_v26  ;;  %v355_v26 = vld [vmem:[#allocation2 + $0x84] sm:$0x1] }
 0x46f   : > { %v975_v32 = vsel %vm5257_vm9, %v912_v27, %v974_v16  ;;  %v978_v4 = vsel %vm5203_vm6, %v913_v28, %v977_v19  ;;  %v963_v15 = vsel %vm5257_vm9, %v896_v29, %v962_v22  ;;  %v966_v2 = vsel %vm5203_vm6, %v897_v30, %v965_v23  ;;  %v1177_v0 = vpop.permute.xlu0 %1176  ;;  %v4205_v23 = vld [vmem:[%s6776_s3 + $0x2] sm:$0x3] }
 0x470   : > { %976 = vst [vmem:[#allocation2 + $0x60] sm:$0xf] %v975_v32  ;;  %979 = vst [vmem:[#allocation2 + $0x64] sm:$0x1] %v978_v4  ;;  %v1285_v24 = vsel %vm464_vm0, %v4205_v23, 0  ;;  %v356_v27 = vsel %vm5203_vm6, 0, %v355_v26 }
 0x471   : > { %964 = vst [vmem:[#allocation2 + $0x48] sm:$0xf] %v963_v15  ;;  %967 = vst [vmem:[#allocation2 + $0x4c] sm:$0x1] %v966_v2 }
 0x472   : > { %357 = vst [vmem:[#allocation2 + $0x84] sm:$0x1] %v356_v27 }
 0x475   : > { %4738 = vmatmul.mubr.msk.bf16.vlgmr.msra.gmra.mrb[12].mxu1 %vm451_vm1, %v4224_v36 }
 0x476   : > { %4741 = vmatprep.mubr.msk.bf16.mxu1 %vm451_vm1, %v4225_v3 }
 0x47d   : > { %4742 = vmatmul.mubr.msk.bf16.gmra.mrb[16].mxu1 %vm451_vm1, %v4226_v39 }
 0x540   : > { %v1163_v43 = vpop.f32.mrb[8].mxu1 }
 0x541   : > { %v1169_v45 = vpack.c.bf16 %v1163_v43, %v1163_v43  ;;  %v4713_v46 = vpop.f32.mrb[9].mxu1 }
 0x542   : > { %v1166_v47 = vpop.f32.mrb[10].mxu1 }
 0x543   : > { %v1191_v48 = vsel %vm464_vm0, %v1169_v45, 0  ;;  %v4714_v49 = vpop.f32.mrb[11].mxu1  ;;  %4855 = vmatprep.subr.msk.bf16.mxu0 %vm464_vm0, %v1169_v45 }
 0x544   : > { %4716 = vmatpush3.bf16.msra.mxu0 %v1191_v48 }
 0x545   : > { %4856 = vmatprep.subr.msk.bf16.mxu0 %vm464_vm0, %v4205_v23 }
 0x547   : > { %4718 = vmatmul.mubr.msk.bf16.vlgmr.msra.gmra.mrb[28].mxu0 %vm451_vm1, %v1173_v44 }
 0x548   : > { %4721 = vmatprep.mubr.msk.bf16.mxu0 %vm451_vm1, %v1175_v50  ;;  %v4739_v51 = vpop.f32.mrb[12].mxu1  ;;  %4726 = vmatpush3.bf16.msra.mxu0 %v1285_v24 }
 0x549   : > { %v1625_v54 = vadd.f32 %v4739_v51, %v4222_v11  ;;  %v1616_v40 = vpop.f32.mrb[13].mxu1  ;;  %4745 = vmatprep.subr.bf16.mxu0 %v5016_v14  ;;  %v358_v51 = vld [vmem:[#allocation2 + $0x90] sm:$0x1] }
 0x54a   : > { %v1617_v41 = vadd.f32 %v4222_v11, %v1616_v40  ;;  %v4740_v55 = vpop.f32.mrb[14].mxu1  ;;  %v352_v40 = vld [vmem:[#allocation2 + $0x78] sm:$0x1] }
 0x54b   : > { %v1628_v12 = vadd.f32 %v4740_v55, %v4222_v11  ;;  %v1619_v8 = vpop.f32.mrb[15].mxu1  ;;  %v367_v55 = vld [vmem:[#allocation2 + $0xb4] sm:$0x1] }
 0x54c   : > { %v1620_v60 = vadd.f32 %v4222_v11, %v1619_v8  ;;  %v361_v8 = vld [vmem:[#allocation2 + $0x9c] sm:$0x1] }
 0x54d   : > { %v1648_v61 = vpack.c.bf16 %v1628_v12, %v1625_v54  ;;  %v359_v54 = vsel %vm5203_vm6, 0, %v358_v51  ;;  %v368_v12 = vsel %vm5203_vm6, 0, %v367_v55 }
 0x54e   : > { %v1647_v5 = vpack.c.bf16 %v1620_v60, %v1617_v41  ;;  %360 = vst [vmem:[#allocation2 + $0x90] sm:$0x1] %v359_v54  ;;  %v353_v41 = vsel %vm5203_vm6, 0, %v352_v40  ;;  %369 = vst [vmem:[#allocation2 + $0xb4] sm:$0x1] %v368_v12  ;;  %v362_v60 = vsel %vm5203_vm6, 0, %v361_v8 }
 0x54f   : > { %4722 = vmatmul.mubr.msk.bf16.gmra.mrb[32].mxu0 %vm451_vm1, %v1177_v0  ;;  %1657 = vrot.lane.b32.xlu0 %v1648_v61, %s5017_s11  ;;  %354 = vst [vmem:[#allocation2 + $0x78] sm:$0x1] %v353_v41  ;;  %363 = vst [vmem:[#allocation2 + $0x9c] sm:$0x1] %v362_v60 }
 0x550   : > { %1727 = vrot.lane.b32.xlu1 %v1647_v5, %s5019_s12  ;;  %v4743_v9 = vpop.f32.mrb[16].mxu1 }
 0x551   : > { %v1641_v10 = vadd.f32 %v4743_v9, %v4222_v11  ;;  %v1632_v13 = vpop.f32.mrb[17].mxu1 }
 0x552   : > { %v1633_v16 = vadd.f32 %v4222_v11, %v1632_v13  ;;  %v4744_v17 = vpop.f32.mrb[18].mxu1  ;;  %v1258_v13 = vunpack.c.l.bf16 %v5147_v52 }
 0x553   : > { %1655 = vrot.lane.b32.xlu0 %v1647_v5, %s5017_s11  ;;  %v1644_v18 = vadd.f32 %v4744_v17, %v4222_v11  ;;  %v1635_v19 = vpop.f32.mrb[19].mxu1 }
 0x554   : > { %1729 = vrot.lane.b32.xlu1 %v1648_v61, %s5019_s12  ;;  %v1636_v20 = vadd.f32 %v4222_v11, %v1635_v19  ;;  %v349_v11 = vld [vmem:[#allocation2 + $0x6c] sm:$0x1]  ;;  %v1259_v19 = vunpack.c.l.bf16 %v5150_v53  ;;  %v1262_v53 = vunpack.c.l.bf16 %v5163_v58  ;;  %v1492_v58 = vld [vmem:[#allocation2 + $0x70] sm:$0x1] }
 0x555   : > { %v1650_v21 = vpack.c.bf16 %v1644_v18, %v1641_v10  ;;  %v350_v50 = vsel %vm5203_vm6, 0, %v349_v11  ;;  %v1260_v10 = vunpack.c.l.bf16 %v5157_v56  ;;  %v5391_v18 = vld [vmem:[%s6777_s4 + $0x1] ss:$0 sm:$0xff] }
 0x556   : > { %v1649_v22 = vpack.c.bf16 %v1636_v20, %v1633_v16  ;;  %351 = vst [vmem:[#allocation2 + $0x6c] sm:$0x1] %v350_v50  ;;  %v1261_v16 = vunpack.c.l.bf16 %v5160_v57 }
 0x558   : > { %1659 = vrot.lane.b32.xlu0 %v1649_v22, %s5017_s11  ;;  %1731 = vrot.lane.b32.xlu1 %v1649_v22, %s5019_s12 }
 0x55c   : > { %1661 = vrot.lane.b32.xlu0 %v1650_v21, %s5017_s11  ;;  %1733 = vrot.lane.b32.xlu1 %v1650_v21, %s5019_s12 }
 0x55d   : > { %v1489_v55 = vld [vmem:[#allocation2 + $0x6c] sm:$0xf] }
 0x5c1   : > { %v1658_v28 = vpop.permute.xlu0 %1657 }
 0x5c2   : > { %v1728_v49 = vpop.permute.xlu1 %1727 }
 0x5c5   : > { %v1656_v29 = vpop.permute.xlu0 %1655 }
 0x5c6   : > { %1667 = vxpose.xlu0.c.b16.start [1/4] (short) (narrow) %v1656_v29, 16  ;;  %v1264_v29 = vunpack.c.l.bf16 %v5175_v62 }
 0x5ca   : > { %1668 = vxpose.xlu0.c.b16.cont [2/4] (short) (narrow) %v1658_v28, 16  ;;  %v1660_v30 = vpop.permute.xlu0 %1659 }
 0x5ce   : > { %1669 = vxpose.xlu0.c.b16.cont [3/4] (short) (narrow) %v1660_v30, 16  ;;  %v1662_v31 = vpop.permute.xlu0 %1661 }
 0x5d2   : > { %1670 = vxpose.xlu0.c.b16.end [4/4] (short) (narrow) %v1662_v31, 16 }
 0x61a   : > { %v4719_v32 = vpop.f32.mrb[28].mxu0 }
 0x61b   : > { %v1227_v4 = vpop.f32.mrb[29].mxu0 }
 0x61c   : > { %v4720_v15 = vpop.f32.mrb[30].mxu0 }
 0x61d   : > { %v1267_v2 = vpack.c.bf16 %v4720_v15, %v4719_v32  ;;  %v1230_v36 = vpop.f32.mrb[31].mxu0  ;;  %v1265_v15 = vunpack.c.l.bf16 %v5178_v63 }
 0x61e   : > { %v1266_v3 = vpack.c.bf16 %v1230_v36, %v1227_v4 }
 0x620   : > { %4727 = vmatprep.mubr.msk.bf16.mxu0 %vm451_vm1, %v1266_v3  ;;  %v1501_v3 = vld [vmem:[#allocation2 + $0x84] sm:$0xf] }
 0x621   : > { %4728 = vmatmul.mubr.msk.bf16.vlgmr.msra.gmra.mrb[36].mxu0 %vm451_vm1, %v1267_v2  ;;  %v1263_v2 = vunpack.c.l.bf16 %v5166_v59 }
 0x622   : > { %4746 = vmatpush3.bf16.msra.mxu0 %v1647_v5  ;;  %v4723_v39 = vpop.f32.mrb[32].mxu0  ;;  %v364_v5 = vld [vmem:[#allocation2 + $0xa8] sm:$0x1] }
 0x623   : > { %v1243_v43 = vpop.f32.mrb[33].mxu0  ;;  %4747 = vmatprep.subr.bf16.mxu0 %v5016_v14  ;;  %v365_v9 = vsel %vm5203_vm6, 0, %v364_v5  ;;  %v1507_v5 = vld [vmem:[#allocation2 + $0x90] sm:$0xf] }
 0x624   : > { %v4724_v44 = vpop.f32.mrb[34].mxu0  ;;  %366 = vst [vmem:[#allocation2 + $0xa8] sm:$0x1] %v365_v9  ;;  %v1510_v9 = vld [vmem:[#allocation2 + $0x94] sm:$0x1] }
 0x625   : > { %v1269_v45 = vpack.c.bf16 %v4724_v44, %v4723_v39  ;;  %v1246_v46 = vpop.f32.mrb[35].mxu0 }
 0x626   : > { %v1268_v47 = vpack.c.bf16 %v1246_v46, %v1243_v43  ;;  %4748 = vmatpush3.bf16.msra.mxu0 %v1648_v61  ;;  %v370_v61 = vld [vmem:[#allocation2 + $0xc0] sm:$0x1] }
 0x627   : > { %4749 = vmatprep.subr.bf16.mxu0 %v5016_v14  ;;  %v371_v0 = vsel %vm5203_vm6, 0, %v370_v61 }
 0x628   : > { %4731 = vmatprep.mubr.msk.bf16.mxu0 %vm451_vm1, %v1268_v47  ;;  %372 = vst [vmem:[#allocation2 + $0xc0] sm:$0x1] %v371_v0  ;;  %v1504_v47 = vld [vmem:[#allocation2 + $0x88] sm:$0x1] }
 0x629   : > { %4732 = vmatmul.mubr.msk.bf16.gmra.mrb[40].mxu0 %vm451_vm1, %v1269_v45 }
 0x62a   : > { %4750 = vmatpush3.bf16.msra.mxu0 %v1649_v22  ;;  %4753 = vmatprep.mubr.msk.bf16.mxu0 %vm5018_vm2, %v5016_v14 }
 0x62b   : > { %4751 = vmatprep.subr.bf16.mxu0 %v5016_v14 }
 0x62c   : > { %v1675_v48 = vpop.trf.xlu0 }
 0x62e   : > { %4752 = vmatpush3.bf16.msra.mxu0 %v1650_v21 }
 0x631   : > { %4754 = vmatmul.mubr.msk.bf16.vlgmr.msra.gmra.mrb[44].mxu0 %vm569_vm3, %v1675_v48 }
 0x632   : > { %4759 = vmatprep.mubr.msk.bf16.mxu0 %vm451_vm1, %v1728_v49 }
 0x6f4   : > { %v4729_v17 = vpop.f32.mrb[36].mxu0 }
 0x6f5   : > { %v1354_v20 = vadd.f32 %v4729_v17, %v1260_v10  ;;  %v1321_v21 = vpop.f32.mrb[37].mxu0 }
 0x6f6   : > { %v1352_v22 = vadd.f32 %v1321_v21, %v1258_v13  ;;  %v4730_v23 = vpop.f32.mrb[38].mxu0  ;;  %v1495_v21 = vld [vmem:[#allocation2 + $0x78] sm:$0xf] }
 0x6f7   : > { %v1370_v24 = vadd.f32 %v5391_v18, %v1354_v20  ;;  %v1355_v26 = vadd.f32 %v4730_v23, %v1261_v16  ;;  %v1324_v56 = vpop.f32.mrb[39].mxu0 }
 0x6f8   : > { %v1368_v52 = vadd.f32 %v5391_v18, %v1352_v22  ;;  %v1353_v27 = vadd.f32 %v1324_v56, %v1259_v19  ;;  %v1498_v22 = vld [vmem:[#allocation2 + $0x7c] sm:$0x1] }
 0x6f9   : > { %v4387_v57 = vpack.c.bf16 %v1370_v24, %v1370_v24  ;;  %v1371_v28 = vadd.f32 %v5391_v18, %v1355_v26 }
 0x6fa   : > { %v4385_v30 = vpack.c.bf16 %v1368_v52, %v1368_v52  ;;  %v1369_v31 = vadd.f32 %v5391_v18, %v1353_v27 }
 0x6fb   : > { %v1425_v32 = vshrl.u32 %v4387_v57, 16  ;;  %v4388_v4 = vpack.c.bf16 %v1371_v28, %v1371_v28  ;;  %v1428_v36 = vshll.u32 %v4387_v57, 16 }
 0x6fc   : > { %v1409_v39 = vshrl.u32 %v4385_v30, 16  ;;  %v1412_v43 = vshll.u32 %v4385_v30, 16  ;;  %v4386_v44 = vpack.c.bf16 %v1369_v31, %v1369_v31  ;;  %v4733_v45 = vpop.f32.mrb[40].mxu0 }
 0x6fd   : > { %v1427_v46 = vrot.slane %v1425_v32, 7  ;;  %v1433_v62 = vshrl.u32 %v4388_v4, 16  ;;  %v1436_v48 = vshll.u32 %v4388_v4, 16  ;;  %v1358_v49 = vadd.f32 %v4733_v45, %v1264_v29  ;;  %v1337_v11 = vpop.f32.mrb[41].mxu0 }
 0x6fe   : > { %v1411_v50 = vrot.slane %v1409_v39, 7  ;;  %v1417_v51 = vshrl.u32 %v4386_v44, 16  ;;  %v1420_v54 = vshll.u32 %v4386_v44, 16  ;;  %v1356_v40 = vadd.f32 %v1337_v11, %v1262_v53  ;;  %v4734_v63 = vpop.f32.mrb[42].mxu0  ;;  %v1730_v39 = vpop.permute.xlu1 %1729  ;;  %v1516_v44 = vld [vmem:[#allocation2 + $0xa0] sm:$0x1] }
 0x6ff   : > { %v1430_v41 = vor.u32 %v1428_v36, %v1427_v46  ;;  %v1431_v59 = vrot.slane %v1427_v46, 4  ;;  %v1435_v12 = vrot.slane %v1433_v62, 7  ;;  %v1374_v8 = vadd.f32 %v5391_v18, %v1358_v49  ;;  %v1340_v60 = vpop.f32.mrb[43].mxu0 }
 0x700   : > { %v1414_v61 = vor.u32 %v1412_v43, %v1411_v50  ;;  %v1415_v0 = vrot.slane %v1411_v50, 4  ;;  %v1419_v10 = vrot.slane %v1417_v51, 7  ;;  %v1372_v13 = vadd.f32 %v5391_v18, %v1356_v40  ;;  %v1528_v43 = vld [vmem:[#allocation2 + $0xb8] sm:$0x1]  ;;  %v1513_v51 = vld [vmem:[#allocation2 + $0x9c] sm:$0xf] }
 0x701   : > { %v1502_v16 = vsel %vm5257_vm9, %v1430_v41, %v1501_v3  ;;  %v1505_v17 = vsel %vm5203_vm6, %v1431_v59, %v1504_v47  ;;  %v1438_v19 = vor.u32 %v1436_v48, %v1435_v12  ;;  %v1439_v20 = vrot.slane %v1435_v12, 4 }
 0x702   : > { %1503 = vst [vmem:[#allocation2 + $0x84] sm:$0xf] %v1502_v16  ;;  %1506 = vst [vmem:[#allocation2 + $0x88] sm:$0x1] %v1505_v17  ;;  %v1490_v23 = vsel %vm5257_vm9, %v1414_v61, %v1489_v55  ;;  %v1493_v24 = vsel %vm5203_vm6, %v1415_v0, %v1492_v58  ;;  %v1422_v26 = vor.u32 %v1420_v54, %v1419_v10  ;;  %v1423_v56 = vrot.slane %v1419_v10, 4  ;;  %v1732_v10 = vpop.permute.xlu1 %1731 }
 0x703   : > { %1491 = vst [vmem:[#allocation2 + $0x6c] sm:$0xf] %v1490_v23  ;;  %1494 = vst [vmem:[#allocation2 + $0x70] sm:$0x1] %v1493_v24  ;;  %v1508_v52 = vsel %vm5257_vm9, %v1438_v19, %v1507_v5  ;;  %v1511_v27 = vsel %vm5203_vm6, %v1439_v20, %v1510_v9  ;;  %v4391_v57 = vpack.c.bf16 %v1374_v8, %v1374_v8  ;;  %v1525_v58 = vld [vmem:[#allocation2 + $0xb4] sm:$0xf] }
 0x704   : > { %v4389_v28 = vpack.c.bf16 %v1372_v13, %v1372_v13  ;;  %1509 = vst [vmem:[#allocation2 + $0x90] sm:$0xf] %v1508_v52  ;;  %1512 = vst [vmem:[#allocation2 + $0x94] sm:$0x1] %v1511_v27  ;;  %v1496_v29 = vsel %vm5257_vm9, %v1422_v26, %v1495_v21  ;;  %v1499_v30 = vsel %vm5203_vm6, %v1423_v56, %v1498_v22  ;;  %v1720_v32 = vpop.f32.mrb[44].mxu0 }
 0x705   : > { %v1359_v31 = vadd.f32 %v4734_v63, %v1265_v15  ;;  %v1357_v53 = vadd.f32 %v1340_v60, %v1263_v2  ;;  %1497 = vst [vmem:[#allocation2 + $0x78] sm:$0xf] %v1496_v29  ;;  %1500 = vst [vmem:[#allocation2 + $0x7c] sm:$0x1] %v1499_v30  ;;  %v1457_v4 = vshrl.u32 %v4391_v57, 16  ;;  %v4755_v3 = vpop.f32.mrb[45].mxu0  ;;  %v1726_v47 = vpack.c.bf16 %v1720_v32, %v1720_v32 }
 0x706   : > { %v1441_v36 = vshrl.u32 %v4389_v28, 16  ;;  %v1723_v62 = vpop.f32.mrb[46].mxu0  ;;  %v4251_v15 = vld [vmem:[%s6774_s1 + $0x6] sm:$0x3]  ;;  %v1460_v48 = vshll.u32 %v4391_v57, 16  ;;  %v1444_v11 = vshll.u32 %v4389_v28, 16  ;;  %v1734_v32 = vpop.permute.xlu1 %1733 }
 0x707   : > { %v1375_v45 = vadd.f32 %v5391_v18, %v1359_v31  ;;  %v1373_v46 = vadd.f32 %v5391_v18, %v1357_v53  ;;  %v1459_v2 = vrot.slane %v1457_v4, 7  ;;  %v4756_v50 = vpop.f32.mrb[47].mxu0  ;;  %v1748_v63 = vsel %vm464_vm0, %v1726_v47, 0  ;;  %4858 = vmatprep.subr.msk.bf16.mxu0 %vm464_vm0, %v1726_v47  ;;  %v1531_v17 = vld [vmem:[#allocation2 + $0xc0] sm:$0xf] }
 0x708   : > { %v1443_v49 = vrot.slane %v1441_v36, 7  ;;  %4758 = vmatpush3.bf16.msra.mxu0 %v1748_v63  ;;  %v2136_v60 = vsel %vm464_vm0, %v4251_v15, 0  ;;  %v1534_v21 = vld [vmem:[#allocation2 + $0xc4] sm:$0x1]  ;;  %v1519_v22 = vld [vmem:[#allocation2 + $0xa8] sm:$0xf] }
 0x709   : > { %v4392_v54 = vpack.c.bf16 %v1375_v45, %v1375_v45  ;;  %v4390_v40 = vpack.c.bf16 %v1373_v46, %v1373_v46  ;;  %v1462_v18 = vor.u32 %v1460_v48, %v1459_v2  ;;  %v1463_v41 = vrot.slane %v1459_v2, 4  ;;  %4860 = vmatprep.subr.msk.bf16.mxu0 %vm464_vm0, %v4251_v15  ;;  %v1522_v23 = vld [vmem:[#allocation2 + $0xac] sm:$0x1]  ;;  %v297_v27 = vld [vmem:[%s5080_s8 + $0x44] sm:$0xf] }
 0x70a   : > { %v1446_v59 = vor.u32 %v1444_v11, %v1443_v49  ;;  %v1447_v55 = vrot.slane %v1443_v49, 4  ;;  %v299_v57 = vld [vmem:[%s5080_s8 + $0x4c] sm:$0xf]  ;;  %v301_v4 = vld [vmem:[%s5080_s8 + $0x54] sm:$0xf] }
 0x70b   : > { %v1465_v12 = vshrl.u32 %v4392_v54, 16  ;;  %v1449_v8 = vshrl.u32 %v4390_v40, 16  ;;  %v1526_v61 = vsel %vm5257_vm9, %v1462_v18, %v1525_v58  ;;  %v1529_v0 = vsel %vm5203_vm6, %v1463_v41, %v1528_v43  ;;  %4760 = vmatmul.mubr.msk.bf16.vlgmr.msra.gmra.mrb[48].mxu0 %vm451_vm1, %v1730_v39  ;;  %v303_v36 = vld [vmem:[%s5080_s8 + $0x5c] sm:$0xf]  ;;  %v305_v3 = vld [vmem:[%s5080_s8 + $0x64] sm:$0xf] }
 0x70c   : > { %v1514_v5 = vsel %vm5257_vm9, %v1446_v59, %v1513_v51  ;;  %v1517_v9 = vsel %vm5203_vm6, %v1447_v55, %v1516_v44  ;;  %1527 = vst [vmem:[#allocation2 + $0xb4] sm:$0xf] %v1526_v61  ;;  %1530 = vst [vmem:[#allocation2 + $0xb8] sm:$0x1] %v1529_v0  ;;  %v1468_v16 = vshll.u32 %v4392_v54, 16  ;;  %v1452_v20 = vshll.u32 %v4390_v40, 16  ;;  %4763 = vmatprep.mubr.msk.bf16.mxu0 %vm451_vm1, %v1732_v10 }
 0x70d   : > { %1515 = vst [vmem:[#allocation2 + $0x9c] sm:$0xf] %v1514_v5  ;;  %1518 = vst [vmem:[#allocation2 + $0xa0] sm:$0x1] %v1517_v9  ;;  %v1467_v13 = vrot.slane %v1465_v12, 7  ;;  %v1451_v19 = vrot.slane %v1449_v8, 7  ;;  %4778 = vmatpush3.bf16.msra.mxu0 %v2136_v60  ;;  %v4254_v53 = vcombine.low %v297_v27, %v299_v57  ;;  %v4255_v43 = vcombine.low %v301_v4, %v303_v36 }
 0x70e   : > { %v307_v39 = vld [vmem:[%s5080_s8 + $0x6c] sm:$0xf]  ;;  %v309_v45 = vld [vmem:[%s5080_s8 + $0x74] sm:$0xf]  ;;  %v311_v46 = vld [vmem:[%s5080_s8 + $0x7c] sm:$0xf] }
 0x70f   : > { %v1470_v24 = vor.u32 %v1468_v16, %v1467_v13  ;;  %v1471_v26 = vrot.slane %v1467_v13, 4  ;;  %v1454_v56 = vor.u32 %v1452_v20, %v1451_v19  ;;  %v1455_v52 = vrot.slane %v1451_v19, 4  ;;  %v4236_v62 = vld [vmem:[%s6776_s3 + $0x4] sm:$0x3]  ;;  %v4253_v55 = vld [vmem:[%s6775_s2 + $0x3] ss:$0 sm:$0xff] }
 0x710   : > { %v4256_v44 = vcombine.low %v305_v3, %v307_v39  ;;  %v4257_v47 = vcombine.low %v309_v45, %v311_v46  ;;  %4859 = vmatprep.subr.msk.bf16.mxu1 %vm464_vm0, %v4236_v62  ;;  %v1842_v15 = vsel %vm464_vm0, %v4236_v62, 0  ;;  %v387_v36 = vld [vmem:[#allocation2 + $0x44] sm:$0x1]  ;;  %v396_v39 = vld [vmem:[#allocation2 + $0x68] sm:$0x1] }
 0x711   : > { %v1532_v28 = vsel %vm5257_vm9, %v1470_v24, %v1531_v17  ;;  %v1535_v29 = vsel %vm5203_vm6, %v1471_v26, %v1534_v21  ;;  %v1520_v30 = vsel %vm5257_vm9, %v1454_v56, %v1519_v22  ;;  %v1523_v31 = vsel %vm5203_vm6, %v1455_v52, %v1522_v23  ;;  %4768 = vmatpush3.bf16.msra.mxu1 %v1842_v15  ;;  %v381_v23 = vld [vmem:[#allocation2 + $0x2c] sm:$0x1]  ;;  %v4267_v46 = vld [vmem:[%s6776_s3 + $0x6] sm:$0x3] }
 0x712   : > { %1533 = vst [vmem:[#allocation2 + $0xc0] sm:$0xf] %v1532_v28  ;;  %1536 = vst [vmem:[#allocation2 + $0xc4] sm:$0x1] %v1535_v29  ;;  %4787 = vmatprep.subr.bf16.mxu1 %v5016_v14  ;;  %v382_v56 = vsel %vm5480_vm10, 0, %v381_v23  ;;  %v388_v3 = vsel %vm5480_vm10, 0, %v387_v36  ;;  %4862 = vmatprep.subr.msk.bf16.mxu0 %vm464_vm0, %v4267_v46 }
 0x713   : > { %1521 = vst [vmem:[#allocation2 + $0xa8] sm:$0xf] %v1520_v30  ;;  %1524 = vst [vmem:[#allocation2 + $0xac] sm:$0x1] %v1523_v31  ;;  %4764 = vmatmul.mubr.msk.bf16.gmra.mrb[52].mxu0 %vm451_vm1, %v1734_v32  ;;  %v375_v28 = vld [vmem:[#allocation2 + $0x14] sm:$0x1] }
 0x714   : > { %4779 = vmatprep.mubr.msk.bf16.mxu0 %vm451_vm1, %v4254_v53  ;;  %383 = vst [vmem:[#allocation2 + $0x2c] sm:$0x1] %v382_v56  ;;  %v376_v29 = vsel %vm5480_vm10, 0, %v375_v28  ;;  %v384_v30 = vld [vmem:[#allocation2 + $0x38] sm:$0x1] }
 0x715   : > { %377 = vst [vmem:[#allocation2 + $0x14] sm:$0x1] %v376_v29  ;;  %v385_v31 = vsel %vm5480_vm10, 0, %v384_v30  ;;  %v378_v53 = vld [vmem:[#allocation2 + $0x20] sm:$0x1] }
 0x716   : > { %386 = vst [vmem:[#allocation2 + $0x38] sm:$0x1] %v385_v31  ;;  %v379_v32 = vsel %vm5480_vm10, 0, %v378_v53  ;;  %389 = vst [vmem:[#allocation2 + $0x44] sm:$0x1] %v388_v3 }
 0x717   : > { %380 = vst [vmem:[#allocation2 + $0x20] sm:$0x1] %v379_v32 }
 0x71b   : > { %4780 = vmatmul.mubr.msk.bf16.vlgmr.msra.gmra.mrb[56].mxu0 %vm451_vm1, %v4255_v43  ;;  %v397_v43 = vsel %vm5480_vm10, 0, %v396_v39 }
 0x71c   : > { %4783 = vmatprep.mubr.msk.bf16.mxu0 %vm451_vm1, %v4256_v44  ;;  %398 = vst [vmem:[#allocation2 + $0x68] sm:$0x1] %v397_v43  ;;  %v390_v44 = vld [vmem:[#allocation2 + $0x50] sm:$0x1]  ;;  %v2048_v31 = vld [vmem:[#allocation2 + $0x14] sm:$0x1] }
 0x71d   : > { %v391_v45 = vsel %vm5480_vm10, 0, %v390_v44  ;;  %v2066_v3 = vld [vmem:[#allocation2 + $0x38] sm:$0x1] }
 0x71e   : > { %392 = vst [vmem:[#allocation2 + $0x50] sm:$0x1] %v391_v45 }
 0x723   : > { %4784 = vmatmul.mubr.msk.bf16.gmra.mrb[60].mxu0 %vm451_vm1, %v4257_v47  ;;  %v2398_v47 = vsel %vm464_vm0, %v4267_v46, 0  ;;  %v2045_v46 = vld [vmem:[#allocation2 + $0x10] sm:$0xf] }
 0x724   : > { %4810 = vmatpush3.bf16.msra.mxu0 %v2398_v47 }
 0x7de   : > { %v4761_v2 = vpop.f32.mrb[48].mxu0 }
 0x7df   : > { %v1784_v48 = vpop.f32.mrb[49].mxu0 }
 0x7e0   : > { %v4762_v49 = vpop.f32.mrb[50].mxu0 }
 0x7e1   : > { %v1824_v11 = vpack.c.bf16 %v4762_v49, %v4761_v2  ;;  %v1787_v50 = vpop.f32.mrb[51].mxu0  ;;  %v1817_v49 = vunpack.c.l.bf16 %v5309_v33 }
 0x7e2   : > { %v1823_v58 = vpack.c.bf16 %v1787_v50, %v1784_v48  ;;  %v1818_v50 = vunpack.c.l.bf16 %v5312_v6 }
 0x7e4   : > { %4769 = vmatprep.mubr.msk.bf16.mxu1 %vm451_vm1, %v1823_v58 }
 0x7e5   : > { %4770 = vmatmul.mubr.msk.bf16.vlgmr.msra.gmra.mrb[20].mxu1 %vm451_vm1, %v1824_v11  ;;  %v1815_v11 = vunpack.c.l.bf16 %v5282_v1 }
 0x7e6   : > { %v4765_v51 = vpop.f32.mrb[52].mxu0 }
 0x7e7   : > { %v1800_v54 = vpop.f32.mrb[53].mxu0 }
 0x7e8   : > { %v4766_v40 = vpop.f32.mrb[54].mxu0 }
 0x7e9   : > { %v1826_v63 = vpack.c.bf16 %v4766_v40, %v4765_v51  ;;  %v1803_v18 = vpop.f32.mrb[55].mxu0  ;;  %v5519_v51 = vld [vmem:[%s6777_s4 + $0x2] ss:$0 sm:$0xff] }
 0x7ea   : > { %v1825_v41 = vpack.c.bf16 %v1803_v18, %v1800_v54  ;;  %v1816_v54 = vunpack.c.l.bf16 %v5285_v25  ;;  %v1819_v25 = vunpack.c.l.bf16 %v5316_v34 }
 0x7ec   : > { %4773 = vmatprep.mubr.msk.bf16.mxu1 %vm451_vm1, %v1825_v41 }
 0x7ed   : > { %4774 = vmatmul.mubr.msk.bf16.gmra.mrb[24].mxu1 %vm451_vm1, %v1826_v63 }
 0x7ee   : > { %v4781_v59 = vpop.f32.mrb[56].mxu0  ;;  %4795 = vmatprep.mubr.msk.bf16.mxu1 %vm5018_vm2, %v5016_v14 }
 0x7ef   : > { %v2172_v12 = vpop.f32.mrb[57].mxu0  ;;  %v2181_v60 = vadd.f32 %v4781_v59, %v4253_v55 }
 0x7f0   : > { %v4782_v8 = vpop.f32.mrb[58].mxu0  ;;  %v2173_v5 = vadd.f32 %v4253_v55, %v2172_v12 }
 0x7f1   : > { %v2184_v61 = vadd.f32 %v4782_v8, %v4253_v55  ;;  %v2175_v0 = vpop.f32.mrb[59].mxu0 }
 0x7f2   : > { %v2176_v9 = vadd.f32 %v4253_v55, %v2175_v0 }
 0x7f3   : > { %v2204_v10 = vpack.c.bf16 %v2184_v61, %v2181_v60  ;;  %v1821_v60 = vunpack.c.l.bf16 %v5328_v37 }
 0x7f4   : > { %v2203_v13 = vpack.c.bf16 %v2176_v9, %v2173_v5 }
 0x7f5   : > { %2213 = vrot.lane.b32.xlu1 %v2204_v10, %s5017_s11 }
 0x7f6   : > { %2283 = vrot.lane.b32.xlu0 %v2203_v13, %s5019_s12  ;;  %4788 = vmatpush3.bf16.msra.mxu1 %v2203_v13  ;;  %v4785_v16 = vpop.f32.mrb[60].mxu0 }
 0x7f7   : > { %v2197_v17 = vadd.f32 %v4785_v16, %v4253_v55  ;;  %v2188_v19 = vpop.f32.mrb[61].mxu0  ;;  %4789 = vmatprep.subr.bf16.mxu1 %v5016_v14 }
 0x7f8   : > { %v2189_v20 = vadd.f32 %v4253_v55, %v2188_v19  ;;  %v4786_v21 = vpop.f32.mrb[62].mxu0 }
 0x7f9   : > { %2211 = vrot.lane.b32.xlu1 %v2203_v13, %s5017_s11  ;;  %v2200_v24 = vadd.f32 %v4786_v21, %v4253_v55  ;;  %v2191_v26 = vpop.f32.mrb[63].mxu0  ;;  %v1820_v13 = vunpack.c.l.bf16 %v5319_v35 }
 0x7fa   : > { %2285 = vrot.lane.b32.xlu0 %v2204_v10, %s5019_s12  ;;  %4790 = vmatpush3.bf16.msra.mxu1 %v2204_v10  ;;  %v2192_v52 = vadd.f32 %v4253_v55, %v2191_v26  ;;  %v1822_v10 = vunpack.c.l.bf16 %v5331_v38 }
 0x7fb   : > { %v2206_v27 = vpack.c.bf16 %v2200_v24, %v2197_v17  ;;  %4791 = vmatprep.subr.bf16.mxu1 %v5016_v14 }
 0x7fc   : > { %v2205_v57 = vpack.c.bf16 %v2192_v52, %v2189_v20  ;;  %v2060_v52 = vld [vmem:[#allocation2 + $0x2c] sm:$0x1] }
 0x7fe   : > { %2215 = vrot.lane.b32.xlu1 %v2205_v57, %s5017_s11  ;;  %2287 = vrot.lane.b32.xlu0 %v2205_v57, %s5019_s12 }
 0x7ff   : > { %4792 = vmatpush3.bf16.msra.mxu1 %v2205_v57 }
 0x800   : > { %4793 = vmatprep.subr.bf16.mxu1 %v5016_v14  ;;  %v393_v14 = vld [vmem:[#allocation2 + $0x5c] sm:$0x1] }
 0x801   : > { %v394_v4 = vsel %vm5480_vm10, 0, %v393_v14  ;;  %v2057_v14 = vld [vmem:[#allocation2 + $0x28] sm:$0xf] }
 0x802   : > { %2217 = vrot.lane.b32.xlu1 %v2206_v27, %s5017_s11  ;;  %2289 = vrot.lane.b32.xlu0 %v2206_v27, %s5019_s12  ;;  %395 = vst [vmem:[#allocation2 + $0x5c] sm:$0x1] %v394_v4 }
 0x803   : > { %4794 = vmatpush3.bf16.msra.mxu1 %v2206_v27 }
 0x867   : > { %v2214_v62 = vpop.permute.xlu1 %2213 }
 0x86b   : > { %v2212_v15 = vpop.permute.xlu1 %2211 }
 0x86c   : > { %2223 = vxpose.xlu1.c.b16.start [1/4] (short) (narrow) %v2212_v15, 16  ;;  %v2054_v15 = vld [vmem:[#allocation2 + $0x20] sm:$0x1] }
 0x870   : > { %2224 = vxpose.xlu1.c.b16.cont [2/4] (short) (narrow) %v2214_v62, 16  ;;  %v2216_v2 = vpop.permute.xlu1 %2215 }
 0x874   : > { %2225 = vxpose.xlu1.c.b16.cont [3/4] (short) (narrow) %v2216_v2, 16  ;;  %v2218_v48 = vpop.permute.xlu1 %2217 }
 0x878   : > { %2226 = vxpose.xlu1.c.b16.end [4/4] (short) (narrow) %v2218_v48, 16 }
 0x8b8   : > { %v4771_v58 = vpop.f32.mrb[20].mxu1 }
 0x8b9   : > { %v1911_v40 = vadd.f32 %v4771_v58, %v1817_v49  ;;  %v1878_v63 = vpop.f32.mrb[21].mxu1  ;;  %v2063_v49 = vld [vmem:[#allocation2 + $0x34] sm:$0xf] }
 0x8ba   : > { %v1909_v18 = vadd.f32 %v1878_v63, %v1815_v11  ;;  %v4772_v41 = vpop.f32.mrb[22].mxu1 }
 0x8bb   : > { %v1927_v59 = vadd.f32 %v5519_v51, %v1911_v40  ;;  %v1912_v55 = vadd.f32 %v4772_v41, %v1818_v50  ;;  %v1881_v33 = vpop.f32.mrb[23].mxu1  ;;  %v2051_v40 = vld [vmem:[#allocation2 + $0x1c] sm:$0xf] }
 0x8bc   : > { %v1925_v1 = vadd.f32 %v5519_v51, %v1909_v18  ;;  %v1910_v12 = vadd.f32 %v1881_v33, %v1816_v54 }
 0x8bd   : > { %v4395_v6 = vpack.c.bf16 %v1927_v59, %v1927_v59  ;;  %v1928_v8 = vadd.f32 %v5519_v51, %v1912_v55 }
 0x8be   : > { %v4393_v61 = vpack.c.bf16 %v1925_v1, %v1925_v1  ;;  %v1926_v0 = vadd.f32 %v5519_v51, %v1910_v12 }
 0x8bf   : > { %v1982_v5 = vshrl.u32 %v4395_v6, 16  ;;  %v4396_v9 = vpack.c.bf16 %v1928_v8, %v1928_v8  ;;  %v1985_v16 = vshll.u32 %v4395_v6, 16 }
 0x8c0   : > { %v1966_v17 = vshrl.u32 %v4393_v61, 16  ;;  %v1969_v19 = vshll.u32 %v4393_v61, 16  ;;  %v4394_v20 = vpack.c.bf16 %v1926_v0, %v1926_v0  ;;  %v4775_v21 = vpop.f32.mrb[24].mxu1 }
 0x8c1   : > { %v1984_v23 = vrot.slane %v1982_v5, 7  ;;  %v1990_v24 = vshrl.u32 %v4396_v9, 16  ;;  %v1993_v26 = vshll.u32 %v4396_v9, 16  ;;  %v1915_v37 = vadd.f32 %v4775_v21, %v1821_v60  ;;  %v1894_v56 = vpop.f32.mrb[25].mxu1  ;;  %v2084_v5 = vld [vmem:[#allocation2 + $0x5c] sm:$0x1] }
 0x8c2   : > { %v1968_v27 = vrot.slane %v1966_v17, 7  ;;  %v1974_v57 = vshrl.u32 %v4394_v20, 16  ;;  %v1977_v34 = vshll.u32 %v4394_v20, 16  ;;  %v1913_v28 = vadd.f32 %v1894_v56, %v1819_v25  ;;  %v4776_v29 = vpop.f32.mrb[26].mxu1  ;;  %v2072_v9 = vld [vmem:[#allocation2 + $0x44] sm:$0x1] }
 0x8c3   : > { %v1987_v30 = vor.u32 %v1985_v16, %v1984_v23  ;;  %v1988_v38 = vrot.slane %v1984_v23, 4  ;;  %v1992_v35 = vrot.slane %v1990_v24, 7  ;;  %v1931_v53 = vadd.f32 %v5519_v51, %v1915_v37  ;;  %v1897_v32 = vpop.f32.mrb[27].mxu1  ;;  %v2081_v21 = vld [vmem:[#allocation2 + $0x58] sm:$0xf] }
 0x8c4   : > { %v1971_v4 = vor.u32 %v1969_v19, %v1968_v27  ;;  %v1972_v36 = vrot.slane %v1968_v27, 4  ;;  %v1976_v39 = vrot.slane %v1974_v57, 7  ;;  %v1929_v43 = vadd.f32 %v5519_v51, %v1913_v28  ;;  %v2069_v23 = vld [vmem:[#allocation2 + $0x40] sm:$0xf] }
 0x8c5   : > { %v2058_v44 = vsel %vm5257_vm9, %v1987_v30, %v2057_v14  ;;  %v2061_v45 = vsel %vm5203_vm6, %v1988_v38, %v2060_v52  ;;  %v1995_v47 = vor.u32 %v1993_v26, %v1992_v35  ;;  %v1996_v62 = vrot.slane %v1992_v35, 4  ;;  %v2078_v30 = vld [vmem:[#allocation2 + $0x50] sm:$0x1]  ;;  %v2284_v14 = vpop.permute.xlu0 %2283 }
 0x8c6   : > { %2059 = vst [vmem:[#allocation2 + $0x28] sm:$0xf] %v2058_v44  ;;  %2062 = vst [vmem:[#allocation2 + $0x2c] sm:$0x1] %v2061_v45  ;;  %v2046_v2 = vsel %vm5257_vm9, %v1971_v4, %v2045_v46  ;;  %v2049_v48 = vsel %vm5203_vm6, %v1972_v36, %v2048_v31  ;;  %v1979_v11 = vor.u32 %v1977_v34, %v1976_v39  ;;  %v1980_v50 = vrot.slane %v1976_v39, 4 }
 0x8c7   : > { %2047 = vst [vmem:[#allocation2 + $0x10] sm:$0xf] %v2046_v2  ;;  %2050 = vst [vmem:[#allocation2 + $0x14] sm:$0x1] %v2049_v48  ;;  %v2064_v58 = vsel %vm5257_vm9, %v1995_v47, %v2063_v49  ;;  %v2067_v54 = vsel %vm5203_vm6, %v1996_v62, %v2066_v3  ;;  %v4399_v63 = vpack.c.bf16 %v1931_v53, %v1931_v53  ;;  %v2087_v4 = vld [vmem:[#allocation2 + $0x64] sm:$0xf] }
 0x8c8   : > { %v4397_v18 = vpack.c.bf16 %v1929_v43, %v1929_v43  ;;  %2065 = vst [vmem:[#allocation2 + $0x34] sm:$0xf] %v2064_v58  ;;  %2068 = vst [vmem:[#allocation2 + $0x38] sm:$0x1] %v2067_v54  ;;  %v2052_v41 = vsel %vm5257_vm9, %v1979_v11, %v2051_v40  ;;  %v2055_v59 = vsel %vm5203_vm6, %v1980_v50, %v2054_v15  ;;  %v2075_v36 = vld [vmem:[#allocation2 + $0x4c] sm:$0xf] }
 0x8c9   : > { %v1916_v55 = vadd.f32 %v4776_v29, %v1822_v10  ;;  %v1914_v33 = vadd.f32 %v1897_v32, %v1820_v13  ;;  %2053 = vst [vmem:[#allocation2 + $0x1c] sm:$0xf] %v2052_v41  ;;  %2056 = vst [vmem:[#allocation2 + $0x20] sm:$0x1] %v2055_v59  ;;  %v2014_v1 = vshrl.u32 %v4399_v63, 16  ;;  %v2017_v61 = vshll.u32 %v4399_v63, 16 }
 0x8ca   : > { %v1998_v12 = vshrl.u32 %v4397_v18, 16  ;;  %v2001_v25 = vshll.u32 %v4397_v18, 16  ;;  %v2090_v29 = vld [vmem:[#allocation2 + $0x68] sm:$0x1]  ;;  %v5568_v45 = vld [vmem:[#allocation2 + $0x60] sm:$0xf] }
 0x8cb   : > { %v1932_v6 = vadd.f32 %v5519_v51, %v1916_v55  ;;  %v1930_v8 = vadd.f32 %v5519_v51, %v1914_v33  ;;  %v2016_v60 = vrot.slane %v2014_v1, 7  ;;  %v5582_v2 = vld [vmem:[#allocation2 + $0xc] sm:$0xf]  ;;  %v5587_v11 = vld [vmem:[#allocation2 + $0x18] sm:$0xf]  ;;  %v6839_v63 = vmov 0 }
 0x8cc   : > { %v2000_v0 = vrot.slane %v1998_v12, 7  ;;  %v5589_v50 = vld [vmem:[#allocation2 + $0x24] sm:$0xf]  ;;  %v6840_v63 = vsel %vm5596_vm13, 4294967295, %v6839_v63  ;;  %v4318_v41 = vrot.slane %v5582_v2, 9  ;;  %v4319_v1 = vrot.slane %v5587_v11, 9 }
 0x8cd   : > { %v4400_v16 = vpack.c.bf16 %v1932_v6, %v1932_v6  ;;  %v4398_v17 = vpack.c.bf16 %v1930_v8, %v1930_v8  ;;  %v2019_v19 = vor.u32 %v2017_v61, %v2016_v60  ;;  %v2020_v20 = vrot.slane %v2016_v60, 4  ;;  %v5592_v54 = vld [vmem:[#allocation2 + $0x28] sm:$0xf]  ;;  %6841 = vst [vmem:[#allocation4_spill] sm:$0xff] %v6840_v63  ;;  %v5604_v33 = vld [vmem:[#allocation2 + $0x2c] sm:$0x1] }
 0x8ce   : > { %v2003_v10 = vor.u32 %v2001_v25, %v2000_v0  ;;  %v2004_v13 = vrot.slane %v2000_v0, 4  ;;  %v5578_v62 = vld [vmem:[#allocation2 + $0x10] sm:$0xf]  ;;  %v5584_v48 = vld [vmem:[#allocation2 + $0x14] sm:$0x1]  ;;  %v3457_v0 = vrot.slane %v5592_v54, 5 }
 0x8cf   : > { %v2022_v24 = vshrl.u32 %v4400_v16, 16  ;;  %v2006_v26 = vshrl.u32 %v4398_v17, 16  ;;  %v2082_v37 = vsel %vm5257_vm9, %v2019_v19, %v2081_v21  ;;  %v2085_v51 = vsel %vm5203_vm6, %v2020_v20, %v2084_v5  ;;  %v5600_v18 = vld [vmem:[#allocation2 + $0x34] sm:$0xf]  ;;  %v5607_v6 = vld [vmem:[#allocation2 + $0x30] sm:$0xf] }
 0x8d0   : > { %v2070_v56 = vsel %vm5257_vm9, %v2003_v10, %v2069_v23  ;;  %v2073_v52 = vsel %vm5203_vm6, %v2004_v13, %v2072_v9  ;;  %2083 = vst [vmem:[#allocation2 + $0x58] sm:$0xf] %v2082_v37  ;;  %2086 = vst [vmem:[#allocation2 + $0x5c] sm:$0x1] %v2085_v51  ;;  %v2025_v57 = vshll.u32 %v4400_v16, 16  ;;  %v2009_v28 = vshll.u32 %v4398_v17, 16 }
 0x8d1   : > { %2071 = vst [vmem:[#allocation2 + $0x40] sm:$0xf] %v2070_v56  ;;  %2074 = vst [vmem:[#allocation2 + $0x44] sm:$0x1] %v2073_v52  ;;  %v2024_v27 = vrot.slane %v2022_v24, 7  ;;  %v2008_v34 = vrot.slane %v2006_v26, 7 }
 0x8d2   : > { %v2231_v32 = vpop.trf.xlu1  ;;  %v5580_v15 = vld [vmem:[#allocation2 + $0x1c] sm:$0xf]  ;;  %v3443_v49 = vrot.slane %v5578_v62, 5  ;;  %v5594_v40 = vld [vmem:[#allocation2 + $0x20] sm:$0x1]  ;;  %v3446_v55 = vrot.slane %v5584_v48, 5 }
 0x8d3   : > { %v2027_v38 = vor.u32 %v2025_v57, %v2024_v27  ;;  %v2028_v31 = vrot.slane %v2024_v27, 4  ;;  %v2011_v35 = vor.u32 %v2009_v28, %v2008_v34  ;;  %v2012_v53 = vrot.slane %v2008_v34, 4  ;;  %4796 = vmatmul.mubr.msk.bf16.vlgmr.msra.gmra.mrb[28].mxu1 %vm569_vm3, %v2231_v32  ;;  %v5621_v5 = vld [vmem:[#allocation2 + $0x38] sm:$0x1]  ;;  %v5627_v19 = vld [vmem:[#allocation2 + $0x3c] sm:$0xf] }
 0x8d4   : > { %4801 = vmatprep.mubr.msk.bf16.mxu1 %vm451_vm1, %v2284_v14  ;;  %v3450_v58 = vrot.slane %v5580_v15, 5  ;;  %v3445_v59 = vrot.slane %v3443_v49, 4  ;;  %v5611_v8 = vsel %vm5596_vm13, %v4318_v41, %v3443_v49  ;;  %v3453_v61 = vrot.slane %v5594_v40, 5 }
 0x8d5   : > { %v2088_v3 = vsel %vm5257_vm9, %v2027_v38, %v2087_v4  ;;  %v2091_v39 = vsel %vm5203_vm6, %v2028_v31, %v2090_v29  ;;  %v2076_v43 = vsel %vm5257_vm9, %v2011_v35, %v2075_v36  ;;  %v2079_v44 = vsel %vm5203_vm6, %v2012_v53, %v2078_v30  ;;  %6842 = vst [vmem:[#allocation5_spill] sm:$0xff] %v5611_v8  ;;  %v5663_v31 = vld [vmem:[#allocation2 + $0x48] sm:$0xf] }
 0x8d6   : > { %2089 = vst [vmem:[#allocation2 + $0x64] sm:$0xf] %v2088_v3  ;;  %2092 = vst [vmem:[#allocation2 + $0x68] sm:$0x1] %v2091_v39  ;;  %v3452_v12 = vrot.slane %v3450_v58, 4  ;;  %v5615_v60 = vsel %vm5596_vm13, %v3445_v59, %v3446_v55  ;;  %v4320_v16 = vrot.slane %v5589_v50, 9  ;;  %v5631_v20 = vsel %vm5596_vm13, %v4319_v1, %v3450_v58 }
 0x8d7   : > { %2077 = vst [vmem:[#allocation2 + $0x4c] sm:$0xf] %v2076_v43  ;;  %2080 = vst [vmem:[#allocation2 + $0x50] sm:$0x1] %v2079_v44  ;;  %v3464_v17 = vrot.slane %v5600_v18, 5  ;;  %v3459_v13 = vrot.slane %v3457_v0, 4 }
 0x8d8   : > { %6843 = vst [vmem:[#allocation6_spill] sm:$0xff] %v5615_v60  ;;  %v5619_v25 = vld [vmem:[#allocation2 + $0x40] sm:$0xf]  ;;  %6844 = vst [vmem:[#allocation7_spill] sm:$0xff] %v5631_v20  ;;  %v5635_v10 = vsel %vm5596_vm13, %v3452_v12, %v3453_v61  ;;  %v3460_v21 = vrot.slane %v5604_v33, 5  ;;  %v4321_v26 = vrot.slane %v5607_v6, 9  ;;  %v5647_v56 = vsel %vm5596_vm13, %v4320_v16, %v3457_v0 }
 0x8d9   : > { %6845 = vst [vmem:[#allocation8_spill] sm:$0xff] %v5635_v10  ;;  %v5638_v23 = vld [vmem:[#allocation2 + $0x44] sm:$0x1]  ;;  %v3466_v37 = vrot.slane %v3464_v17, 4  ;;  %6846 = vst [vmem:[#allocation9_spill] sm:$0xff] %v5647_v56  ;;  %v3467_v27 = vrot.slane %v5621_v5, 5 }
 0x8da   : > { %v5651_v52 = vsel %vm5596_vm13, %v3459_v13, %v3460_v21  ;;  %v3471_v57 = vrot.slane %v5619_v25, 5  ;;  %v5657_v28 = vld [vmem:[#allocation2 + $0x58] sm:$0xf]  ;;  %v4322_v30 = vrot.slane %v5627_v19, 9  ;;  %v5667_v35 = vsel %vm5596_vm13, %v4321_v26, %v3464_v17  ;;  %v5680_v44 = vld [vmem:[#allocation2 + $0x54] sm:$0xf] }
 0x8db   : > { %6847 = vst [vmem:[#allocation10_spill] sm:$0xff] %v5651_v52  ;;  %6848 = vst [vmem:[#allocation11_spill] sm:$0xff] %v5667_v35  ;;  %v5671_v53 = vsel %vm5596_vm13, %v3466_v37, %v3467_v27  ;;  %v3474_v14 = vrot.slane %v5638_v23, 5  ;;  %v4325_v3 = vrot.slane %v5568_v45, 9  ;;  %v2672_v49 = vld [vmem:[#allocation2 + $0x5c] sm:$0x1] }
 0x8dc   : > { %6849 = vst [vmem:[#allocation12_spill] sm:$0xff] %v5671_v53  ;;  %v3473_v32 = vrot.slane %v3471_v57, 4  ;;  %v5684_v58 = vsel %vm5596_vm13, %v4322_v30, %v3471_v57  ;;  %v3485_v55 = vrot.slane %v5657_v28, 5  ;;  %v4323_v16 = vrot.slane %v5663_v31, 9  ;;  %v5775_v1 = vld [vmem:[#allocation2 + $0x6c] sm:$0xf] }
 0x8dd   : > { %v5570_v46 = vld [vmem:[#allocation2 + $0x64] sm:$0xf]  ;;  %v5643_v51 = vld [vmem:[#allocation2 + $0x68] sm:$0x1]  ;;  %6851 = vst [vmem:[#allocation14_spill] sm:$0xff] %v5684_v58  ;;  %v4324_v21 = vrot.slane %v5680_v44, 9 }
 0x8de   : > { %v5574_v47 = vcombine.low %v5568_v45, %v5570_v46  ;;  %v5655_v34 = vld [vmem:[#allocation2 + $0x4c] sm:$0xf]  ;;  %v3492_v38 = vrot.slane %v5570_v46, 5  ;;  %v5674_v4 = vld [vmem:[#allocation2 + $0x50] sm:$0x1]  ;;  %v3495_v43 = vrot.slane %v5643_v51, 5  ;;  %v5688_v41 = vsel %vm5596_vm13, %v3473_v32, %v3474_v14 }
 0x8df   : > { %6850 = vst [vmem:[#allocation13_spill] sm:$0xff] %v5674_v4  ;;  %6852 = vst [vmem:[#allocation15_spill] sm:$0xff] %v5688_v41  ;;  %v3478_v59 = vrot.slane %v5655_v34, 5  ;;  %v3481_v13 = vrot.slane %v5674_v4, 5  ;;  %v3487_v26 = vrot.slane %v3485_v55, 4  ;;  %v3488_v37 = vrot.slane %v2672_v49, 5 }
 0x8e0   : > { %6838 = vst [vmem:[#allocation3_spill] sm:$0xff] %v5574_v47  ;;  %4863 = vmatprep.subr.msk.bf16.mxu0 %vm451_vm1, %v5574_v47  ;;  %v3494_v39 = vrot.slane %v3492_v38, 4  ;;  %v3493_v12 = vsel %vm5596_vm13, %v4325_v3, %v3492_v38  ;;  %v5715_v38 = vsel %vm5596_vm13, %v4324_v21, %v3485_v55  ;;  %v2912_v22 = vshrl.u32 %v5582_v2, 16  ;;  %v5785_v47 = vld [vmem:[#allocation2 + $0x84] sm:$0xf] }
 0x8e1   : > { %v3480_v17 = vrot.slane %v3478_v59, 4  ;;  %v5705_v27 = vsel %vm5596_vm13, %v4323_v16, %v3478_v59  ;;  %6856 = vst [vmem:[#allocation19_spill] sm:$0xff] %v5715_v38  ;;  %v5719_v32 = vsel %vm5596_vm13, %v3487_v26, %v3488_v37  ;;  %v3008_v14 = vshrl.u32 %v5627_v19, 16  ;;  %v5813_v4 = vld [vmem:[#allocation2 + $0x9c] sm:$0xf] }
 0x8e2   : > { %v3496_v61 = vsel %vm5596_vm13, %v3494_v39, %v3495_v43  ;;  %6854 = vst [vmem:[#allocation17_spill] sm:$0xff] %v5705_v27  ;;  %6857 = vst [vmem:[#allocation20_spill] sm:$0xff] %v5719_v32  ;;  %v2286_v39 = vpop.permute.xlu0 %2285  ;;  %v3032_v29 = vshrl.u32 %v5663_v31, 16  ;;  %v3035_v24 = vshll.u32 %v5663_v31, 16  ;;  %v3107_v38 = vshll.u32 %v5775_v1, 16 }
 0x8e3   : > { %v5698_v0 = vcombine.low %v3493_v12, %v3496_v61  ;;  %v5709_v57 = vsel %vm5596_vm13, %v3480_v17, %v3481_v13  ;;  %v405_v17 = vld [vmem:[#allocation2 + $0x8c] sm:$0x1]  ;;  %v3083_v27 = vshll.u32 %v5568_v45, 16  ;;  %6863 = vst [vmem:[#allocation26_spill] sm:$0xff] %v5813_v4 }
 0x8e4   : > { %6855 = vst [vmem:[#allocation18_spill] sm:$0xff] %v5709_v57  ;;  %v406_v13 = vsel %vm5480_vm10, 0, %v405_v17  ;;  %v399_v17 = vld [vmem:[#allocation2 + $0x74] sm:$0x1]  ;;  %v5789_v57 = vld [vmem:[#allocation2 + $0x90] sm:$0xf] }
 0x8e5   : > { %6853 = vst [vmem:[#allocation16_spill] sm:$0xff] %v5698_v0  ;;  %407 = vst [vmem:[#allocation2 + $0x8c] sm:$0x1] %v406_v13  ;;  %v400_v13 = vsel %vm5480_vm10, 0, %v399_v17  ;;  %v3034_v0 = vrot.slane %v3032_v29, 4  ;;  %v3037_v41 = vrot.slane %v3035_v24, 5 }
 0x8e6   : > { %v2288_v55 = vpop.permute.xlu0 %2287  ;;  %401 = vst [vmem:[#allocation2 + $0x74] sm:$0x1] %v400_v13  ;;  %v3109_v29 = vrot.slane %v3107_v38, 5  ;;  %v5809_v52 = vrot.slane %v3083_v27, 5  ;;  %v2921_v38 = vshll.u32 %v5578_v62, 16 }
 0x8e7   : > { %v3038_v56 = vor.u32 %v3037_v41, %v3034_v0  ;;  %v3200_v0 = vshrl.u32 %v5813_v4, 16 }
 0x8e8   : > { %6861 = vst [vmem:[#allocation24_spill] sm:$0xff] %v5809_v52 }
 0x8ea   : > { %v2290_v16 = vpop.permute.xlu0 %2289 }
 0x9a6   : > { %v2276_v3 = vpop.f32.mrb[28].mxu1 }
 0x9a7   : > { %v2282_v43 = vpack.c.bf16 %v2276_v3, %v2276_v3  ;;  %v4797_v49 = vpop.f32.mrb[29].mxu1 }
 0x9a8   : > { %v2279_v59 = vpop.f32.mrb[30].mxu1 }
 0x9a9   : > { %v2304_v12 = vsel %vm464_vm0, %v2282_v43, 0  ;;  %4861 = vmatprep.subr.msk.bf16.mxu1 %vm464_vm0, %v2282_v43  ;;  %v4798_v61 = vpop.f32.mrb[31].mxu1  ;;  %vm5880_vm0 = vmor %vm2884_vm14, %vm2885_vm15 }
 0x9aa   : > { %4800 = vmatpush3.bf16.msra.mxu1 %v2304_v12 }
 0x9ad   : > { %4802 = vmatmul.mubr.msk.bf16.vlgmr.msra.gmra.mrb[32].mxu1 %vm451_vm1, %v2286_v39 }
 0x9ae   : > { %4805 = vmatprep.mubr.msk.bf16.mxu1 %vm451_vm1, %v2288_v55 }
 0x9b5   : > { %4806 = vmatmul.mubr.msk.bf16.gmra.mrb[36].mxu1 %vm451_vm1, %v2290_v16 }
 0xa80   : > { %v4803_v21 = vpop.f32.mrb[32].mxu1 }
 0xa81   : > { %v2340_v26 = vpop.f32.mrb[33].mxu1 }
 0xa82   : > { %v4804_v37 = vpop.f32.mrb[34].mxu1 }
 0xa83   : > { %v2380_v3 = vpack.c.bf16 %v4804_v37, %v4803_v21  ;;  %v2343_v43 = vpop.f32.mrb[35].mxu1  ;;  %v408_v21 = vld [vmem:[#allocation2 + $0x98] sm:$0x1]  ;;  %v402_v37 = vld [vmem:[#allocation2 + $0x80] sm:$0x1] }
 0xa84   : > { %v2379_v49 = vpack.c.bf16 %v2343_v43, %v2340_v26  ;;  %v409_v26 = vsel %vm5480_vm10, 0, %v408_v21  ;;  %v5020_v43 = vmov 0  }
 0xa85   : > { %410 = vst [vmem:[#allocation2 + $0x98] sm:$0x1] %v409_v26  ;;  %313 = vst.msk [vmem:[#allocation2] sm:$0xf] %vm312_vm7, %v5020_v43  ;;  %4948 = vset.pattern.permute.xlu0 %v5020_v43 }
 0xa86   : > { %4811 = vmatprep.mubr.msk.bf16.mxu0 %vm451_vm1, %v2379_v49  ;;  %314 = vst.msk [vmem:[#allocation2 + $0x4] sm:$0xf] %vm312_vm7, %v5020_v43  ;;  %318 = vst.msk [vmem:[#allocation2 + $0xcc] sm:$0xf] %vm312_vm7, %v5020_v43  ;;  %v417_v49 = vld [vmem:[#allocation2 + $0xbc] sm:$0x1] }
 0xa87   : > { %4812 = vmatmul.mubr.msk.bf16.vlgmr.msra.gmra.mrb[64].mxu0 %vm451_vm1, %v2380_v3  ;;  %v403_v3 = vsel %vm5480_vm10, 0, %v402_v37  ;;  %316 = vst.msk [vmem:[#allocation2 + $0x8] sm:$0x1] %vm315_vm4, %v5020_v43  ;;  %320 = vst.msk [vmem:[#allocation2 + $0xd4] sm:$0x1] %vm315_vm4, %v5020_v43 }
 0xa88   : > { %v4807_v39 = vpop.f32.mrb[36].mxu1  ;;  %319 = vst.msk [vmem:[#allocation2 + $0xd0] sm:$0xf] %vm312_vm7, %v5020_v43  ;;  %404 = vst [vmem:[#allocation2 + $0x80] sm:$0x1] %v403_v3  ;;  %v2915_v43 = vshll.u32 %v5582_v2, 16 }
 0xa89   : > { %v2356_v59 = vpop.f32.mrb[37].mxu1  ;;  %v2709_v3 = vld [vmem:[%s6778_s5] sm:$0xf] }
 0xa8a   : > { %v4808_v12 = vpop.f32.mrb[38].mxu1 }
 0xa8b   : > { %v2382_v61 = vpack.c.bf16 %v4808_v12, %v4807_v39  ;;  %v2359_v55 = vpop.f32.mrb[39].mxu1  ;;  %v418_v39 = vsel %vm5480_vm10, 0, %v417_v49  ;;  %v2914_v49 = vrot.slane %v2912_v22, 4  ;;  %v3011_v22 = vshll.u32 %v5627_v19, 16 }
 0xa8c   : > { %v2381_v16 = vpack.c.bf16 %v2359_v55, %v2356_v59  ;;  %v411_v59 = vld [vmem:[#allocation2 + $0xa4] sm:$0x1]  ;;  %419 = vst [vmem:[#allocation2 + $0xbc] sm:$0x1] %v418_v39  ;;  %v5754_v13 = vld [vmem:[#allocation2] sm:$0xf] }
 0xa8d   : > { %v412_v12 = vsel %vm5480_vm10, 0, %v411_v59  ;;  %v5756_v21 = vld [vmem:[#allocation2 + $0x4] sm:$0xf]  ;;  %v2917_v39 = vrot.slane %v2915_v43, 5  ;;  %v2936_v59 = vshrl.u32 %v5587_v11, 16  ;;  %v3013_v32 = vrot.slane %v3011_v22, 5 }
 0xa8e   : > { %4815 = vmatprep.mubr.msk.bf16.mxu0 %vm451_vm1, %v2381_v16  ;;  %413 = vst [vmem:[#allocation2 + $0xa4] sm:$0x1] %v412_v12  ;;  %v414_v16 = vld [vmem:[#allocation2 + $0xb0] sm:$0x1]  ;;  %6858 = vst [vmem:[#allocation21_spill] sm:$0xff] %v5756_v21  ;;  %v4282_v26 = vcombine.low %v5754_v13, %v5756_v21  ;;  %v2939_v12 = vshll.u32 %v5587_v11, 16 }
 0xa8f   : > { %4816 = vmatmul.mubr.msk.bf16.gmra.mrb[68].mxu0 %vm451_vm1, %v2382_v61  ;;  %v420_v61 = vld [vmem:[#allocation2 + $0xc8] sm:$0x1]  ;;  %v415_v17 = vsel %vm5480_vm10, 0, %v414_v16  ;;  %v2984_v16 = vshrl.u32 %v5607_v6, 16  ;;  %v3176_v22 = vshrl.u32 %v5789_v57, 16 }
 0xa90   : > { %v421_v55 = vsel %vm5480_vm10, 0, %v420_v61  ;;  %416 = vst [vmem:[#allocation2 + $0xb0] sm:$0x1] %v415_v17  ;;  %v2794_v37 = vsel %vm451_vm1, %v4282_v26, 0  ;;  %4505 = vmatprep.mubr.msk.bf16.mxu0 %vm451_vm1, %v2709_v3  ;;  %v2960_v61 = vshrl.u32 %v5589_v50, 16  ;;  %v2918_v17 = vor.u32 %v2917_v39, %v2914_v49 }
 0xa91   : > { %422 = vst [vmem:[#allocation2 + $0xc8] sm:$0x1] %v421_v55  ;;  %4490 = vmatpush3.bf16.xpose.msra.mxu0 %v2794_v37  ;;  %v2963_v55 = vshll.u32 %v5589_v50, 16  ;;  %v2987_v26 = vshll.u32 %v5607_v6, 16  ;;  %v2938_v37 = vrot.slane %v2936_v59, 4  ;;  %v2941_v3 = vrot.slane %v2939_v12, 5 }
 0xa92   : > { %v2962_v43 = vrot.slane %v2960_v61, 4  ;;  %v2986_v36 = vrot.slane %v2984_v16, 4  ;;  %v5779_v9 = vrot.slane %v2918_v17, 4  ;;  %v3056_v39 = vshrl.u32 %v5680_v44, 16  ;;  %v5783_v12 = vld [vmem:[#allocation2 + $0x78] sm:$0xf] }
 0xa93   : > { %v2965_v30 = vrot.slane %v2963_v55, 5  ;;  %v2989_v49 = vrot.slane %v2987_v26, 5  ;;  %v3059_v59 = vshll.u32 %v5680_v44, 16  ;;  %v2942_v61 = vor.u32 %v2941_v3, %v2938_v37  ;;  %v4354_v26 = vld [vmem:[%s6778_s5 + $0x10] sm:$0xf] }
 0xa94   : > { %v3010_v55 = vrot.slane %v3008_v14, 4  ;;  %v3104_v16 = vshrl.u32 %v5775_v1, 16  ;;  %v3080_v44 = vshrl.u32 %v5568_v45, 16  ;;  %4577 = vmatprep.mubr.msk.bf16.mxu1 %vm451_vm1, %v4354_v26  ;;  %v3128_v14 = vshrl.u32 %v5783_v12, 16  ;;  %v2622_v21 = vld [vmem:[#allocation2 + $0x98] sm:$0x1] }
 0xa95   : > { %v2966_v17 = vor.u32 %v2965_v30, %v2962_v43  ;;  %v3131_v37 = vshll.u32 %v5783_v12, 16  ;;  %v3152_v3 = vshrl.u32 %v5785_v47, 16  ;;  %v3155_v30 = vshll.u32 %v5785_v47, 16 }
 0xa96   : > { %v3179_v43 = vshll.u32 %v5789_v57, 16  ;;  %v5803_v58 = vrot.slane %v2942_v61, 4  ;;  %v2990_v53 = vor.u32 %v2989_v49, %v2986_v36  ;;  %v3106_v45 = vrot.slane %v3104_v16, 4  ;;  %v5827_v16 = vld [vmem:[#allocation2 + $0xb4] sm:$0xf] }
 0xa97   : > { %v3014_v24 = vor.u32 %v3013_v32, %v3010_v55  ;;  %v5805_v35 = vrot.slane %v3056_v39, 4  ;;  %v5807_v26 = vrot.slane %v3080_v44, 4  ;;  %v5811_v10 = vrot.slane %v3059_v59, 5  ;;  %v5825_v55 = vld [vmem:[#allocation2 + $0xa8] sm:$0xf]  ;;  %6865 = vst [vmem:[#allocation28_spill] sm:$0xff] %v5827_v16 }
 0xa98   : > { %v3130_v20 = vrot.slane %v3128_v14, 4  ;;  %v3133_v60 = vrot.slane %v3131_v37, 5  ;;  %v3154_v8 = vrot.slane %v3152_v3, 4  ;;  %v3157_v63 = vrot.slane %v3155_v30, 5  ;;  %6864 = vst [vmem:[#allocation27_spill] sm:$0xff] %v5825_v55 }
 0xa99   : > { %6859 = vst [vmem:[#allocation22_spill] sm:$0xff] %v5805_v35  ;;  %6860 = vst [vmem:[#allocation23_spill] sm:$0xff] %v5807_v26  ;;  %v2925_v36 = vshrl.u32 %v5578_v62, 16  ;;  %v3178_v32 = vrot.slane %v3176_v22, 4  ;;  %v3181_v49 = vrot.slane %v3179_v43, 5  ;;  %v3110_v39 = vor.u32 %v3109_v29, %v3106_v45 }
 0xa9a   : > { %6862 = vst [vmem:[#allocation25_spill] sm:$0xff] %v5811_v10  ;;  %v5817_v61 = vrot.slane %v2966_v17, 4  ;;  %v5819_v27 = vrot.slane %v2990_v53, 4  ;;  %v5821_v41 = vrot.slane %v3014_v24, 4  ;;  %v3203_v59 = vshll.u32 %v5813_v4, 16 }
 0xa9b   : > { %v3134_v44 = vor.u32 %v3133_v60, %v3130_v20  ;;  %v5831_v37 = vrot.slane %v3038_v56, 4  ;;  %v5835_v17 = vrot.slane %v2921_v38, 5  ;;  %v2927_v3 = vrot.slane %v2925_v36, 4  ;;  %v5855_v35 = vld [vmem:[#allocation2 + $0xc0] sm:$0xf] }
 0xa9c   : > { %v3158_v30 = vor.u32 %v3157_v63, %v3154_v8  ;;  %v3182_v22 = vor.u32 %v3181_v49, %v3178_v32  ;;  %v5837_v43 = vrot.slane %v3110_v39, 4  ;;  %v3224_v45 = vshrl.u32 %v5825_v55, 16  ;;  %6868 = vst [vmem:[#allocation31_spill] sm:$0xff] %v5855_v35 }
 0xa9d   : > { %6866 = vst [vmem:[#allocation29_spill] sm:$0xff] %v5831_v37  ;;  %v3227_v29 = vshll.u32 %v5825_v55, 16  ;;  %v3248_v60 = vshrl.u32 %v5827_v16, 16  ;;  %v2949_v20 = vshrl.u32 %v5580_v15, 16  ;;  %v2945_v56 = vshll.u32 %v5580_v15, 16 }
 0xa9e   : > { %v3202_v24 = vrot.slane %v3200_v0, 4  ;;  %v3205_v14 = vrot.slane %v3203_v59, 5  ;;  %v3251_v38 = vshll.u32 %v5827_v16, 16  ;;  %v2928_v32 = vor.u32 %v2927_v3, %v5835_v17  ;;  %v2616_v16 = vld [vmem:[#allocation2 + $0x8c] sm:$0x1] }
 0xa9f   : > { %v5849_v49 = vrot.slane %v3134_v44, 4  ;;  %v5851_v39 = vrot.slane %v3158_v30, 4  ;;  %v5853_v53 = vrot.slane %v3182_v22, 4  ;;  %v3226_v0 = vrot.slane %v3224_v45, 4  ;;  %v2604_v55 = vld [vmem:[#allocation2 + $0x74] sm:$0x1] }
 0xaa0   : > { %v3229_v59 = vrot.slane %v3227_v29, 5  ;;  %v5857_v10 = vrot.slane %v3248_v60, 4  ;;  %v2931_v63 = vshll.u32 %v5584_v48, 16  ;;  %v5861_v37 = vrot.slane %v2945_v56, 5 }
 0xaa1   : > { %6867 = vst [vmem:[#allocation30_spill] sm:$0xff] %v5853_v53  ;;  %v2951_v8 = vrot.slane %v2949_v20, 4  ;;  %v3206_v3 = vor.u32 %v3205_v14, %v3202_v24  ;;  %v5863_v44 = vrot.slane %v3251_v38, 5  ;;  %v2929_v45 = vrot.slane %v2928_v32, 4 }
 0xaa2   : > { %6869 = vst [vmem:[#allocation32_spill] sm:$0xff] %v5857_v10  ;;  %v2973_v29 = vshrl.u32 %v5592_v54, 16  ;;  %v2969_v60 = vshll.u32 %v5592_v54, 16  ;;  %v4283_v48 = vcombine.low %v5582_v2, %v5578_v62  ;;  %v3230_v56 = vor.u32 %v3229_v59, %v3226_v0  ;;  %v4998_v10 = vld [vmem:[%s5080_s8 + $0x6c] sm:$0xf] }
 0xaa3   : > { %6870 = vst [vmem:[#allocation33_spill] sm:$0xff] %v5863_v44  ;;  %v2933_v24 = vrot.slane %v2931_v63, 5  ;;  %v2952_v38 = vor.u32 %v2951_v8, %v5861_v37  ;;  %v5874_v30 = vrot.slane %v3206_v3, 4  ;;  %v4284_v32 = vcombine.low %v5587_v11, %v5580_v15 }
 0xaa4   : > { %v4285_v62 = vcombine.low %v5589_v50, %v5592_v54  ;;  %v2955_v2 = vshll.u32 %v5594_v40, 16  ;;  %v4286_v15 = vcombine.low %v5607_v6, %v5600_v18  ;;  %v5893_v11 = vrot.slane %v2969_v60, 5  ;;  %v4991_v60 = vld [vmem:[%s5080_s8 + $0x54] sm:$0xf] }
 0xaa5   : > { %6871 = vst [vmem:[#allocation34_spill] sm:$0xff] %v5874_v30  ;;  %v2934_v8 = vsel %vm5880_vm0, %v2929_v45, %v2933_v24  ;;  %v2975_v0 = vrot.slane %v2973_v29, 4  ;;  %v5896_v59 = vsel %vm451_vm1, %v4283_v48, 0  ;;  %v2979_v50 = vshll.u32 %v5604_v33, 16  ;;  %v4992_v24 = vld [vmem:[%s5080_s8 + $0x44] sm:$0xf] }
 0xaa6   : > { %6874 = vst [vmem:[#allocation35_spill] sm:$0xff] %v5896_v59  ;;  %v4287_v54 = vcombine.low %v5627_v19, %v5619_v25  ;;  %v5901_v40 = vrot.slane %v3230_v56, 4  ;;  %v2924_v6 = vsel %vm5880_vm0, %v5779_v9, %v5835_v17  ;;  %v2953_v3 = vrot.slane %v2952_v38, 4  ;;  %v4993_v38 = vld [vmem:[%s5080_s8 + $0x5c] sm:$0xf] }
 0xaa7   : > { %v2997_v45 = vshrl.u32 %v5600_v18, 16  ;;  %v2993_v29 = vshll.u32 %v5600_v18, 16  ;;  %v2373_v48 = vunpack.c.l.bf16 %v4991_v60  ;;  %v5911_v33 = vsel %vm451_vm1, %v4284_v32, 0 }
 0xaa8   : > { %6875 = vst [vmem:[#allocation36_spill] sm:$0xff] %v5901_v40  ;;  %6876 = vst [vmem:[#allocation37_spill] sm:$0xff] %v5911_v33  ;;  %v4301_v19 = vcombine.low %v2924_v6, %v2934_v8  ;;  %v5914_v56 = vsel %vm451_vm1, %v4285_v62, 0  ;;  %v2371_v63 = vunpack.c.l.bf16 %v4992_v24  ;;  %v2957_v20 = vrot.slane %v2955_v2, 5  ;;  %v5934_v2 = vld [vmem:[%s6777_s4 + $0x3] ss:$0 sm:$0xff] }
 0xaa9   : > { %6877 = vst [vmem:[#allocation38_spill] sm:$0xff] %v5914_v56  ;;  %v5918_v9 = vsel %vm451_vm1, %v4286_v15, 0  ;;  %v2976_v17 = vor.u32 %v2975_v0, %v5893_v11  ;;  %v2374_v18 = vunpack.c.l.bf16 %v4993_v38  ;;  %v2948_v32 = vsel %vm5880_vm0, %v5803_v58, %v5861_v37  ;;  %v4994_v15 = vld [vmem:[%s5080_s8 + $0x4c] sm:$0xf] }
 0xaaa   : > { %6878 = vst [vmem:[#allocation39_spill] sm:$0xff] %v5918_v9  ;;  %v5926_v60 = vrot.slane %v2979_v50, 5  ;;  %v5929_v62 = vsel %vm451_vm1, %v4287_v54, 0  ;;  %v2372_v0 = vunpack.c.l.bf16 %v4994_v15  ;;  %v2958_v6 = vsel %vm5880_vm0, %v2953_v3, %v2957_v20 }
 0xaab   : > { %6879 = vst [vmem:[#allocation40_spill] sm:$0xff] %v5929_v62  ;;  %v5939_v24 = vrot.slane %v2993_v29, 5  ;;  %v5941_v38 = vrot.slane %v2997_v45, 4  ;;  %v5944_v50 = vsel %vm451_vm1, %v4301_v19, 0  ;;  %v5952_v29 = vrot.slane %v2976_v17, 4 }
 0xaac   : > { %v5956_v14 = vcombine.low %v2948_v32, %v2958_v6  ;;  %v4995_v6 = vld [vmem:[%s5080_s8 + $0x74] sm:$0xf]  ;;  %v4997_v17 = vld [vmem:[%s5080_s8 + $0x7c] sm:$0xf] }
 0xb5a   : > { %v4813_v8 = vpop.f32.mrb[64].mxu0 }
 0xb5b   : > { %v2467_v58 = vadd.f32 %v4813_v8, %v2373_v48  ;;  %v2434_v37 = vpop.f32.mrb[65].mxu0 }
 0xb5c   : > { %v2465_v20 = vadd.f32 %v2434_v37, %v2371_v63  ;;  %v4814_v3 = vpop.f32.mrb[66].mxu0 }
 0xb5d   : > { %v2483_v48 = vadd.f32 %v5934_v2, %v2467_v58  ;;  %v2468_v19 = vadd.f32 %v4814_v3, %v2374_v18  ;;  %v2437_v8 = vpop.f32.mrb[67].mxu0  ;;  %v2377_v58 = vunpack.c.l.bf16 %v4995_v6 }
 0xb5e   : > { %v2481_v22 = vadd.f32 %v5934_v2, %v2465_v20  ;;  %v2466_v15 = vadd.f32 %v2437_v8, %v2372_v0  ;;  %v4996_v0 = vld [vmem:[%s5080_s8 + $0x64] sm:$0xf] }
 0xb5f   : > { %v4403_v18 = vpack.c.bf16 %v2483_v48, %v2483_v48  ;;  %v2484_v32 = vadd.f32 %v5934_v2, %v2468_v19  ;;  %v2375_v8 = vunpack.c.l.bf16 %v4996_v0  ;;  %v2378_v48 = vunpack.c.l.bf16 %v4997_v17 }
 0xb60   : > { %v4401_v3 = vpack.c.bf16 %v2481_v22, %v2481_v22  ;;  %v2482_v20 = vadd.f32 %v5934_v2, %v2466_v15  ;;  %v2376_v19 = vunpack.c.l.bf16 %v4998_v10 }
 0xb61   : > { %v2538_v54 = vshrl.u32 %v4403_v18, 16  ;;  %v4404_v45 = vpack.c.bf16 %v2484_v32, %v2484_v32  ;;  %v2541_v44 = vshll.u32 %v4403_v18, 16 }
 0xb62   : > { %v2522_v6 = vshrl.u32 %v4401_v3, 16  ;;  %v2525_v26 = vshll.u32 %v4401_v3, 16  ;;  %v4402_v37 = vpack.c.bf16 %v2482_v20, %v2482_v20  ;;  %v4817_v22 = vpop.f32.mrb[68].mxu0  ;;  %v2613_v20 = vld [vmem:[#allocation2 + $0x88] sm:$0xf] }
 0xb63   : > { %v2540_v52 = vrot.slane %v2538_v54, 7  ;;  %v2546_v15 = vshrl.u32 %v4404_v45, 16  ;;  %v2549_v40 = vshll.u32 %v4404_v45, 16  ;;  %v2471_v0 = vadd.f32 %v4817_v22, %v2377_v58  ;;  %v2450_v35 = vpop.f32.mrb[69].mxu0 }
 0xb64   : > { %v2524_v62 = vrot.slane %v2522_v6, 7  ;;  %v2530_v30 = vshrl.u32 %v4402_v37, 16  ;;  %v2533_v63 = vshll.u32 %v4402_v37, 16  ;;  %v2469_v53 = vadd.f32 %v2450_v35, %v2375_v8  ;;  %v4818_v32 = vpop.f32.mrb[70].mxu0  ;;  %v2610_v8 = vld [vmem:[#allocation2 + $0x80] sm:$0x1] }
 0xb65   : > { %v2543_v9 = vor.u32 %v2541_v44, %v2540_v52  ;;  %v2544_v17 = vrot.slane %v2540_v52, 4  ;;  %v2548_v10 = vrot.slane %v2546_v15, 7  ;;  %v2487_v18 = vadd.f32 %v5934_v2, %v2471_v0  ;;  %v2453_v3 = vpop.f32.mrb[71].mxu0  ;;  %v2601_v44 = vld [vmem:[#allocation2 + $0x70] sm:$0xf] }
 0xb66   : > { %v2527_v4 = vor.u32 %v2525_v26, %v2524_v62  ;;  %v2528_v54 = vrot.slane %v2524_v62, 4  ;;  %v2532_v45 = vrot.slane %v2530_v30, 7  ;;  %v2485_v58 = vadd.f32 %v5934_v2, %v2469_v53  ;;  %v2619_v62 = vld [vmem:[#allocation2 + $0x94] sm:$0xf] }
 0xb67   : > { %v2614_v6 = vsel %vm5257_vm9, %v2543_v9, %v2613_v20  ;;  %v2617_v35 = vsel %vm5203_vm6, %v2544_v17, %v2616_v16  ;;  %v2551_v52 = vor.u32 %v2549_v40, %v2548_v10  ;;  %v2552_v37 = vrot.slane %v2548_v10, 4  ;;  %v2607_v9 = vld [vmem:[#allocation2 + $0x7c] sm:$0xf] }
 0xb68   : > { %2615 = vst [vmem:[#allocation2 + $0x88] sm:$0xf] %v2614_v6  ;;  %2618 = vst [vmem:[#allocation2 + $0x8c] sm:$0x1] %v2617_v35  ;;  %v2602_v26 = vsel %vm5257_vm9, %v2527_v4, %v2601_v44  ;;  %v2605_v30 = vsel %vm5203_vm6, %v2528_v54, %v2604_v55  ;;  %v2535_v53 = vor.u32 %v2533_v63, %v2532_v45  ;;  %v2536_v22 = vrot.slane %v2532_v45, 4 }
 0xb69   : > { %2603 = vst [vmem:[#allocation2 + $0x70] sm:$0xf] %v2602_v26  ;;  %2606 = vst [vmem:[#allocation2 + $0x74] sm:$0x1] %v2605_v30  ;;  %v2620_v16 = vsel %vm5257_vm9, %v2551_v52, %v2619_v62  ;;  %v2623_v40 = vsel %vm5203_vm6, %v2552_v37, %v2622_v21  ;;  %v4407_v15 = vpack.c.bf16 %v2487_v18, %v2487_v18  ;;  %v6880_v54 = vshll.u32 %v5621_v5, 16 }
 0xb6a   : > { %v4405_v0 = vpack.c.bf16 %v2485_v58, %v2485_v58  ;;  %2621 = vst [vmem:[#allocation2 + $0x94] sm:$0xf] %v2620_v16  ;;  %2624 = vst [vmem:[#allocation2 + $0x98] sm:$0x1] %v2623_v40  ;;  %v2608_v4 = vsel %vm5257_vm9, %v2535_v53, %v2607_v9  ;;  %v2611_v55 = vsel %vm5203_vm6, %v2536_v22, %v2610_v8  ;;  %v2640_v44 = vld [vmem:[#allocation2 + $0xbc] sm:$0x1] }
 0xb6b   : > { %v2472_v63 = vadd.f32 %v4818_v32, %v2378_v48  ;;  %v2470_v17 = vadd.f32 %v2453_v3, %v2376_v19  ;;  %2609 = vst [vmem:[#allocation2 + $0x7c] sm:$0xf] %v2608_v4  ;;  %2612 = vst [vmem:[#allocation2 + $0x80] sm:$0x1] %v2611_v55  ;;  %v2570_v10 = vshrl.u32 %v4407_v15, 16  ;;  %v5998_v21 = vrot.slane %v6880_v54, 5 }
 0xb6c   : > { %v2554_v20 = vshrl.u32 %v4405_v0, 16  ;;  %v6881_v18 = vcombine.low %v5663_v31, %v5655_v34  ;;  %v6010_v48 = vsel %vm451_vm1, %v5956_v14, 0  ;;  %v3017_v19 = vshll.u32 %v5619_v25, 16  ;;  %v2628_v52 = vld [vmem:[#allocation2 + $0xa4] sm:$0x1] }
 0xb6d   : > { %v2488_v58 = vadd.f32 %v5934_v2, %v2472_v63  ;;  %v2486_v6 = vadd.f32 %v5934_v2, %v2470_v17  ;;  %v2572_v32 = vrot.slane %v2570_v10, 7  ;;  %v2573_v5 = vshll.u32 %v4407_v15, 16  ;;  %v2637_v22 = vld [vmem:[#allocation2 + $0xb8] sm:$0xf]  ;;  %v2625_v9 = vld [vmem:[#allocation2 + $0xa0] sm:$0xf] }
 0xb6e   : > { %v6004_v45 = vsel %vm451_vm1, %v6881_v18, 0  ;;  %v2556_v3 = vrot.slane %v2554_v20, 7  ;;  %v2557_v35 = vshll.u32 %v4405_v0, 16  ;;  %v6882_v8 = vsel %vm5880_vm0, %v5952_v29, %v5926_v60  ;;  %v2646_v63 = vld [vmem:[#allocation2 + $0xc8] sm:$0x1] }
 0xb6f   : > { %v4408_v31 = vpack.c.bf16 %v2488_v58, %v2488_v58  ;;  %v4406_v37 = vpack.c.bf16 %v2486_v6, %v2486_v6  ;;  %v6883_v14 = vsel %vm5880_vm0, %v5817_v61, %v5893_v11  ;;  %v6884_v26 = vor.u32 %v5941_v38, %v5939_v24  ;;  %v2643_v6 = vld [vmem:[#allocation2 + $0xc4] sm:$0xf] }
 0xb70   : > { %v6023_v2 = vcombine.low %v6883_v14, %v6882_v8  ;;  %v2575_v62 = vor.u32 %v2573_v5, %v2572_v32  ;;  %v2576_v53 = vrot.slane %v2572_v32, 4  ;;  %v2559_v16 = vor.u32 %v2557_v35, %v2556_v3  ;;  %v6030_v4 = vld [vmem:[#allocation2 + $0x70] sm:$0xf]  ;;  %v6040_v17 = vld [vmem:[#allocation2 + $0x74] sm:$0x1] }
 0xb71   : > { %v6028_v30 = vrot.slane %v6884_v26, 4  ;;  %v2560_v40 = vrot.slane %v2556_v3, 4  ;;  %v2578_v15 = vshrl.u32 %v4408_v31, 16  ;;  %v2581_v60 = vshll.u32 %v4408_v31, 16  ;;  %v2634_v32 = vld [vmem:[#allocation2 + $0xb0] sm:$0x1] }
 0xb72   : > { %v2562_v29 = vshrl.u32 %v4406_v37, 16  ;;  %v2565_v0 = vshll.u32 %v4406_v37, 16  ;;  %v2638_v61 = vsel %vm5257_vm9, %v2575_v62, %v2637_v22  ;;  %v2641_v11 = vsel %vm5203_vm6, %v2576_v53, %v2640_v44  ;;  %v6047_v58 = vld [vmem:[#allocation2 + $0x7c] sm:$0xf]  ;;  %v2631_v8 = vld [vmem:[#allocation2 + $0xac] sm:$0xf] }
 0xb73   : > { %v2626_v38 = vsel %vm5257_vm9, %v2559_v16, %v2625_v9  ;;  %v2629_v55 = vsel %vm5203_vm6, %v2560_v40, %v2628_v52  ;;  %2639 = vst [vmem:[#allocation2 + $0xb8] sm:$0xf] %v2638_v61  ;;  %2642 = vst [vmem:[#allocation2 + $0xbc] sm:$0x1] %v2641_v11  ;;  %v2580_v10 = vrot.slane %v2578_v15, 7  ;;  %v6044_v54 = vcombine.low %v5775_v1, %v6030_v4 }
 0xb74   : > { %2627 = vst [vmem:[#allocation2 + $0xa0] sm:$0xf] %v2626_v38  ;;  %2630 = vst [vmem:[#allocation2 + $0xa4] sm:$0x1] %v2629_v55  ;;  %v2564_v20 = vrot.slane %v2562_v29, 7  ;;  %v3117_v18 = vshrl.u32 %v6030_v4, 16  ;;  %v6051_v5 = vcombine.low %v5783_v12, %v6047_v58  ;;  %v3006_v7 = vsel %vm5880_vm0, %v6028_v30, %v5998_v21 }
 0xb75   : > { %6885 = vst [vmem:[#allocation41_spill] sm:$0xff] %v6044_v54  ;;  %v3141_v3 = vshrl.u32 %v6047_v58, 16  ;;  %v3113_v35 = vshll.u32 %v6030_v4, 16  ;;  %v3123_v44 = vshll.u32 %v6040_v17, 16  ;;  %v2583_v52 = vor.u32 %v2581_v60, %v2580_v10  ;;  %4864 = vmatprep.subr.msk.bf16.mxu0 %vm451_vm1, %v6044_v54  ;;  %v6058_v14 = vld [vmem:[#allocation2 + $0x88] sm:$0xf] }
 0xb76   : > { %v2584_v31 = vrot.slane %v2580_v10, 4  ;;  %v2567_v1 = vor.u32 %v2565_v0, %v2564_v20  ;;  %v2568_v37 = vrot.slane %v2564_v20, 4  ;;  %4492 = vmatpush3.bf16.xpose.msra.mxu0 %v5896_v59  ;;  %v3119_v62 = vrot.slane %v3117_v18, 4  ;;  %v6061_v53 = vld [vmem:[#allocation2 + $0x80] sm:$0x1] }
 0xb77   : > { %v3115_v26 = vrot.slane %v3113_v35, 5  ;;  %v6063_v22 = vrot.slane %v3017_v19, 5  ;;  %v6886_v16 = vshrl.u32 %v5619_v25, 16  ;;  %v2644_v9 = vsel %vm5257_vm9, %v2583_v52, %v2643_v6  ;;  %4865 = vmatprep.subr.msk.bf16.mxu0 %vm451_vm1, %v6051_v5  ;;  %v6086_v38 = vld [vmem:[#allocation2 + $0x94] sm:$0xf] }
 0xb78   : > { %v2647_v15 = vsel %vm5203_vm6, %v2584_v31, %v2646_v63  ;;  %v2632_v60 = vsel %vm5257_vm9, %v2567_v1, %v2631_v8  ;;  %v2635_v29 = vsel %vm5203_vm6, %v2568_v37, %v2634_v32  ;;  %2645 = vst [vmem:[#allocation2 + $0xc4] sm:$0xf] %v2644_v9  ;;  %v3165_v19 = vshrl.u32 %v6058_v14, 16  ;;  %v6095_v21 = vld [vmem:[#allocation2 + $0x8c] sm:$0x1] }
 0xb79   : > { %v6067_v40 = vrot.slane %v6886_v16, 4  ;;  %2648 = vst [vmem:[#allocation2 + $0xc8] sm:$0x1] %v2647_v15  ;;  %2633 = vst [vmem:[#allocation2 + $0xac] sm:$0xf] %v2632_v60  ;;  %v3120_v25 = vor.u32 %v3119_v62, %v3115_v26  ;;  %v3137_v0 = vshll.u32 %v6047_v58, 16  ;;  %v3116_v32 = vsel %vm5880_vm0, %v5837_v43, %v3115_v26 }
 0xb7a   : > { %2636 = vst [vmem:[#allocation2 + $0xb0] sm:$0x1] %v2635_v29  ;;  %v3125_v61 = vrot.slane %v3123_v44, 5  ;;  %v3143_v42 = vrot.slane %v3141_v3, 4  ;;  %v3147_v11 = vshll.u32 %v6061_v53, 16  ;;  %v3027_v55 = vshll.u32 %v5638_v23, 16 }
 0xb7b   : > { %v3121_v63 = vrot.slane %v3120_v25, 4  ;;  %v3139_v10 = vrot.slane %v3137_v0, 5  ;;  %v3161_v20 = vshll.u32 %v6058_v14, 16  ;;  %v3167_v18 = vrot.slane %v3165_v19, 4  ;;  %v6090_v6 = vld [vmem:[#allocation2 + $0xa0] sm:$0xf] }
 0xb7c   : > { %v6887_v30 = vsel %vm5880_vm0, %v5819_v27, %v5939_v24  ;;  %v3089_v35 = vshll.u32 %v5570_v46, 16  ;;  %v3189_v31 = vshrl.u32 %v6086_v38, 16  ;;  %v6111_v37 = vcombine.low %v5785_v47, %v6058_v14 }
 0xb7d   : > { %v4304_v3 = vcombine.low %v6887_v30, %v3006_v7  ;;  %v3126_v44 = vsel %vm5880_vm0, %v3121_v63, %v3125_v61  ;;  %v3144_v52 = vor.u32 %v3143_v42, %v3139_v10  ;;  %v3163_v1 = vrot.slane %v3161_v20, 5 }
 0xb7e   : > { %v6107_v43 = vcombine.low %v3116_v32, %v3126_v44  ;;  %6888 = vst [vmem:[#allocation42_spill] sm:$0xff] %v6111_v37  ;;  %v3213_v27 = vshrl.u32 %v6090_v6, 16  ;;  %v3185_v24 = vshll.u32 %v6086_v38, 16  ;;  %4494 = vmatpush3.bf16.xpose.msra.mxu0 %v5911_v33  ;;  %v3149_v26 = vrot.slane %v3147_v11, 5 }
 0xb7f   : > { %v3145_v8 = vrot.slane %v3144_v52, 4  ;;  %v3168_v62 = vor.u32 %v3167_v18, %v3163_v1  ;;  %v3171_v16 = vshll.u32 %v6095_v21, 16  ;;  %4866 = vmatprep.subr.msk.bf16.mxu0 %vm451_vm1, %v6111_v37  ;;  %v3140_v9 = vsel %vm5880_vm0, %v5849_v49, %v3139_v10 }
 0xb80   : > { %4895 = vmatprep.subr.msk.bf16.mxu1 %vm451_vm1, %v6107_v43  ;;  %v3209_v15 = vshll.u32 %v6090_v6, 16  ;;  %v3024_v60 = vor.u32 %v6067_v40, %v6063_v22  ;;  %v3041_v29 = vshll.u32 %v5655_v34, 16  ;;  %v6131_v0 = vrot.slane %v3185_v24, 5  ;;  %v6143_v10 = vld [vmem:[#allocation2 + $0xac] sm:$0xf] }
 0xb81   : > { %4562 = vmatpush3.bf16.xpose.msra.mxu1 %v5944_v50  ;;  %v3150_v25 = vsel %vm5880_vm0, %v3145_v8, %v3149_v26  ;;  %v3169_v19 = vrot.slane %v3168_v62, 4  ;;  %v3191_v7 = vrot.slane %v3189_v31, 4  ;;  %v6137_v49 = vsel %vm451_vm1, %v6023_v2, 0  ;;  %v6155_v2 = vld [vmem:[#allocation2 + $0x98] sm:$0x1] }
 0xb82   : > { %v6133_v61 = vcombine.low %v3140_v9, %v3150_v25  ;;  %v3215_v42 = vrot.slane %v3213_v27, 4  ;;  %v6889_v40 = vshrl.u32 %v5570_v46, 16  ;;  %v3173_v63 = vrot.slane %v3171_v16, 5  ;;  %v6168_v27 = vld [vmem:[#allocation2 + $0xa4] sm:$0x1] }
 0xb83   : > { %v6145_v20 = vrot.slane %v3209_v15, 5  ;;  %v6151_v32 = vrot.slane %v3027_v55, 5  ;;  %v6158_v46 = vsel %vm451_vm1, %v4304_v3, 0  ;;  %v6160_v30 = vrot.slane %v3024_v60, 4 }
 0xb84   : > { %v6141_v11 = vrot.slane %v6889_v40, 4  ;;  %4896 = vmatprep.subr.msk.bf16.mxu1 %vm451_vm1, %v6133_v61  ;;  %v6162_v44 = vrot.slane %v3089_v35, 5  ;;  %v3174_v31 = vsel %vm5880_vm0, %v3169_v19, %v3173_v63  ;;  %v3192_v55 = vor.u32 %v3191_v7, %v6131_v0  ;;  %v6198_v63 = vld [vmem:[#allocation2 + $0xb8] sm:$0xf] }
 0xb85   : > { %v6170_v24 = vrot.slane %v3041_v29, 5  ;;  %v6890_v8 = vshrl.u32 %v5655_v34, 16  ;;  %v6178_v3 = vcombine.low %v5789_v57, %v6086_v38  ;;  %v3237_v35 = vshrl.u32 %v6143_v10, 16  ;;  %v6892_v29 = vld [vmem:[#allocation21_spill] sm:$0xff] }
 0xb86   : > { %v3216_v62 = vor.u32 %v3215_v42, %v6145_v20  ;;  %v3233_v16 = vshll.u32 %v6143_v10, 16  ;;  %v2888_v9 = vshrl.u32 %v5754_v13, 16  ;;  %v2891_v15 = vshll.u32 %v5754_v13, 16  ;;  %4496 = vmatpush3.bf16.xpose.msra.mxu0 %v5914_v56  ;;  %v6893_v42 = vld [vmem:[#allocation13_spill] sm:$0xff] }
 0xb87   : > { %v6174_v26 = vrot.slane %v6890_v8, 4  ;;  %6891 = vst [vmem:[#allocation43_spill] sm:$0xff] %v6178_v3  ;;  %v3164_v34 = vsel %vm5880_vm0, %v5851_v39, %v3163_v1  ;;  %v3195_v60 = vshll.u32 %v6155_v2, 16  ;;  %v2901_v25 = vshrl.u32 %v6892_v29, 16  ;;  %4867 = vmatprep.subr.msk.bf16.mxu0 %vm451_vm1, %v6178_v3  ;;  %v6897_v3 = vld [vmem:[#allocation39_spill] sm:$0xff] }
 0xb88   : > { %v6193_v19 = vcombine.low %v3164_v34, %v3174_v31  ;;  %v3219_v7 = vshll.u32 %v6168_v27, 16  ;;  %v3193_v13 = vrot.slane %v3192_v55, 4  ;;  %v2897_v31 = vshll.u32 %v6892_v29, 16  ;;  %v6228_v55 = vld [vmem:[#allocation2 + $0xb0] sm:$0x1] }
 0xb89   : > { %4564 = vmatpush3.bf16.xpose.msra.mxu1 %v6010_v48  ;;  %v3217_v8 = vrot.slane %v3216_v62, 4  ;;  %v6209_v34 = vrot.slane %v3233_v16, 5  ;;  %v3239_v40 = vrot.slane %v3237_v35, 4  ;;  %v3197_v52 = vrot.slane %v3195_v60, 5  ;;  %v6894_v16 = vld [vmem:[#allocation26_spill] sm:$0xff] }
 0xb8a   : > { %4897 = vmatprep.subr.msk.bf16.mxu1 %vm451_vm1, %v6193_v19  ;;  %v6214_v18 = vrot.slane %v2888_v9, 4  ;;  %v6216_v39 = vrot.slane %v2891_v15, 5  ;;  %v3221_v1 = vrot.slane %v3219_v7, 5  ;;  %v3261_v29 = vshrl.u32 %v6198_v63, 16  ;;  %v6896_v7 = vld [vmem:[#allocation27_spill] sm:$0xff] }
 0xb8b   : > { %v6219_v59 = vrot.slane %v2901_v25, 4  ;;  %v3506_v62 = vrot.slane %v6047_v58, 5  ;;  %v6224_v35 = vcombine.low %v6894_v16, %v6090_v6  ;;  %v3198_v60 = vsel %vm5880_vm0, %v3193_v13, %v3197_v52  ;;  %v6898_v52 = vld [vmem:[#allocation30_spill] sm:$0xff] }
 0xb8c   : > { %v3257_v9 = vshll.u32 %v6198_v63, 16  ;;  %v6231_v15 = vrot.slane %v2897_v31, 5  ;;  %v6235_v23 = vcombine.low %v6896_v7, %v6143_v10  ;;  %v3222_v58 = vsel %vm5880_vm0, %v3217_v8, %v3221_v1  ;;  %v6899_v31 = vld [vmem:[#allocation34_spill] sm:$0xff] }
 0xb8d   : > { %6895 = vst [vmem:[#allocation21_spill] sm:$0xff] %v6224_v35  ;;  %v3240_v25 = vor.u32 %v3239_v40, %v6209_v34  ;;  %v3508_v54 = vrot.slane %v3506_v62, 4  ;;  %v3188_v13 = vsel %vm5880_vm0, %v6898_v52, %v6131_v0  ;;  %v3212_v56 = vsel %vm5880_vm0, %v6899_v31, %v6145_v20 }
 0xb8e   : > { %4498 = vmatpush3.bf16.xpose.msra.mxu0 %v6897_v3  ;;  %v3509_v37 = vrot.slane %v6061_v53, 5  ;;  %v3513_v33 = vrot.slane %v6058_v14, 5  ;;  %v6253_v40 = vcombine.low %v3188_v13, %v3198_v60  ;;  %v3243_v1 = vshll.u32 %v6228_v55, 16  ;;  %v6300_v3 = vld [vmem:[#allocation2 + $0xc8] sm:$0x1] }
 0xb8f   : > { %4868 = vmatprep.subr.msk.bf16.mxu0 %vm451_vm1, %v6224_v35  ;;  %v6256_v8 = vrot.slane %v3261_v29, 4  ;;  %v3520_v0 = vrot.slane %v6086_v38, 5  ;;  %v6260_v52 = vcombine.low %v3212_v56, %v3222_v58  ;;  %v6262_v20 = vrot.slane %v3257_v9, 5  ;;  %v6277_v9 = vld [vmem:[#allocation2 + $0xbc] sm:$0x1] }
 0xb90   : > { %v6900_v53 = vrot.slane %v5783_v12, 9  ;;  %v3510_v60 = vsel %vm5596_vm13, %v3508_v54, %v3509_v37  ;;  %v6272_v29 = vrot.slane %v3240_v25, 4  ;;  %v3515_v13 = vrot.slane %v3513_v33, 4  ;;  %v6282_v54 = vld [vmem:[#allocation2 + $0xc4] sm:$0xf] }
 0xb91   : > { %4566 = vmatpush3.bf16.xpose.msra.mxu1 %v6137_v49  ;;  %v3516_v56 = vrot.slane %v6095_v21, 5  ;;  %v3522_v58 = vrot.slane %v3520_v0, 4  ;;  %v3523_v12 = vrot.slane %v6155_v2, 5  ;;  %v6902_v37 = vrot.slane %v5785_v47, 9 }
 0xb92   : > { %v3507_v31 = vsel %vm5596_vm13, %v6900_v53, %v3506_v62  ;;  %4898 = vmatprep.subr.msk.bf16.mxu1 %vm451_vm1, %v6253_v40  ;;  %v3527_v62 = vrot.slane %v6090_v6, 5  ;;  %v3534_v53 = vrot.slane %v6143_v10, 5  ;;  %v6903_v21 = vrot.slane %v5789_v57, 9 }
 0xb93   : > { %v6274_v38 = vcombine.low %v3507_v31, %v3510_v60  ;;  %v3514_v25 = vsel %vm5596_vm13, %v6902_v37, %v3513_v33  ;;  %v3517_v31 = vsel %vm5596_vm13, %v3515_v13, %v3516_v56  ;;  %v3541_v2 = vrot.slane %v6198_v63, 5 }
 0xb94   : > { %v3521_v60 = vsel %vm5596_vm13, %v6903_v21, %v3520_v0  ;;  %v6295_v6 = vcombine.low %v3514_v25, %v3517_v31  ;;  %v3524_v10 = vsel %vm5596_vm13, %v3522_v58, %v3523_v12  ;;  %v3529_v35 = vrot.slane %v3527_v62, 4  ;;  %v6904_v0 = vld [vmem:[#allocation40_spill] sm:$0xff] }
 0xb95   : > { %v3530_v47 = vrot.slane %v6168_v27, 5  ;;  %v6302_v33 = vcombine.low %v3521_v60, %v3524_v10  ;;  %v3536_v13 = vrot.slane %v3534_v53, 4  ;;  %v3537_v57 = vrot.slane %v6228_v55, 5  ;;  %v6329_v10 = vld [vmem:[#allocation2 + $0x8] sm:$0x1] }
 0xb96   : > { %v3544_v56 = vrot.slane %v6277_v9, 5  ;;  %4500 = vmatpush3.bf16.xpose.msra.mxu0 %v6904_v0  ;;  %v6905_v37 = vrot.slane %v6894_v16, 9  ;;  %v3543_v27 = vrot.slane %v3541_v2, 4  ;;  %v3827_v12 = vrot.slane %v6282_v54, 5 }
 0xb97   : > { %v3531_v58 = vsel %vm5596_vm13, %v3529_v35, %v3530_v47  ;;  %4869 = vmatprep.subr.msk.bf16.mxu0 %vm451_vm1, %v6235_v23  ;;  %v6906_v55 = vrot.slane %v6896_v7, 9  ;;  %v3538_v16 = vsel %vm5596_vm13, %v3536_v13, %v3537_v57  ;;  %v6910_v13 = vsel %vm5880_vm0, %v5821_v41, %v6063_v22 }
 0xb98   : > { %v3528_v25 = vsel %vm5596_vm13, %v6905_v37, %v3527_v62  ;;  %v6907_v62 = vld [vmem:[#allocation28_spill] sm:$0xff]  ;;  %v3545_v7 = vsel %vm5596_vm13, %v3543_v27, %v3544_v56  ;;  %v3829_v37 = vrot.slane %v3827_v12, 4 }
 0xb99   : > { %v6316_v31 = vcombine.low %v3528_v25, %v3531_v58  ;;  %v3535_v21 = vsel %vm5596_vm13, %v6906_v55, %v3534_v53  ;;  %v6908_v60 = vrot.slane %v6907_v62, 9  ;;  %4568 = vmatpush3.bf16.xpose.msra.mxu1 %v6158_v46  ;;  %v3830_v53 = vrot.slane %v6300_v3, 5 }
 0xb9a   : > { %v6331_v47 = vcombine.low %v3535_v21, %v3538_v16  ;;  %4899 = vmatprep.subr.msk.bf16.mxu1 %vm451_vm1, %v6260_v52  ;;  %v6911_v25 = vshll.u32 %v5657_v28, 16  ;;  %v6912_v58 = vshrl.u32 %v5657_v28, 16  ;;  %v3245_v21 = vrot.slane %v3243_v1, 5 }
 0xb9b   : > { %v3542_v35 = vsel %vm5596_vm13, %v6908_v60, %v3541_v2  ;;  %v6909_v2 = vsel %vm5880_vm0, %v6160_v30, %v6151_v32  ;;  %v6913_v16 = vor.u32 %v6174_v26, %v6170_v24  ;;  %v6914_v30 = vld [vmem:[#allocation31_spill] sm:$0xff]  ;;  %v3831_v22 = vsel %vm5596_vm13, %v3829_v37, %v3830_v53 }
 0xb9c   : > { %v4305_v57 = vcombine.low %v6910_v13, %v6909_v2  ;;  %v6350_v56 = vrot.slane %v6911_v25, 5  ;;  %v3071_v27 = vrot.slane %v6912_v58, 4  ;;  %v6354_v55 = vcombine.low %v3542_v35, %v3545_v7  ;;  %v6919_v58 = vld [vmem:[#allocation36_spill] sm:$0xff] }
 0xb9d   : > { %v3049_v32 = vrot.slane %v6913_v16, 4  ;;  %v6915_v60 = vrot.slane %v6914_v30, 9  ;;  %v2894_v2 = vor.u32 %v6216_v39, %v6214_v18  ;;  %v2904_v28 = vor.u32 %v6219_v59, %v6231_v15 }
 0xb9e   : > { %v2907_v1 = vshll.u32 %v6329_v10, 16  ;;  %v3246_v26 = vsel %vm5880_vm0, %v6272_v29, %v3245_v21  ;;  %v3756_v7 = vshll.u32 %v6282_v54, 16  ;;  %v3760_v37 = vshrl.u32 %v6282_v54, 16  ;;  %4502 = vmatpush3.bf16.xpose.msra.mxu0 %v6004_v45 }
 0xb9f   : > { %v3828_v41 = vsel %vm5596_vm13, %v6915_v60, %v3827_v12  ;;  %v3264_v12 = vor.u32 %v6256_v8, %v6262_v20  ;;  %v6381_v18 = vcombine.low %v6907_v62, %v6198_v63  ;;  %v6916_v59 = vor.u32 %v6141_v11, %v6162_v44 }
 0xba0   : > { %v6370_v35 = vcombine.low %v3828_v41, %v3831_v22  ;;  %v6917_v53 = vshll.u32 %v5643_v51, 16  ;;  %v6918_v29 = vshll.u32 %v6893_v42, 16  ;;  %v6392_v8 = vsel %vm451_vm1, %v4305_v57, 0 }
 0xba1   : > { %v3097_v39 = vrot.slane %v6916_v59, 4  ;;  %v3236_v63 = vsel %vm5880_vm0, %v6919_v58, %v6209_v34  ;;  %v3267_v62 = vshll.u32 %v6277_v9, 16  ;;  %v3072_v11 = vor.u32 %v3071_v27, %v6350_v56  ;;  %4870 = vmatprep.subr.msk.bf16.mxu0 %vm451_vm1, %v6381_v18  ;;  %4570 = vmatpush3.bf16.xpose.msra.mxu1 %v6392_v8  ;;  %v4999_v9 = vld [vmem:[#allocation2 + $0x58] sm:$0xf]  ;;  %v5000_v27 = vld [vmem:[#allocation2 + $0x54] sm:$0xf] }
 0xba2   : > { %v3101_v13 = vrot.slane %v6917_v53, 5  ;;  %v3053_v25 = vrot.slane %v6918_v29, 5  ;;  %v6402_v51 = vcombine.low %v3236_v63, %v3246_v26  ;;  %v2895_v21 = vrot.slane %v2894_v2, 4  ;;  %v6920_v59 = vld [vmem:[#allocation24_spill] sm:$0xff]  ;;  %v6921_v26 = vld [vmem:[#allocation23_spill] sm:$0xff] }
 0xba3   : > { %v2909_v57 = vrot.slane %v2907_v1, 5  ;;  %v3265_v16 = vrot.slane %v3264_v12, 4  ;;  %v2905_v60 = vrot.slane %v2904_v28, 4  ;;  %v3758_v41 = vrot.slane %v3756_v7, 5  ;;  %v6925_v12 = vld [vmem:[#allocation29_spill] sm:$0xff] }
 0xba4   : > { %v3054_v42 = vsel %vm5880_vm0, %v3049_v32, %v3053_v25  ;;  %v3762_v34 = vrot.slane %v3760_v37, 4  ;;  %4900 = vmatprep.subr.msk.bf16.mxu1 %vm451_vm1, %v6402_v51  ;;  %v4289_v22 = vcombine.low %v5000_v27, %v4999_v9  ;;  %v6922_v53 = vor.u32 %v6920_v59, %v6921_v26  ;;  %v5001_v58 = vld [vmem:[#allocation2 + $0x5c] sm:$0x1]  ;;  %v6926_v59 = vld [vmem:[#allocation33_spill] sm:$0xff]  ;;  %v6927_v26 = vld [vmem:[#allocation32_spill] sm:$0xff] }
 0xba5   : > { %v6923_v32 = vshrl.u32 %v6914_v30, 16  ;;  %v6924_v1 = vshll.u32 %v6914_v30, 16  ;;  %v3102_v28 = vsel %vm5880_vm0, %v3097_v39, %v3101_v13  ;;  %v3044_v7 = vsel %vm5880_vm0, %v6925_v12, %v6170_v24 }
 0xba6   : > { %v3087_v29 = vrot.slane %v6922_v53, 4  ;;  %v3269_v37 = vrot.slane %v3267_v62, 5  ;;  %v3075_v63 = vshll.u32 %v5001_v58, 16  ;;  %v4306_v27 = vcombine.low %v3044_v7, %v3054_v42 }
 0xba7   : > { %v3749_v2 = vrot.slane %v6923_v32, 4  ;;  %v3752_v25 = vrot.slane %v6924_v1, 5  ;;  %v6928_v30 = vor.u32 %v6926_v59, %v6927_v26  ;;  %v3073_v32 = vrot.slane %v3072_v11, 4 }
 0xba8   : > { %v3092_v9 = vsel %vm5880_vm0, %v3087_v29, %v6162_v44  ;;  %v3270_v39 = vsel %vm5880_vm0, %v3265_v16, %v3269_v37  ;;  %v2900_v24 = vsel %vm5880_vm0, %v2895_v21, %v6231_v15  ;;  %v2910_v13 = vsel %vm5880_vm0, %v2905_v60, %v2909_v57  ;;  %v6929_v60 = vld [vmem:[#allocation25_spill] sm:$0xff] }
 0xba9   : > { %v3255_v53 = vrot.slane %v6928_v30, 4  ;;  %v3763_v62 = vor.u32 %v3762_v34, %v3758_v41  ;;  %v6436_v1 = vsel %vm451_vm1, %v4289_v22, 0  ;;  %v4308_v44 = vcombine.low %v3092_v9, %v3102_v28  ;;  %v6930_v34 = vld [vmem:[#allocation22_spill] sm:$0xff] }
 0xbaa   : > { %4504 = vmatpush3.bf16.xpose.msra.mxu0 %v6436_v1  ;;  %v3077_v42 = vrot.slane %v3075_v63, 5  ;;  %v3766_v16 = vshll.u32 %v6300_v3, 16  ;;  %v6445_v15 = vsel %vm451_vm1, %v4306_v27, 0  ;;  %v4300_v57 = vcombine.low %v2900_v24, %v2910_v13  ;;  %v6464_v63 = vld [vmem:[%s6778_s5 + $0x4] sm:$0xf] }
 0xbab   : > { %v3260_v11 = vsel %vm5880_vm0, %v3255_v53, %v6262_v20  ;;  %4871 = vmatprep.subr.msk.bf16.mxu0 %vm451_vm1, %v4308_v44  ;;  %4572 = vmatpush3.bf16.xpose.msra.mxu1 %v6445_v15  ;;  %v6931_v22 = vor.u32 %v6929_v60, %v6930_v34  ;;  %v3753_v28 = vor.u32 %v3752_v25, %v3749_v2  ;;  %v3764_v12 = vrot.slane %v3763_v62, 4  ;;  %v5002_v27 = vld [vmem:[%s6778_s5] sm:$0xf]  ;;  %v6932_v62 = vld [vmem:[#allocation5_spill] sm:$0xff] }
 0xbac   : > { %v6447_v21 = vcombine.low %v3260_v11, %v3270_v39  ;;  %v3078_v20 = vsel %vm5880_vm0, %v3073_v32, %v3077_v42  ;;  %v3768_v7 = vrot.slane %v3766_v16, 5  ;;  %v3325_v37 = vsel %vm451_vm1, %v4300_v57, 0  ;;  %v6935_v16 = vld [vmem:[#allocation7_spill] sm:$0xff]  ;;  %v6936_v57 = vld [vmem:[#allocation8_spill] sm:$0xff] }
 0xbad   : > { %v3063_v29 = vrot.slane %v6931_v22, 4  ;;  %v3754_v9 = vrot.slane %v3753_v28, 4  ;;  %v3499_v25 = vrot.slane %v6030_v4, 5  ;;  %v3502_v30 = vrot.slane %v6040_v17, 5  ;;  %v5004_v17 = vld [vmem:[%s6778_s5 + $0x10] sm:$0xf] }
 0xbae   : > { %4901 = vmatprep.subr.msk.bf16.mxu1 %vm451_vm1, %v6447_v21  ;;  %v3769_v2 = vsel %vm5880_vm0, %v3764_v12, %v3768_v7  ;;  %v6496_v24 = vsel %vm451_vm1, %v4308_v44, 0  ;;  %v6933_v44 = vld [vmem:[#allocation6_spill] sm:$0xff]  ;;  %v6937_v60 = vcombine.low %v6935_v16, %v6936_v57  ;;  %v6938_v22 = vld [vmem:[#allocation9_spill] sm:$0xff]  ;;  %v6941_v12 = vld [vmem:[#allocation11_spill] sm:$0xff] }
 0xbaf   : > { %v3068_v3 = vsel %vm5880_vm0, %v3063_v29, %v6350_v56  ;;  %v3759_v56 = vsel %vm5880_vm0, %v3754_v9, %v3758_v41  ;;  %v3501_v26 = vrot.slane %v3499_v25, 4  ;;  %v5003_v41 = vld [vmem:[#allocation2 + $0x6c] sm:$0xf]  ;;  %v6934_v11 = vcombine.low %v6932_v62, %v6933_v44  ;;  %v6939_v29 = vld [vmem:[#allocation10_spill] sm:$0xff] }
 0xbb0   : > { %v4307_v58 = vcombine.low %v3068_v3, %v3078_v20  ;;  %v6482_v4 = vcombine.low %v3759_v56, %v3769_v2  ;;  %v4326_v53 = vrot.slane %v5003_v41, 9  ;;  %v6527_v34 = vsel %vm451_vm1, %v6937_v60, 0  ;;  %v6942_v3 = vld [vmem:[#allocation12_spill] sm:$0xff]  ;;  %v6944_v2 = vld [vmem:[#allocation14_spill] sm:$0xff]  ;;  %v6948_v62 = vld [vmem:[#allocation17_spill] sm:$0xff] }
 0xbb1   : > { %4506 = vmatmul.mubr.msk.bf16.vlgmr.msra.gmra.mrb[72].mxu0 %vm451_vm1, %v5002_v27  ;;  %v3503_v32 = vsel %vm5596_vm13, %v3501_v26, %v3502_v30  ;;  %v3603_v42 = vsel %vm451_vm1, %v6934_v11, 0  ;;  %v6940_v20 = vcombine.low %v6938_v22, %v6939_v29  ;;  %v6943_v7 = vcombine.low %v6941_v12, %v6942_v3  ;;  %v5006_v26 = vld [vmem:[#allocation2] sm:$0xf]  ;;  %v6949_v44 = vld [vmem:[#allocation18_spill] sm:$0xff]  ;;  %v4333_v60 = vld [vmem:[%s6778_s5 + $0x8] sm:$0xf] }
 0xbb2   : > { %4508 = vmatpush3.bf16.xpose.msra.mxu0 %v3325_v37  ;;  %4523 = vmatprep.mubr.msk.bf16.mxu0 %vm451_vm1, %v6464_v63  ;;  %v6480_v59 = vsel %vm451_vm1, %v4307_v58, 0  ;;  %v3500_v39 = vsel %vm5596_vm13, %v4326_v53, %v3499_v25  ;;  %v5005_v58 = vld [vmem:[#allocation2 + $0x4] sm:$0xf]  ;;  %v6945_v25 = vld [vmem:[#allocation15_spill] sm:$0xff]  ;;  %v4317_v30 = vrot.slane %v5006_v26, 9  ;;  %v3439_v53 = vrot.slane %v6329_v10, 5 }
 0xbb3   : > { %4872 = vmatprep.subr.msk.bf16.mxu0 %vm451_vm1, %v6107_v43  ;;  %4574 = vmatpush3.bf16.xpose.msra.mxu1 %v6480_v59  ;;  %v6498_v13 = vcombine.low %v3500_v39, %v3503_v32  ;;  %v6539_v28 = vsel %vm451_vm1, %v6940_v20, 0  ;;  %v6551_v37 = vsel %vm451_vm1, %v6943_v7, 0  ;;  %v3436_v9 = vrot.slane %v5005_v58, 5  ;;  %v6951_v22 = vld [vmem:[#allocation19_spill] sm:$0xff]  ;;  %v6952_v29 = vld [vmem:[#allocation20_spill] sm:$0xff]  ;;  %v6955_v7 = vld [vmem:[#allocation42_spill] sm:$0xff] }
 0xbb4   : > { %4902 = vmatprep.subr.msk.bf16.mxu1 %vm451_vm1, %v6482_v4  ;;  %v6946_v27 = vcombine.low %v6944_v2, %v6945_v25  ;;  %v6950_v11 = vcombine.low %v6948_v62, %v6949_v44  ;;  %v6953_v20 = vcombine.low %v6951_v22, %v6952_v29  ;;  %v4361_v3 = vld [vmem:[%s6778_s5 + $0x18] sm:$0xf]  ;;  %v6956_v58 = vld [vmem:[#allocation38_spill] sm:$0xff]  ;;  %v6959_v2 = vld [vmem:[#allocation21_spill] sm:$0xff] }
 0xbb5   : > { %v3438_v41 = vrot.slane %v3436_v9, 4  ;;  %v3437_v32 = vsel %vm5596_vm13, %v4317_v30, %v3436_v9  ;;  %v6957_v9 = vld [vmem:[#allocation43_spill] sm:$0xff]  ;;  %v6960_v25 = vld [vmem:[#allocation41_spill] sm:$0xff]  ;;  %v2703_v44 = vld [vmem:[%s6779_s6] sm:$0xff] }
 0xbb6   : > { %v6563_v56 = vsel %vm451_vm1, %v6946_v27, 0  ;;  %v6580_v16 = vsel %vm451_vm1, %v6950_v11, 0  ;;  %v6598_v12 = vsel %vm451_vm1, %v6953_v20, 0  ;;  %v5007_v27 = vld [vmem:[#allocation2 + $0xc0] sm:$0xf]  ;;  %v2821_v62 = vsel %vm451_vm1, %v6960_v25, 0  ;;  %2706 = vperm.xlu0 %4948, %v2703_v44  }
 0xbb7   : > { %v3440_v39 = vsel %vm5596_vm13, %v3438_v41, %v3439_v53  ;;  %v4352_v26 = vcombine.low %v5007_v27, %v6282_v54  ;;  %v6653_v30 = vld [vmem:[#allocation2 + $0xcc] sm:$0xf]  ;;  %v6655_v41 = vld [vmem:[#allocation2 + $0xd0] sm:$0xf]  ;;  %v6962_v54 = vld [vmem:[#allocation3_spill] sm:$0xff] }
 0xbb8   : > { %v4334_v10 = vcombine.low %v3437_v32, %v3440_v39  ;;  %v4351_v53 = vld [vmem:[%s6778_s5 + $0xc] sm:$0xf]  ;;  %v4362_v32 = vcombine.low %v6653_v30, %v6655_v41  ;;  %v6961_v39 = vld [vmem:[#allocation35_spill] sm:$0xff]  ;;  %v4023_v36 = vrot.slane %v6655_v41, 5 }
 0xbba   : > { %4510 = vmatpush3.bf16.xpose.msra.mxu0 %v5944_v50  ;;  %v4358_v50 = vld [vmem:[%s6778_s5 + $0x14] sm:$0xf]  ;;  %v3600_v57 = vsel %vm451_vm1, %v4334_v10, 0 }
 0xbbb   : > { %4873 = vmatprep.subr.msk.bf16.mxu0 %vm451_vm1, %v6133_v61  ;;  %4576 = vmatpush3.bf16.xpose.msra.mxu1 %v6496_v24 }
 0xbbc   : > { %4903 = vmatprep.subr.msk.bf16.mxu1 %vm451_vm1, %v6498_v13 }
 0xbc2   : > { %4512 = vmatpush3.bf16.xpose.msra.mxu0 %v6010_v48  ;;  %4578 = vmatmul.mubr.msk.bf16.vlgmr.msra.gmra.mrb[40].mxu1 %vm451_vm1, %v5004_v17  ;;  %v6947_v17 = vld [vmem:[#allocation16_spill] sm:$0xff] }
 0xbc3   : > { %4874 = vmatprep.subr.msk.bf16.mxu0 %vm451_vm1, %v6193_v19  ;;  %4580 = vmatpush3.bf16.xpose.msra.mxu1 %v3603_v42 }
 0xbc4   : > { %4595 = vmatprep.mubr.msk.bf16.mxu1 %vm451_vm1, %v4358_v50  ;;  %4904 = vmatprep.subr.msk.bf16.mxu1 %vm451_vm1, %v6274_v38 }
 0xbca   : > { %4514 = vmatpush3.bf16.xpose.msra.mxu0 %v6137_v49 }
 0xbcb   : > { %4875 = vmatprep.subr.msk.bf16.mxu0 %vm451_vm1, %v6253_v40  ;;  %4582 = vmatpush3.bf16.xpose.msra.mxu1 %v6527_v34 }
 0xbcc   : > { %4905 = vmatprep.subr.msk.bf16.mxu1 %vm451_vm1, %v6295_v6 }
 0xbd2   : > { %4516 = vmatpush3.bf16.xpose.msra.mxu0 %v6158_v46 }
 0xbd3   : > { %4876 = vmatprep.subr.msk.bf16.mxu0 %vm451_vm1, %v6260_v52  ;;  %4584 = vmatpush3.bf16.xpose.msra.mxu1 %v6539_v28 }
 0xbd4   : > { %4906 = vmatprep.subr.msk.bf16.mxu1 %vm451_vm1, %v6302_v33 }
 0xbda   : > { %4518 = vmatpush3.bf16.xpose.msra.mxu0 %v6392_v8 }
 0xbdb   : > { %4877 = vmatprep.subr.msk.bf16.mxu0 %vm451_vm1, %v6402_v51  ;;  %4586 = vmatpush3.bf16.xpose.msra.mxu1 %v6551_v37 }
 0xbdc   : > { %4907 = vmatprep.subr.msk.bf16.mxu1 %vm451_vm1, %v6316_v31 }
 0xbe2   : > { %4520 = vmatpush3.bf16.xpose.msra.mxu0 %v6445_v15 }
 0xbe3   : > { %4878 = vmatprep.subr.msk.bf16.mxu0 %vm451_vm1, %v6447_v21  ;;  %4588 = vmatpush3.bf16.xpose.msra.mxu1 %v6563_v56 }
 0xbe4   : > { %4908 = vmatprep.subr.msk.bf16.mxu1 %vm451_vm1, %v6331_v47 }
 0xbea   : > { %4522 = vmatpush3.bf16.xpose.msra.mxu0 %v6480_v59 }
 0xbeb   : > { %4879 = vmatprep.subr.msk.bf16.mxu0 %vm451_vm1, %v6947_v17  ;;  %4590 = vmatpush3.bf16.xpose.msra.mxu1 %v6580_v16 }
 0xbec   : > { %4909 = vmatprep.subr.msk.bf16.mxu1 %vm451_vm1, %v6354_v55 }
 0xbf1   : > { %4524 = vmatmul.mubr.msk.bf16.vlgmr.msra.gmra.mrb[72].mxu0 %vm451_vm1, %v6464_v63  ;;  %v6607_v63 = vsel %vm451_vm1, %v6947_v17, 0  ;;  %v2818_v17 = vsel %vm451_vm1, %v6962_v54, 0 }
 0xbf2   : > { %4526 = vmatpush3.bf16.xpose.msra.mxu0 %v3600_v57  ;;  %4541 = vmatprep.mubr.msk.bf16.mxu0 %vm451_vm1, %v4333_v60  ;;  %v3352_v57 = vsel %vm451_vm1, %v6107_v43, 0  ;;  %v4367_v43 = vrot.slane %v6653_v30, 9 }
 0xbf3   : > { %4880 = vmatprep.subr.msk.bf16.mxu0 %vm451_vm1, %v6498_v13  ;;  %4592 = vmatpush3.bf16.xpose.msra.mxu1 %v6598_v12 }
 0xbf4   : > { %4910 = vmatprep.subr.msk.bf16.mxu1 %vm451_vm1, %v6370_v35 }
 0xbfa   : > { %4528 = vmatpush3.bf16.xpose.msra.mxu0 %v3603_v42  ;;  %v6954_v42 = vld [vmem:[#allocation37_spill] sm:$0xff] }
 0xbfb   : > { %4881 = vmatprep.subr.msk.bf16.mxu0 %vm451_vm1, %v6274_v38  ;;  %4594 = vmatpush3.bf16.xpose.msra.mxu1 %v6607_v63 }
 0xbfc   : > { %4911 = vmatprep.subr.msk.bf16.mxu1 %vm451_vm1, %v6051_v5 }
 0xc02   : > { %4530 = vmatpush3.bf16.xpose.msra.mxu0 %v6527_v34  ;;  %4596 = vmatmul.mubr.msk.bf16.vlgmr.msra.gmra.mrb[40].mxu1 %vm451_vm1, %v4358_v50  ;;  %v6958_v50 = vld [vmem:[#allocation39_spill] sm:$0xff] }
 0xc03   : > { %4882 = vmatprep.subr.msk.bf16.mxu0 %vm451_vm1, %v6295_v6  ;;  %4598 = vmatpush3.bf16.xpose.msra.mxu1 %v6954_v42 }
 0xc04   : > { %4613 = vmatprep.mubr.msk.bf16.mxu1 %vm451_vm1, %v4361_v3  ;;  %4912 = vmatprep.subr.msk.bf16.mxu1 %vm451_vm1, %v6955_v7 }
 0xc0a   : > { %4532 = vmatpush3.bf16.xpose.msra.mxu0 %v6539_v28 }
 0xc0b   : > { %4883 = vmatprep.subr.msk.bf16.mxu0 %vm451_vm1, %v6302_v33  ;;  %4600 = vmatpush3.bf16.xpose.msra.mxu1 %v6956_v58 }
 0xc0c   : > { %4913 = vmatprep.subr.msk.bf16.mxu1 %vm451_vm1, %v6957_v9 }
 0xc12   : > { %4534 = vmatpush3.bf16.xpose.msra.mxu0 %v6551_v37 }
 0xc13   : > { %4884 = vmatprep.subr.msk.bf16.mxu0 %vm451_vm1, %v6316_v31  ;;  %4602 = vmatpush3.bf16.xpose.msra.mxu1 %v6958_v50 }
 0xc14   : > { %4914 = vmatprep.subr.msk.bf16.mxu1 %vm451_vm1, %v6959_v2 }
 0xc1a   : > { %4536 = vmatpush3.bf16.xpose.msra.mxu0 %v6563_v56 }
 0xc1b   : > { %4885 = vmatprep.subr.msk.bf16.mxu0 %vm451_vm1, %v6331_v47  ;;  %4604 = vmatpush3.bf16.xpose.msra.mxu1 %v6904_v0 }
 0xc1c   : > { %4915 = vmatprep.subr.msk.bf16.mxu1 %vm451_vm1, %v6235_v23 }
 0xc22   : > { %4538 = vmatpush3.bf16.xpose.msra.mxu0 %v6580_v16 }
 0xc23   : > { %4886 = vmatprep.subr.msk.bf16.mxu0 %vm451_vm1, %v6354_v55  ;;  %4606 = vmatpush3.bf16.xpose.msra.mxu1 %v6004_v45 }
 0xc24   : > { %4916 = vmatprep.subr.msk.bf16.mxu1 %vm451_vm1, %v6381_v18 }
 0xc2a   : > { %4540 = vmatpush3.bf16.xpose.msra.mxu0 %v6598_v12 }
 0xc2b   : > { %4887 = vmatprep.subr.msk.bf16.mxu0 %vm451_vm1, %v6960_v25  ;;  %4608 = vmatpush3.bf16.xpose.msra.mxu1 %v6436_v1 }
 0xc2c   : > { %4917 = vmatprep.subr.msk.bf16.mxu1 %vm451_vm1, %v4352_v26 }
 0xc31   : > { %4542 = vmatmul.mubr.msk.bf16.vlgmr.msra.gmra.mrb[72].mxu0 %vm451_vm1, %v4333_v60 }
 0xc32   : > { %4544 = vmatpush3.bf16.xpose.msra.mxu0 %v6961_v39  ;;  %4559 = vmatprep.mubr.msk.bf16.mxu0 %vm451_vm1, %v4351_v53 }
 0xc33   : > { %4888 = vmatprep.subr.msk.bf16.mxu0 %vm451_vm1, %v6051_v5  ;;  %4610 = vmatpush3.bf16.xpose.msra.mxu1 %v2818_v17  ;;  %v4364_v5 = vld [vmem:[%s6778_s5 + $0x1c] sm:$0xf] }
 0xc34   : > { %4918 = vmatprep.subr.msk.bf16.mxu1 %vm451_vm1, %v4362_v32 }
 0xc3a   : > { %4546 = vmatpush3.bf16.xpose.msra.mxu0 %v6954_v42 }
 0xc3b   : > { %4889 = vmatprep.subr.msk.bf16.mxu0 %vm451_vm1, %v6955_v7  ;;  %4612 = vmatpush3.bf16.xpose.msra.mxu1 %v2821_v62 }
 0xc3c   : > { %4919 = vmatprep.subr.msk.bf16.mxu1 %vm451_vm1, %v6133_v61  ;;  %v3946_v61 = vshll.u32 %v6653_v30, 16 }
 0xc42   : > { %4548 = vmatpush3.bf16.xpose.msra.mxu0 %v6956_v58  ;;  %4614 = vmatmul.mubr.msk.bf16.vlgmr.msra.gmra.mrb[40].mxu1 %vm451_vm1, %v4361_v3 }
 0xc43   : > { %4890 = vmatprep.subr.msk.bf16.mxu0 %vm451_vm1, %v6957_v9  ;;  %4616 = vmatpush3.bf16.xpose.msra.mxu1 %v6010_v48  ;;  %v3943_v48 = vshrl.u32 %v6653_v30, 16 }
 0xc44   : > { %4631 = vmatprep.mubr.msk.bf16.mxu1 %vm451_vm1, %v4364_v5  ;;  %4920 = vmatprep.subr.msk.bf16.mxu1 %vm451_vm1, %v6193_v19 }
 0xc4a   : > { %4550 = vmatpush3.bf16.xpose.msra.mxu0 %v6958_v50 }
 0xc4b   : > { %4891 = vmatprep.subr.msk.bf16.mxu0 %vm451_vm1, %v6959_v2  ;;  %4618 = vmatpush3.bf16.xpose.msra.mxu1 %v6137_v49  ;;  %v3952_v49 = vshll.u32 %v6655_v41, 16 }
 0xc4c   : > { %4921 = vmatprep.subr.msk.bf16.mxu1 %vm451_vm1, %v6253_v40 }
 0xc4d   : > { %v3954_v19 = vrot.slane %v3952_v49, 5 }
 0xc52   : > { %4552 = vmatpush3.bf16.xpose.msra.mxu0 %v6904_v0 }
 0xc53   : > { %4892 = vmatprep.subr.msk.bf16.mxu0 %vm451_vm1, %v6235_v23  ;;  %4620 = vmatpush3.bf16.xpose.msra.mxu1 %v6158_v46  ;;  %v3956_v23 = vshrl.u32 %v6655_v41, 16  ;;  %v3945_v46 = vrot.slane %v3943_v48, 4 }
 0xc54   : > { %4922 = vmatprep.subr.msk.bf16.mxu1 %vm451_vm1, %v6260_v52  ;;  %v2702_v52 = vld [vmem:[#allocation2 + $0xd4] sm:$0x1] }
 0xc55   : > { %v3958_v40 = vrot.slane %v3956_v23, 4 }
 0xc5a   : > { %4554 = vmatpush3.bf16.xpose.msra.mxu0 %v6004_v45  ;;  %v3948_v45 = vrot.slane %v3946_v61, 5 }
 0xc5b   : > { %4893 = vmatprep.subr.msk.bf16.mxu0 %vm451_vm1, %v6381_v18  ;;  %4622 = vmatpush3.bf16.xpose.msra.mxu1 %v6392_v8  ;;  %v3959_v18 = vor.u32 %v3958_v40, %v3954_v19  ;;  %v3962_v8 = vshll.u32 %v2702_v52, 16 }
 0xc5c   : > { %4923 = vmatprep.subr.msk.bf16.mxu1 %vm451_vm1, %v6402_v51  ;;  %v3949_v0 = vor.u32 %v3948_v45, %v3945_v46 }
 0xc5d   : > { %v3960_v11 = vrot.slane %v3959_v18, 4  ;;  %v3964_v10 = vrot.slane %v3962_v8, 5 }
 0xc5e   : > { %v3950_v51 = vrot.slane %v3949_v0, 4 }
 0xc62   : > { %4556 = vmatpush3.bf16.xpose.msra.mxu0 %v6436_v1  ;;  %v3955_v1 = vsel %vm5880_vm0, %v3950_v51, %v3954_v19 }
 0xc63   : > { %4894 = vmatprep.subr.msk.bf16.mxu0 %vm451_vm1, %v4352_v26  ;;  %4624 = vmatpush3.bf16.xpose.msra.mxu1 %v6445_v15  ;;  %v3965_v15 = vsel %vm5880_vm0, %v3960_v11, %v3964_v10 }
 0xc64   : > { %4924 = vmatprep.subr.msk.bf16.mxu1 %vm451_vm1, %v6447_v21  ;;  %v4365_v21 = vcombine.low %v3955_v1, %v3965_v15 }
 0xc6a   : > { %4558 = vmatpush3.bf16.xpose.msra.mxu0 %v2818_v17 }
 0xc6b   : > { %4626 = vmatpush3.bf16.xpose.msra.mxu1 %v6480_v59  ;;  %v4368_v59 = vld [vmem:[%s6778_s5 + $0x20] sm:$0xf] }
 0xc6c   : > { %4925 = vmatprep.subr.msk.bf16.mxu1 %vm451_vm1, %v6482_v4 }
 0xc71   : > { %4560 = vmatmul.mubr.msk.bf16.vlgmr.msra.gmra.mrb[72].mxu0 %vm451_vm1, %v4351_v53 }
 0xc73   : > { %4628 = vmatpush3.bf16.xpose.msra.mxu1 %v6496_v24 }
 0xc74   : > { %4926 = vmatprep.subr.msk.bf16.mxu1 %vm451_vm1, %v4365_v21 }
 0xc7b   : > { %4630 = vmatpush3.bf16.xpose.msra.mxu1 %v3352_v57 }
 0xc7c   : > { %4927 = vmatprep.subr.msk.bf16.mxu1 %vm451_vm1, %v6274_v38  ;;  %v4025_v38 = vrot.slane %v4023_v36, 4 }
 0xc82   : > { %4632 = vmatmul.mubr.msk.bf16.vlgmr.msra.gmra.mrb[40].mxu1 %vm451_vm1, %v4364_v5 }
 0xc83   : > { %4634 = vmatpush3.bf16.xpose.msra.mxu1 %v6527_v34  ;;  %4649 = vmatprep.mubr.msk.bf16.mxu1 %vm451_vm1, %v4368_v59 }
 0xc84   : > { %4928 = vmatprep.subr.msk.bf16.mxu1 %vm451_vm1, %v6295_v6  ;;  %v4026_v6 = vrot.slane %v2702_v52, 5 }
 0xc8b   : > { %4636 = vmatpush3.bf16.xpose.msra.mxu1 %v6539_v28  ;;  %v2707_v28 = vpop.permute.xlu0 %2706 }
 0xc8c   : > { %4929 = vmatprep.subr.msk.bf16.mxu1 %vm451_vm1, %v6302_v33  ;;  %v4024_v33 = vsel %vm5596_vm13, %v4367_v43, %v4023_v36 }
 0xc93   : > { %4638 = vmatpush3.bf16.xpose.msra.mxu1 %v6551_v37 }
 0xc94   : > { %4930 = vmatprep.subr.msk.bf16.mxu1 %vm451_vm1, %v6316_v31  ;;  %v4027_v31 = vsel %vm5596_vm13, %v4025_v38, %v4026_v6 }
 0xc9b   : > { %4640 = vmatpush3.bf16.xpose.msra.mxu1 %v6563_v56 }
 0xc9c   : > { %4931 = vmatprep.subr.msk.bf16.mxu1 %vm451_vm1, %v6331_v47  ;;  %v4369_v47 = vcombine.low %v4024_v33, %v4027_v31 }
 0xca3   : > { %4642 = vmatpush3.bf16.xpose.msra.mxu1 %v6580_v16 }
 0xca4   : > { %4932 = vmatprep.subr.msk.bf16.mxu1 %vm451_vm1, %v6354_v55  ;;  %v3627_v55 = vsel %vm451_vm1, %v6498_v13, 0 }
 0xcab   : > { %4644 = vmatpush3.bf16.xpose.msra.mxu1 %v6598_v12 }
 0xcac   : > { %4933 = vmatprep.subr.msk.bf16.mxu1 %vm451_vm1, %v6370_v35 }
 0xcb3   : > { %4646 = vmatpush3.bf16.xpose.msra.mxu1 %v6607_v63 }
 0xcb4   : > { %4934 = vmatprep.subr.msk.bf16.mxu1 %vm451_vm1, %v4369_v47 }
 0xcbb   : > { %4648 = vmatpush3.bf16.xpose.msra.mxu1 %v3627_v55 }
 0xcc2   : > { %4650 = vmatmul.mubr.msk.bf16.vlgmr.msra.gmra.mrb[40].mxu1 %vm451_vm1, %v4368_v59 }
 0xd44   : > { %v3737_v4 = vpop.f32.mrb[72].mxu0 }
 0xd45   : > { %v3739_v24 = vpop.f32.mrb[73].mxu0  ;;  %v4819_v37 = vadd.f32 %v3737_v4, %v2707_v28 }
 0xd46   : > { %v3741_v35 = vpop.f32.mrb[74].mxu0  ;;  %v4821_v56 = vadd.f32 %v3739_v24, %v2707_v28 }
 0xd47   : > { %v3742_v34 = vpop.f32.mrb[75].mxu0 }
 0xd95   : > { %v4073_v14 = vpop.f32.mrb[40].mxu1 }
 0xd96   : > { %v4820_v16 = vadd.f32 %v4819_v37, %v4073_v14  ;;  %v4075_v60 = vpop.f32.mrb[41].mxu1 }
 0xd97   : > { %v4822_v22 = vadd.f32 %v4821_v56, %v4075_v60  ;;  %v4077_v29 = vpop.f32.mrb[42].mxu1 }
 0xd98   : > { %v4371_v20 = vmul.f32 -1.442695, %v4820_v16  ;;  %v4078_v12 = vpop.f32.mrb[43].mxu1 }
 0xd99   : > { %v4372_v63 = vmul.f32 -1.442695, %v4822_v22 }
 0xd9a   : > { %4983 = vpow2.f32 %v4371_v20 }
 0xd9b   : > { %4985 = vpow2.f32 %v4372_v63 }
 0xda4   : > { %v4984_v13 = vpop.eup %4983 }
 0xda5   : > { %v4986_v3 = vpop.eup %4985  ;;  %v4088_v42 = vadd.f32 1.0, %v4984_v13 }
 0xda6   : > { %v4089_v7 = vadd.f32 1.0, %v4986_v3 }
 0xda7   : > { %4987 = vrcp.f32 %v4088_v42 }
 0xda8   : > { %4989 = vrcp.f32 %v4089_v7 }
 0xdb1   : > { %v4988_v58 = vpop.eup %4987 }
 0xdb2   : > { %v4990_v9 = vpop.eup %4989  ;;  %v4094_v50 = vmul.f32 %v4988_v58, %v4820_v16 }
 0xdb3   : > { %v4095_v2 = vmul.f32 %v4990_v9, %v4822_v22 }
 0xdb4   : > { %4096 = vst [vmem:[%s278_s28] sm:$0xff] %v4094_v50 }
 0xdb5   : > { %4097 = vst [vmem:[%s278_s28 + $0x8] sm:$0xff] %v4095_v2 }
 0xdb6 PF: > { %s17_s24 = sadd.s32 1, %s5014_s24  }
 0xdb7   : > { %p14_p4 = scmp.ge.s32.totalorder %s17_s24, 4  }
 0xdb9   :  { %16 = sbr.rel (!%p14_p4) target bundleno = 1 (0x1), region = 101 }

</bundles_post_ra>
